<compile_context>
chip_gen: v7x
topology: tpu7x:2x2x1
jax: 0.10.0
libtpu: 0.0.40
codegen_flags: <defaults>
</compile_context>

<pallas_src>
import jax
import jax.numpy as jnp
from jax.experimental import pallas as pl
from jax.experimental.pallas import tpu as pltpu

NUM_CLASS = 10
CLS_PAD = 16              # one-hot / class-bias rows padded to a sublane multiple
NKER = 128
HID = 4 * NKER            # 512
IMG_FEAT = 1 * 32 * 32    # 1024  (exact multiple of 128/256 -> clean MXU passes)
OUT_PAD = 128             # final output dim (1) padded up to one lane tile


def _leaky_relu(v, slope=0.2):
    return jnp.where(v > 0, v, slope * v)


def disc_kernel(x_ref, oh_ref, w1_ref, cb_ref, w2_ref, b2_ref,
                w3_ref, b3_ref, w4_ref, b4_ref, o_ref):
    # enc1: Linear(1034, 512) + LeakyReLU.  Image columns of W1: clean K=1024
    # bf16 MXU matmul.  The 10 embedding columns of W1 (+ b1) are pre-folded
    # into a (16, 512) per-class bias table; adding it back is a tiny
    # one-hot matmul instead of a 512-wide f32 per-sample bias stream.
    h = jnp.dot(x_ref[...], w1_ref[...], preferred_element_type=jnp.float32)
    h = h + jnp.dot(oh_ref[...], cb_ref[...],
                    preferred_element_type=jnp.float32)
    h = _leaky_relu(h)
    # enc2: Linear + Dropout(eval: identity) + LeakyReLU(0.2)
    h = jnp.dot(h.astype(jnp.bfloat16), w2_ref[...],
                preferred_element_type=jnp.float32)
    h = _leaky_relu(h + b2_ref[...])
    # enc3: Linear + Dropout(eval: identity) + LeakyReLU(0.2)
    h = jnp.dot(h.astype(jnp.bfloat16), w3_ref[...],
                preferred_element_type=jnp.float32)
    h = _leaky_relu(h + b3_ref[...])
    # enc4: Linear(512, 1) as a VPU multiply + XLU lane reduction instead of
    # a zero-padded (512, 128) MXU pass.  The scalar is broadcast across the
    # 128-lane output block; the wrapper keeps only column 0.
    logit = jnp.sum(h * w4_ref[...], axis=-1, keepdims=True)      # (TB, 1) f32
    o_ref[...] = (logit + b4_ref[...]).astype(o_ref.dtype)        # (TB, 128)


def init_params(key):
    """Raw f32 parameters mirroring the PyTorch module shapes."""
    ks = jax.random.split(key, 9)

    def linear(kw, kb, fan_in, fan_out):
        bound = 1.0 / jnp.sqrt(jnp.float32(fan_in))
        w = jax.random.uniform(kw, (fan_in, fan_out), jnp.float32, -bound, bound)
        b = jax.random.uniform(kb, (fan_out,), jnp.float32, -bound, bound)
        return w, b

    emb = jax.random.normal(ks[0], (NUM_CLASS, NUM_CLASS), jnp.float32)
    w1, b1 = linear(ks[1], ks[2], NUM_CLASS + IMG_FEAT, HID)
    w2, b2 = linear(ks[3], ks[4], HID, HID)
    w3, b3 = linear(ks[5], ks[6], HID, HID)
    w4, b4 = linear(ks[7], ks[8], HID, 1)
    return dict(emb=emb, w1=w1, b1=b1, w2=w2, b2=b2,
                w3=w3, b3=b3, w4=w4, b4=b4)


def pack_params(raw):
    """One-time weight prep (hoisted out of the per-call path)."""
    w1 = raw["w1"]
    # Image columns of W1, stored bf16 for halved HBM weight traffic.
    w1x = w1[:IMG_FEAT].astype(jnp.bfloat16)                          # (1024, 512)
    # Embedding columns of W1 folded (with b1) into a per-class bias table,
    # zero-padded to CLS_PAD rows so the in-kernel one-hot matmul is aligned.
    cls_bias = raw["emb"] @ w1[IMG_FEAT:] + raw["b1"]                 # (10, 512) f32
    cb = jnp.zeros((CLS_PAD, HID), jnp.float32).at[:NUM_CLASS].set(cls_bias)
    # enc4 weight as a single f32 row (elementwise path) + broadcast bias.
    w4row = raw["w4"][:, 0].reshape(1, HID).astype(jnp.float32)       # (1, 512)
    b4row = jnp.full((1, OUT_PAD), raw["b4"][0], jnp.float32)         # (1, 128)
    return dict(
        w1x=w1x, cb=cb,
        w2=raw["w2"].astype(jnp.bfloat16), b2=raw["b2"].reshape(1, HID),
        w3=raw["w3"].astype(jnp.bfloat16), b3=raw["b3"].reshape(1, HID),
        w4row=w4row, b4row=b4row)


def _tile_rows(B):
    """Batch-tile rows.

    Small batches: one tile, rounded up to a sublane multiple.  Large
    batches: the biggest tile <= 512 that still leaves >= 2 grid steps, so
    the ("parallel",) axis can shard over both v7x TensorCores while
    amortizing per-grid-step overhead on v6e/v5e.  VMEM at TB=512 (weights +
    double-buffered streams, ~6-7 MiB) stays under v5e's 16 MiB default.
    """
    if B <= 128:
        return max(8, ((B + 7) // 8) * 8)
    for tb in (512, 256, 128):
        if B >= 2 * tb:
            return tb
    return 128


def _pallas_forward(x_p, oh_p, packed, TB, single_buffer_consts):
    B_pad = x_p.shape[0]
    nsteps = B_pad // TB

    def const(shape):
        # Constant index_map: weights/biases are DMA'd once and stay
        # VMEM-resident across all batch tiles.  Single-buffer them when
        # supported (they never change block index, so the second pipeline
        # buffer is wasted VMEM).
        if single_buffer_consts:
            return pl.BlockSpec(shape, lambda i: (0, 0),
                                pipeline_mode=pl.Buffered(1))
        return pl.BlockSpec(shape, lambda i: (0, 0))

    w_bytes = (2 * (packed["w1x"].size + packed["w2"].size + packed["w3"].size)
               + 4 * (packed["cb"].size + packed["b2"].size + packed["b3"].size
                      + packed["w4row"].size + packed["b4row"].size))
    cost = pl.CostEstimate(
        flops=2 * B_pad * (IMG_FEAT * HID + CLS_PAD * HID
                           + HID * HID + HID * HID + HID),
        transcendentals=0,
        bytes_accessed=(w_bytes + 2 * x_p.size + 4 * oh_p.size
                        + 4 * B_pad * OUT_PAD))

    return pl.pallas_call(
        disc_kernel,
        out_shape=jax.ShapeDtypeStruct((B_pad, OUT_PAD), jnp.float32),
        grid=(nsteps,),
        in_specs=[
            pl.BlockSpec((TB, IMG_FEAT), lambda i: (i, 0)),   # x tile (bf16)
            pl.BlockSpec((TB, CLS_PAD), lambda i: (i, 0)),    # one-hot tile (f32)
            const((IMG_FEAT, HID)),                           # w1 image cols (bf16)
            const((CLS_PAD, HID)),                            # folded class bias (f32)
            const((HID, HID)), const((1, HID)),               # w2, b2
            const((HID, HID)), const((1, HID)),               # w3, b3
            const((1, HID)), const((1, OUT_PAD)),             # w4 row, b4 broadcast
        ],
        out_specs=pl.BlockSpec((TB, OUT_PAD), lambda i: (i, 0)),
        compiler_params=pltpu.CompilerParams(
            dimension_semantics=("parallel",)),
        cost_estimate=cost,
    )(x_p, oh_p, packed["w1x"], packed["cb"], packed["w2"], packed["b2"],
      packed["w3"], packed["b3"], packed["w4row"], packed["b4row"])


def discriminator_forward(x, y, packed):
    B = x.shape[0]
    TB = _tile_rows(B)
    B_pad = ((B + TB - 1) // TB) * TB

    # Glue: flatten image (bf16 stream) and build the tiny one-hot label
    # matrix.  No (B, 512) f32 per-sample bias materialization here.
    xf = x.reshape(B, -1).astype(jnp.bfloat16)                 # (B, 1024)
    oh = jax.nn.one_hot(y, CLS_PAD, dtype=jnp.float32)         # (B, 16)

    if B_pad == B:
        # Divisible batch: skip the zero-pad copies entirely (saves a full
        # extra HBM read+write of the whole batch).
        x_p, oh_p = xf, oh
    else:
        x_p = jnp.zeros((B_pad, IMG_FEAT), jnp.bfloat16).at[:B].set(xf)
        oh_p = jnp.zeros((B_pad, CLS_PAD), jnp.float32).at[:B].set(oh)

    try:
        out_p = _pallas_forward(x_p, oh_p, packed, TB, single_buffer_consts=True)
    except Exception:
        # pipeline_mode=pl.Buffered(1) not supported by this JAX/Mosaic build:
        # retry with default double-buffered constant specs.
        out_p = _pallas_forward(x_p, oh_p, packed, TB, single_buffer_consts=False)

    # Padded rows and the 127 broadcast output columns are owned by this
    # wrapper and sliced off here.
    return out_p[:B, :1]


def reference_forward(x, y, packed):
    """Pure-JAX reference using the identical (bf16-stored) packed params."""
    f32 = jnp.float32
    B = x.shape[0]

    def dot(a, b):
        return jnp.dot(a, b, preferred_element_type=f32,
                       precision=jax.lax.Precision.HIGHEST)

    xf = x.reshape(B, -1).astype(jnp.bfloat16).astype(f32)
    oh = jax.nn.one_hot(y, CLS_PAD, dtype=f32)
    h = _leaky_relu(dot(xf, packed["w1x"].astype(f32)) + dot(oh, packed["cb"]))
    h = _leaky_relu(dot(h.astype(jnp.bfloat16).astype(f32),
                        packed["w2"].astype(f32)) + packed["b2"])
    h = _leaky_relu(dot(h.astype(jnp.bfloat16).astype(f32),
                        packed["w3"].astype(f32)) + packed["b3"])
    logit = jnp.sum(h * packed["w4row"], axis=-1, keepdims=True)
    return logit + packed["b4row"][:, :1]


if __name__ == "__main__":
    key = jax.random.PRNGKey(0)
    k_param, k_x, k_y = jax.random.split(key, 3)

    raw = init_params(k_param)
    packed = pack_params(raw)

    B = 2
    x = jax.random.normal(k_x, (B, 1, 32, 32), jnp.float32)
    y = jax.random.randint(k_y, (B,), 0, NUM_CLASS, jnp.int32)

    out = discriminator_forward(x, y, packed)
    out = jax.block_until_ready(out)

    ref = reference_forward(x, y, packed)
    assert out.shape == (B, 1)
    assert jnp.allclose(out, ref, atol=1e-3, rtol=1e-3), (out, ref)

    print("KERNEL_OK")
</pallas_src>

<mosaic_0001>
module attributes {stable_mosaic.version = 11 : i64} {
  func.func @disc_kernel(%arg0: i32, %arg1: memref<8x1024xbf16, #tpu.memory_space<vmem>>, %arg2: memref<8x16xf32, #tpu.memory_space<vmem>>, %arg3: memref<1024x512xbf16, #tpu.memory_space<vmem>>, %arg4: memref<16x512xf32, #tpu.memory_space<vmem>>, %arg5: memref<512x512xbf16, #tpu.memory_space<vmem>>, %arg6: memref<1x512xf32, #tpu.memory_space<vmem>>, %arg7: memref<512x512xbf16, #tpu.memory_space<vmem>>, %arg8: memref<1x512xf32, #tpu.memory_space<vmem>>, %arg9: memref<1x512xf32, #tpu.memory_space<vmem>>, %arg10: memref<1x128xf32, #tpu.memory_space<vmem>>, %arg11: memref<8x128xf32, #tpu.memory_space<vmem>>) attributes {dimension_semantics = [#tpu.dimension_semantics<parallel>], iteration_bounds = array<i64: 1>, scalar_prefetch = 0 : i64, scratch_operands = 0 : i64, tpu.core_type = #tpu.core_type<tc>, window_params = [{transform_indices = @transform_0, window_bounds = array<i64: 8, 1024>}, {transform_indices = @transform_1, window_bounds = array<i64: 8, 16>}, {pipeline_mode = #tpu.pipeline_mode<synchronous>, transform_indices = @transform_2, window_bounds = array<i64: 1024, 512>}, {pipeline_mode = #tpu.pipeline_mode<synchronous>, transform_indices = @transform_3, window_bounds = array<i64: 16, 512>}, {pipeline_mode = #tpu.pipeline_mode<synchronous>, transform_indices = @transform_4, window_bounds = array<i64: 512, 512>}, {pipeline_mode = #tpu.pipeline_mode<synchronous>, transform_indices = @transform_5, window_bounds = array<i64: 1, 512>}, {pipeline_mode = #tpu.pipeline_mode<synchronous>, transform_indices = @transform_6, window_bounds = array<i64: 512, 512>}, {pipeline_mode = #tpu.pipeline_mode<synchronous>, transform_indices = @transform_7, window_bounds = array<i64: 1, 512>}, {pipeline_mode = #tpu.pipeline_mode<synchronous>, transform_indices = @transform_8, window_bounds = array<i64: 1, 512>}, {pipeline_mode = #tpu.pipeline_mode<synchronous>, transform_indices = @transform_9, window_bounds = array<i64: 1, 128>}, {transform_indices = @transform_10, window_bounds = array<i64: 8, 128>}]} {
    %c0 = arith.constant 0 : index
    %c0_0 = arith.constant 0 : index
    %0 = vector.load %arg1[%c0, %c0_0] : memref<8x1024xbf16, #tpu.memory_space<vmem>>, vector<8x1024xbf16>
    %c0_1 = arith.constant 0 : index
    %c0_2 = arith.constant 0 : index
    %1 = vector.load %arg3[%c0_1, %c0_2] : memref<1024x512xbf16, #tpu.memory_space<vmem>>, vector<1024x512xbf16>
    %cst = arith.constant dense<0.000000e+00> : vector<8x512xf32>
    %2 = tpu.matmul %0, %1, %cst {dimension_numbers = #tpu.dot_dimension_numbers<[1], [0], [0], [1], [0, 0, 1, 1], [], []>} : vector<8x1024xbf16>, vector<1024x512xbf16>, vector<8x512xf32> -> vector<8x512xf32>
    %c0_3 = arith.constant 0 : index
    %c0_4 = arith.constant 0 : index
    %3 = vector.load %arg2[%c0_3, %c0_4] : memref<8x16xf32, #tpu.memory_space<vmem>>, vector<8x16xf32>
    %c0_5 = arith.constant 0 : index
    %c0_6 = arith.constant 0 : index
    %4 = vector.load %arg4[%c0_5, %c0_6] : memref<16x512xf32, #tpu.memory_space<vmem>>, vector<16x512xf32>
    %cst_7 = arith.constant dense<0.000000e+00> : vector<8x512xf32>
    %5 = tpu.matmul %3, %4, %cst_7 {dimension_numbers = #tpu.dot_dimension_numbers<[1], [0], [0], [1], [0, 0, 1, 1], [], []>} : vector<8x16xf32>, vector<16x512xf32>, vector<8x512xf32> -> vector<8x512xf32>
    %6 = arith.addf %2, %5 : vector<8x512xf32>
    %cst_8 = arith.constant 0.000000e+00 : f32
    %7 = vector.broadcast %cst_8 : f32 to vector<8x512xf32>
    %8 = arith.cmpf ogt, %6, %7 : vector<8x512xf32>
    %cst_9 = arith.constant 2.000000e-01 : f32
    %9 = vector.broadcast %cst_9 : f32 to vector<8x512xf32>
    %10 = arith.mulf %9, %6 : vector<8x512xf32>
    %11 = arith.select %8, %6, %10 : vector<8x512xi1>, vector<8x512xf32>
    %12 = arith.truncf %11 : vector<8x512xf32> to vector<8x512xbf16>
    %c0_10 = arith.constant 0 : index
    %c0_11 = arith.constant 0 : index
    %13 = vector.load %arg5[%c0_10, %c0_11] : memref<512x512xbf16, #tpu.memory_space<vmem>>, vector<512x512xbf16>
    %cst_12 = arith.constant dense<0.000000e+00> : vector<8x512xf32>
    %14 = tpu.matmul %12, %13, %cst_12 {dimension_numbers = #tpu.dot_dimension_numbers<[1], [0], [0], [1], [0, 0, 1, 1], [], []>} : vector<8x512xbf16>, vector<512x512xbf16>, vector<8x512xf32> -> vector<8x512xf32>
    %c0_13 = arith.constant 0 : index
    %c0_14 = arith.constant 0 : index
    %15 = vector.load %arg6[%c0_13, %c0_14] : memref<1x512xf32, #tpu.memory_space<vmem>>, vector<1x512xf32>
    %16 = vector.broadcast %15 : vector<1x512xf32> to vector<8x512xf32>
    %17 = arith.addf %14, %16 : vector<8x512xf32>
    %cst_15 = arith.constant 0.000000e+00 : f32
    %18 = vector.broadcast %cst_15 : f32 to vector<8x512xf32>
    %19 = arith.cmpf ogt, %17, %18 : vector<8x512xf32>
    %cst_16 = arith.constant 2.000000e-01 : f32
    %20 = vector.broadcast %cst_16 : f32 to vector<8x512xf32>
    %21 = arith.mulf %20, %17 : vector<8x512xf32>
    %22 = arith.select %19, %17, %21 : vector<8x512xi1>, vector<8x512xf32>
    %23 = arith.truncf %22 : vector<8x512xf32> to vector<8x512xbf16>
    %c0_17 = arith.constant 0 : index
    %c0_18 = arith.constant 0 : index
    %24 = vector.load %arg7[%c0_17, %c0_18] : memref<512x512xbf16, #tpu.memory_space<vmem>>, vector<512x512xbf16>
    %cst_19 = arith.constant dense<0.000000e+00> : vector<8x512xf32>
    %25 = tpu.matmul %23, %24, %cst_19 {dimension_numbers = #tpu.dot_dimension_numbers<[1], [0], [0], [1], [0, 0, 1, 1], [], []>} : vector<8x512xbf16>, vector<512x512xbf16>, vector<8x512xf32> -> vector<8x512xf32>
    %c0_20 = arith.constant 0 : index
    %c0_21 = arith.constant 0 : index
    %26 = vector.load %arg8[%c0_20, %c0_21] : memref<1x512xf32, #tpu.memory_space<vmem>>, vector<1x512xf32>
    %27 = vector.broadcast %26 : vector<1x512xf32> to vector<8x512xf32>
    %28 = arith.addf %25, %27 : vector<8x512xf32>
    %cst_22 = arith.constant 0.000000e+00 : f32
    %29 = vector.broadcast %cst_22 : f32 to vector<8x512xf32>
    %30 = arith.cmpf ogt, %28, %29 : vector<8x512xf32>
    %cst_23 = arith.constant 2.000000e-01 : f32
    %31 = vector.broadcast %cst_23 : f32 to vector<8x512xf32>
    %32 = arith.mulf %31, %28 : vector<8x512xf32>
    %33 = arith.select %30, %28, %32 : vector<8x512xi1>, vector<8x512xf32>
    %c0_24 = arith.constant 0 : index
    %c0_25 = arith.constant 0 : index
    %34 = vector.load %arg9[%c0_24, %c0_25] : memref<1x512xf32, #tpu.memory_space<vmem>>, vector<1x512xf32>
    %35 = vector.broadcast %34 : vector<1x512xf32> to vector<8x512xf32>
    %36 = arith.mulf %33, %35 : vector<8x512xf32>
    %cst_26 = arith.constant dense<0.000000e+00> : vector<8xf32>
    %37 = vector.multi_reduction <add>, %36, %cst_26 [1] : vector<8x512xf32> to vector<8xf32>
    %38 = vector.shape_cast %37 : vector<8xf32> to vector<8x1xf32>
    %c0_27 = arith.constant 0 : index
    %c0_28 = arith.constant 0 : index
    %39 = vector.load %arg10[%c0_27, %c0_28] : memref<1x128xf32, #tpu.memory_space<vmem>>, vector<1x128xf32>
    %40 = vector.broadcast %38 : vector<8x1xf32> to vector<8x128xf32>
    %41 = vector.broadcast %39 : vector<1x128xf32> to vector<8x128xf32>
    %42 = arith.addf %40, %41 : vector<8x128xf32>
    %c0_29 = arith.constant 0 : index
    %c0_30 = arith.constant 0 : index
    %43 = vector.load %arg11[%c0_29, %c0_30] : memref<8x128xf32, #tpu.memory_space<vmem>>, vector<8x128xf32>
    tpu.vector_store %arg11[%c0_29, %c0_30], %42 {strides = array<i32>} : memref<8x128xf32, #tpu.memory_space<vmem>>, vector<8x128xf32>,
    return
  }
  func.func @transform_0(%arg0: i32) -> (i32, i32) {
    %c0_i32 = arith.constant 0 : i32
    %c0_i32_0 = arith.constant 0 : i32
    return %arg0, %c0_i32 : i32, i32
  }
  func.func @transform_1(%arg0: i32) -> (i32, i32) {
    %c0_i32 = arith.constant 0 : i32
    %c0_i32_0 = arith.constant 0 : i32
    return %arg0, %c0_i32 : i32, i32
  }
  func.func @transform_2(%arg0: i32) -> (i32, i32) {
    %c0_i32 = arith.constant 0 : i32
    %c0_i32_0 = arith.constant 0 : i32
    %c0_i32_1 = arith.constant 0 : i32
    return %c0_i32, %c0_i32_0 : i32, i32
  }
  func.func @transform_3(%arg0: i32) -> (i32, i32) {
    %c0_i32 = arith.constant 0 : i32
    %c0_i32_0 = arith.constant 0 : i32
    %c0_i32_1 = arith.constant 0 : i32
    return %c0_i32, %c0_i32_0 : i32, i32
  }
  func.func @transform_4(%arg0: i32) -> (i32, i32) {
    %c0_i32 = arith.constant 0 : i32
    %c0_i32_0 = arith.constant 0 : i32
    %c0_i32_1 = arith.constant 0 : i32
    return %c0_i32, %c0_i32_0 : i32, i32
  }
  func.func @transform_5(%arg0: i32) -> (i32, i32) {
    %c0_i32 = arith.constant 0 : i32
    %c0_i32_0 = arith.constant 0 : i32
    %c0_i32_1 = arith.constant 0 : i32
    return %c0_i32, %c0_i32_0 : i32, i32
  }
  func.func @transform_6(%arg0: i32) -> (i32, i32) {
    %c0_i32 = arith.constant 0 : i32
    %c0_i32_0 = arith.constant 0 : i32
    %c0_i32_1 = arith.constant 0 : i32
    return %c0_i32, %c0_i32_0 : i32, i32
  }
  func.func @transform_7(%arg0: i32) -> (i32, i32) {
    %c0_i32 = arith.constant 0 : i32
    %c0_i32_0 = arith.constant 0 : i32
    %c0_i32_1 = arith.constant 0 : i32
    return %c0_i32, %c0_i32_0 : i32, i32
  }
  func.func @transform_8(%arg0: i32) -> (i32, i32) {
    %c0_i32 = arith.constant 0 : i32
    %c0_i32_0 = arith.constant 0 : i32
    %c0_i32_1 = arith.constant 0 : i32
    return %c0_i32, %c0_i32_0 : i32, i32
  }
  func.func @transform_9(%arg0: i32) -> (i32, i32) {
    %c0_i32 = arith.constant 0 : i32
    %c0_i32_0 = arith.constant 0 : i32
    %c0_i32_1 = arith.constant 0 : i32
    return %c0_i32, %c0_i32_0 : i32, i32
  }
  func.func @transform_10(%arg0: i32) -> (i32, i32) {
    %c0_i32 = arith.constant 0 : i32
    %c0_i32_0 = arith.constant 0 : i32
    return %arg0, %c0_i32 : i32, i32
  }
}

module attributes {stable_mosaic.version = 11 : i64} {
  func.func @disc_kernel(%arg0: i32, %arg1: memref<8x1024xbf16, #tpu.memory_space<vmem>>, %arg2: memref<8x16xf32, #tpu.memory_space<vmem>>, %arg3: memref<1024x512xbf16, #tpu.memory_space<vmem>>, %arg4: memref<16x512xf32, #tpu.memory_space<vmem>>, %arg5: memref<512x512xbf16, #tpu.memory_space<vmem>>, %arg6: memref<1x512xf32, #tpu.memory_space<vmem>>, %arg7: memref<512x512xbf16, #tpu.memory_space<vmem>>, %arg8: memref<1x512xf32, #tpu.memory_space<vmem>>, %arg9: memref<1x512xf32, #tpu.memory_space<vmem>>, %arg10: memref<1x128xf32, #tpu.memory_space<vmem>>, %arg11: memref<8x128xf32, #tpu.memory_space<vmem>>) attributes {dimension_semantics = [#tpu.dimension_semantics<parallel>], iteration_bounds = array<i64: 1>, scalar_prefetch = 0 : i64, scratch_operands = 0 : i64, tpu.core_type = #tpu.core_type<tc>, window_params = [{transform_indices = @transform_0, window_bounds = array<i64: 8, 1024>}, {transform_indices = @transform_1, window_bounds = array<i64: 8, 16>}, {pipeline_mode = #tpu.pipeline_mode<synchronous>, transform_indices = @transform_2, window_bounds = array<i64: 1024, 512>}, {pipeline_mode = #tpu.pipeline_mode<synchronous>, transform_indices = @transform_3, window_bounds = array<i64: 16, 512>}, {pipeline_mode = #tpu.pipeline_mode<synchronous>, transform_indices = @transform_4, window_bounds = array<i64: 512, 512>}, {pipeline_mode = #tpu.pipeline_mode<synchronous>, transform_indices = @transform_5, window_bounds = array<i64: 1, 512>}, {pipeline_mode = #tpu.pipeline_mode<synchronous>, transform_indices = @transform_6, window_bounds = array<i64: 512, 512>}, {pipeline_mode = #tpu.pipeline_mode<synchronous>, transform_indices = @transform_7, window_bounds = array<i64: 1, 512>}, {pipeline_mode = #tpu.pipeline_mode<synchronous>, transform_indices = @transform_8, window_bounds = array<i64: 1, 512>}, {pipeline_mode = #tpu.pipeline_mode<synchronous>, transform_indices = @transform_9, window_bounds = array<i64: 1, 128>}, {transform_indices = @transform_10, window_bounds = array<i64: 8, 128>}]} {
    %c0 = arith.constant 0 : index
    %c0_0 = arith.constant 0 : index
    %0 = vector.load %arg1[%c0, %c0_0] : memref<8x1024xbf16, #tpu.memory_space<vmem>>, vector<8x1024xbf16>
    %c0_1 = arith.constant 0 : index
    %c0_2 = arith.constant 0 : index
    %1 = vector.load %arg3[%c0_1, %c0_2] : memref<1024x512xbf16, #tpu.memory_space<vmem>>, vector<1024x512xbf16>
    %cst = arith.constant dense<0.000000e+00> : vector<8x512xf32>
    %2 = tpu.matmul %0, %1, %cst {dimension_numbers = #tpu.dot_dimension_numbers<[1], [0], [0], [1], [0, 0, 1, 1], [], []>} : vector<8x1024xbf16>, vector<1024x512xbf16>, vector<8x512xf32> -> vector<8x512xf32>
    %c0_3 = arith.constant 0 : index
    %c0_4 = arith.constant 0 : index
    %3 = vector.load %arg2[%c0_3, %c0_4] : memref<8x16xf32, #tpu.memory_space<vmem>>, vector<8x16xf32>
    %c0_5 = arith.constant 0 : index
    %c0_6 = arith.constant 0 : index
    %4 = vector.load %arg4[%c0_5, %c0_6] : memref<16x512xf32, #tpu.memory_space<vmem>>, vector<16x512xf32>
    %cst_7 = arith.constant dense<0.000000e+00> : vector<8x512xf32>
    %5 = tpu.matmul %3, %4, %cst_7 {dimension_numbers = #tpu.dot_dimension_numbers<[1], [0], [0], [1], [0, 0, 1, 1], [], []>} : vector<8x16xf32>, vector<16x512xf32>, vector<8x512xf32> -> vector<8x512xf32>
    %6 = arith.addf %2, %5 : vector<8x512xf32>
    %cst_8 = arith.constant 0.000000e+00 : f32
    %7 = vector.broadcast %cst_8 : f32 to vector<8x512xf32>
    %8 = arith.cmpf ogt, %6, %7 : vector<8x512xf32>
    %cst_9 = arith.constant 2.000000e-01 : f32
    %9 = vector.broadcast %cst_9 : f32 to vector<8x512xf32>
    %10 = arith.mulf %9, %6 : vector<8x512xf32>
    %11 = arith.select %8, %6, %10 : vector<8x512xi1>, vector<8x512xf32>
    %12 = arith.truncf %11 : vector<8x512xf32> to vector<8x512xbf16>
    %c0_10 = arith.constant 0 : index
    %c0_11 = arith.constant 0 : index
    %13 = vector.load %arg5[%c0_10, %c0_11] : memref<512x512xbf16, #tpu.memory_space<vmem>>, vector<512x512xbf16>
    %cst_12 = arith.constant dense<0.000000e+00> : vector<8x512xf32>
    %14 = tpu.matmul %12, %13, %cst_12 {dimension_numbers = #tpu.dot_dimension_numbers<[1], [0], [0], [1], [0, 0, 1, 1], [], []>} : vector<8x512xbf16>, vector<512x512xbf16>, vector<8x512xf32> -> vector<8x512xf32>
    %c0_13 = arith.constant 0 : index
    %c0_14 = arith.constant 0 : index
    %15 = vector.load %arg6[%c0_13, %c0_14] : memref<1x512xf32, #tpu.memory_space<vmem>>, vector<1x512xf32>
    %16 = vector.broadcast %15 : vector<1x512xf32> to vector<8x512xf32>
    %17 = arith.addf %14, %16 : vector<8x512xf32>
    %cst_15 = arith.constant 0.000000e+00 : f32
    %18 = vector.broadcast %cst_15 : f32 to vector<8x512xf32>
    %19 = arith.cmpf ogt, %17, %18 : vector<8x512xf32>
    %cst_16 = arith.constant 2.000000e-01 : f32
    %20 = vector.broadcast %cst_16 : f32 to vector<8x512xf32>
    %21 = arith.mulf %20, %17 : vector<8x512xf32>
    %22 = arith.select %19, %17, %21 : vector<8x512xi1>, vector<8x512xf32>
    %23 = arith.truncf %22 : vector<8x512xf32> to vector<8x512xbf16>
    %c0_17 = arith.constant 0 : index
    %c0_18 = arith.constant 0 : index
    %24 = vector.load %arg7[%c0_17, %c0_18] : memref<512x512xbf16, #tpu.memory_space<vmem>>, vector<512x512xbf16>
    %cst_19 = arith.constant dense<0.000000e+00> : vector<8x512xf32>
    %25 = tpu.matmul %23, %24, %cst_19 {dimension_numbers = #tpu.dot_dimension_numbers<[1], [0], [0], [1], [0, 0, 1, 1], [], []>} : vector<8x512xbf16>, vector<512x512xbf16>, vector<8x512xf32> -> vector<8x512xf32>
    %c0_20 = arith.constant 0 : index
    %c0_21 = arith.constant 0 : index
    %26 = vector.load %arg8[%c0_20, %c0_21] : memref<1x512xf32, #tpu.memory_space<vmem>>, vector<1x512xf32>
    %27 = vector.broadcast %26 : vector<1x512xf32> to vector<8x512xf32>
    %28 = arith.addf %25, %27 : vector<8x512xf32>
    %cst_22 = arith.constant 0.000000e+00 : f32
    %29 = vector.broadcast %cst_22 : f32 to vector<8x512xf32>
    %30 = arith.cmpf ogt, %28, %29 : vector<8x512xf32>
    %cst_23 = arith.constant 2.000000e-01 : f32
    %31 = vector.broadcast %cst_23 : f32 to vector<8x512xf32>
    %32 = arith.mulf %31, %28 : vector<8x512xf32>
    %33 = arith.select %30, %28, %32 : vector<8x512xi1>, vector<8x512xf32>
    %c0_24 = arith.constant 0 : index
    %c0_25 = arith.constant 0 : index
    %34 = vector.load %arg9[%c0_24, %c0_25] : memref<1x512xf32, #tpu.memory_space<vmem>>, vector<1x512xf32>
    %35 = vector.broadcast %34 : vector<1x512xf32> to vector<8x512xf32>
    %36 = arith.mulf %33, %35 : vector<8x512xf32>
    %cst_26 = arith.constant dense<0.000000e+00> : vector<8xf32>
    %37 = vector.multi_reduction <add>, %36, %cst_26 [1] : vector<8x512xf32> to vector<8xf32>
    %38 = vector.shape_cast %37 : vector<8xf32> to vector<8x1xf32>
    %c0_27 = arith.constant 0 : index
    %c0_28 = arith.constant 0 : index
    %39 = vector.load %arg10[%c0_27, %c0_28] : memref<1x128xf32, #tpu.memory_space<vmem>>, vector<1x128xf32>
    %40 = vector.broadcast %38 : vector<8x1xf32> to vector<8x128xf32>
    %41 = vector.broadcast %39 : vector<1x128xf32> to vector<8x128xf32>
    %42 = arith.addf %40, %41 : vector<8x128xf32>
    %c0_29 = arith.constant 0 : index
    %c0_30 = arith.constant 0 : index
    %43 = vector.load %arg11[%c0_29, %c0_30] : memref<8x128xf32, #tpu.memory_space<vmem>>, vector<8x128xf32>
    tpu.vector_store %arg11[%c0_29, %c0_30], %42 {strides = array<i32>} : memref<8x128xf32, #tpu.memory_space<vmem>>, vector<8x128xf32>,
    return
  }
  func.func @transform_0(%arg0: i32) -> (i32, i32) {
    %c0_i32 = arith.constant 0 : i32
    %c0_i32_0 = arith.constant 0 : i32
    return %arg0, %c0_i32 : i32, i32
  }
  func.func @transform_1(%arg0: i32) -> (i32, i32) {
    %c0_i32 = arith.constant 0 : i32
    %c0_i32_0 = arith.constant 0 : i32
    return %arg0, %c0_i32 : i32, i32
  }
  func.func @transform_2(%arg0: i32) -> (i32, i32) {
    %c0_i32 = arith.constant 0 : i32
    %c0_i32_0 = arith.constant 0 : i32
    %c0_i32_1 = arith.constant 0 : i32
    return %c0_i32, %c0_i32_0 : i32, i32
  }
  func.func @transform_3(%arg0: i32) -> (i32, i32) {
    %c0_i32 = arith.constant 0 : i32
    %c0_i32_0 = arith.constant 0 : i32
    %c0_i32_1 = arith.constant 0 : i32
    return %c0_i32, %c0_i32_0 : i32, i32
  }
  func.func @transform_4(%arg0: i32) -> (i32, i32) {
    %c0_i32 = arith.constant 0 : i32
    %c0_i32_0 = arith.constant 0 : i32
    %c0_i32_1 = arith.constant 0 : i32
    return %c0_i32, %c0_i32_0 : i32, i32
  }
  func.func @transform_5(%arg0: i32) -> (i32, i32) {
    %c0_i32 = arith.constant 0 : i32
    %c0_i32_0 = arith.constant 0 : i32
    %c0_i32_1 = arith.constant 0 : i32
    return %c0_i32, %c0_i32_0 : i32, i32
  }
  func.func @transform_6(%arg0: i32) -> (i32, i32) {
    %c0_i32 = arith.constant 0 : i32
    %c0_i32_0 = arith.constant 0 : i32
    %c0_i32_1 = arith.constant 0 : i32
    return %c0_i32, %c0_i32_0 : i32, i32
  }
  func.func @transform_7(%arg0: i32) -> (i32, i32) {
    %c0_i32 = arith.constant 0 : i32
    %c0_i32_0 = arith.constant 0 : i32
    %c0_i32_1 = arith.constant 0 : i32
    return %c0_i32, %c0_i32_0 : i32, i32
  }
  func.func @transform_8(%arg0: i32) -> (i32, i32) {
    %c0_i32 = arith.constant 0 : i32
    %c0_i32_0 = arith.constant 0 : i32
    %c0_i32_1 = arith.constant 0 : i32
    return %c0_i32, %c0_i32_0 : i32, i32
  }
  func.func @transform_9(%arg0: i32) -> (i32, i32) {
    %c0_i32 = arith.constant 0 : i32
    %c0_i32_0 = arith.constant 0 : i32
    %c0_i32_1 = arith.constant 0 : i32
    return %c0_i32, %c0_i32_0 : i32, i32
  }
  func.func @transform_10(%arg0: i32) -> (i32, i32) {
    %c0_i32 = arith.constant 0 : i32
    %c0_i32_0 = arith.constant 0 : i32
    return %arg0, %c0_i32 : i32, i32
  }
}

</mosaic_0001>

<bundles_post_ra>
// kernel: tpu_custom_call.1
= control target key start
LH: loop header
LB: loop body
LE: loop exit
PB: predicated region body
PF: predicated region fallthrough
CT: control target
= control target key end

     0   :  { %15 = vsyncpa [#allocation3], 0  ;;  %s5977_s0 = inlined_call_operand.hbm [shape: bf16[8,1024], index: 0, kind: input, shape index: {}]   ;;  %s5978_s1 = inlined_call_operand.hbm [shape: f32[8,16], index: 1, kind: input, shape index: {}]   ;;  %s5979_s2 = inlined_call_operand.hbm [shape: bf16[1024,512], index: 2, kind: input, shape index: {}]   ;;  %s5980_s3 = inlined_call_operand.hbm [shape: f32[16,512], index: 3, kind: input, shape index: {}]   ;;  %s5981_s4 = inlined_call_operand.hbm [shape: bf16[512,512], index: 4, kind: input, shape index: {}]   ;;  %s5982_s5 = inlined_call_operand.vmem [shape: f32[1,512], index: 5, kind: input, shape index: {}]   ;;  %s5983_s6 = inlined_call_operand.hbm [shape: bf16[512,512], index: 6, kind: input, shape index: {}]   ;;  %s5984_s7 = inlined_call_operand.vmem [shape: f32[1,512], index: 7, kind: input, shape index: {}]   ;;  %s5985_s8 = inlined_call_operand.vmem [shape: f32[1,512], index: 8, kind: input, shape index: {}]   ;;  %s5986_s9 = inlined_call_operand.vmem [shape: f32[1,128], index: 9, kind: input, shape index: {}]   ;;  %s5987_s10 = inlined_call_operand.hbm [shape: f32[8,128], index: 10, kind: output, shape index: {}]  }
   0x1   :  { %16 = vsyncpa [#allocation6], 0 }
   0x2   :  { %17 = vsyncpa [#allocation9], 0 }
   0x3   :  { %18 = vsyncpa [#allocation12], 0 }
   0x4   :  { %19 = vsyncpa [#allocation4], 0  ;;  %s5702_s13 = smov [#allocation5]   ;;  %s5703_s15 = smov [#allocation8]  }
   0x5   :  { %s36_s14 = sshll.u32 %s5702_s13, 4  ;;  %s57_s16 = sshll.u32 %s5703_s15, 4  ;;  %s37_s14 = int_to_ptr.vmem [resolvable:$true] %s36_s14  ;;  %s5769_s16 = int_to_ptr.vmem [resolvable:$true] %s57_s16 }
   0x6   :  { %s5538_s19 = scalar_lea.hbm %s5978_s1, 128 }
   0x7   :  { %p5539_p0 = scmp.ne.s32.totalorder %s5978_s1, %s5538_s19  ;;  %p5542_p1 = scmp.lt.u32.totalorder %s5538_s19, %s5978_s1 }
   0x9   :  { %p5544_p2 = pnand %p5542_p1, %p5539_p0 }
   0xb   :  { %5547 = shalt.err (!%p5544_p2)
}
   0xc   :  { %s5548_s24 = scalar_lea.vmem %s37_s14, 128  ;;  %p5553_p4 = scmp.lt.s32.totalorder %s37_s14, %s37_s14 }
   0xd   :  { %p5549_p3 = scmp.ne.s32.totalorder %s37_s14, %s5548_s24  ;;  %p5554_p5 = scmp.lt.s32.totalorder %s5548_s24, %s5548_s24 }
   0xf   :  { %p5555_p6 = por %p5554_p5, %p5553_p4 }
  0x11   :  { %p5556_p7 = pnand %p5555_p6, %p5549_p3 }
  0x13   :  { %5559 = shalt.err (!%p5556_p7)
}
  0x14   :  { %39 = dma.hbm_to_vmem [thread:$0]  %s5978_s1, 128, %s37_s14, [#allocation6]  }
  0x15   :  { %s5560_s29 = scalar_lea.hbm %s5980_s3, 1024 }
  0x16   :  { %p5561_p8 = scmp.ne.s32.totalorder %s5980_s3, %s5560_s29  ;;  %p5564_p9 = scmp.lt.u32.totalorder %s5560_s29, %s5980_s3 }
  0x18   :  { %p5566_p10 = pnand %p5564_p9, %p5561_p8 }
  0x1a   :  { %5569 = shalt.err (!%p5566_p10)
}
  0x1b   :  { %s5570_s15 = scalar_lea.vmem %s5769_s16, 1024  ;;  %p5575_p12 = scmp.lt.s32.totalorder %s5769_s16, %s5769_s16 }
  0x1c   :  { %p5571_p11 = scmp.ne.s32.totalorder %s5769_s16, %s5570_s15  ;;  %p5576_p13 = scmp.lt.s32.totalorder %s5570_s15, %s5570_s15 }
  0x1e   :  { %p5577_p0 = por %p5576_p13, %p5575_p12 }
  0x20   :  { %p5578_p1 = pnand %p5577_p0, %p5571_p11 }
  0x22   :  { %5581 = shalt.err (!%p5578_p1)
}
  0x23   :  { %s5704_s1 = smov 512   ;;  %s5705_s14 = smov 32  }
  0x24   :  { %63 = dma.hbm_to_vmem [thread:$0]  %s5980_s3, 1024, %s5769_s16, [#allocation9], %s5704_s1, %s5704_s1, %s5705_s14  }
  0x25   :  { %s5706_s19 = smov [#allocation2]   ;;  %s5707_s21 = smov [#allocation7]  }
  0x26   :  { %s26_s20 = sshll.u32 %s5706_s19, 4  ;;  %s45_s22 = sshll.u32 %s5707_s21, 4  ;;  %s27_s20 = int_to_ptr.vmem [resolvable:$true] %s26_s20  ;;  %s5800_s22 = int_to_ptr.vmem [resolvable:$true] %s45_s22 }
  0x27   :  { %s5582_s25 = scalar_lea.hbm %s5977_s0, 512 }
  0x28   :  { %p5583_p2 = scmp.ne.s32.totalorder %s5977_s0, %s5582_s25  ;;  %p5586_p3 = scmp.lt.u32.totalorder %s5582_s25, %s5977_s0 }
  0x2a   :  { %p5588_p4 = pnand %p5586_p3, %p5583_p2 }
  0x2c   :  { %5591 = shalt.err (!%p5588_p4)
}
  0x2d   :  { %s5592_s3 = scalar_lea.vmem %s27_s20, 512  ;;  %p5597_p6 = scmp.lt.s32.totalorder %s27_s20, %s27_s20 }
  0x2e   :  { %p5593_p5 = scmp.ne.s32.totalorder %s27_s20, %s5592_s3  ;;  %p5598_p7 = scmp.lt.s32.totalorder %s5592_s3, %s5592_s3 }
  0x30   :  { %p5599_p8 = por %p5598_p7, %p5597_p6 }
  0x32   :  { %p5600_p9 = pnand %p5599_p8, %p5593_p5 }
  0x34   :  { %5603 = shalt.err (!%p5600_p9)
}
  0x35   :  { %29 = dma.hbm_to_vmem [thread:$0]  %s5977_s0, 512, %s27_s20, [#allocation3]  }
  0x36   :  { %s5604_s13 = scalar_lea.hbm %s5979_s2, 32768 }
  0x37   :  { %p5605_p10 = scmp.ne.s32.totalorder %s5979_s2, %s5604_s13  ;;  %p5608_p11 = scmp.lt.u32.totalorder %s5604_s13, %s5979_s2 }
  0x39   :  { %p5610_p12 = pnand %p5608_p11, %p5605_p10 }
  0x3b   :  { %5613 = shalt.err (!%p5610_p12)
}
  0x3c   :  { %s5614_s18 = scalar_lea.vmem %s5800_s22, 32768  ;;  %p5619_p0 = scmp.lt.s32.totalorder %s5800_s22, %s5800_s22 }
  0x3d   :  { %p5615_p13 = scmp.ne.s32.totalorder %s5800_s22, %s5614_s18  ;;  %p5620_p1 = scmp.lt.s32.totalorder %s5614_s18, %s5614_s18 }
  0x3f   :  { %p5621_p2 = por %p5620_p1, %p5619_p0 }
  0x41   :  { %p5622_p3 = pnand %p5621_p2, %p5615_p13 }
  0x43   :  { %5625 = shalt.err (!%p5622_p3)
}
  0x44   :  { %s5708_s0 = smov 256   ;;  %s5709_s19 = smov 16  }
  0x45   :  { %51 = dma.hbm_to_vmem [thread:$0]  %s5979_s2, 32768, %s5800_s22, [#allocation6], %s5708_s0, %s5708_s0, %s5709_s19  }
  0x46   :  { %s5710_s23 = smov [#allocation10]   ;;  %s5711_s25 = smov [#allocation11]  }
  0x47   :  { %s69_s24 = sshll.u32 %s5710_s23, 4  ;;  %s83_s26 = sshll.u32 %s5711_s25, 4  ;;  %s70_s24 = int_to_ptr.vmem [resolvable:$true] %s69_s24  ;;  %s5834_s26 = int_to_ptr.vmem [resolvable:$true] %s83_s26 }
  0x48   :  { %s5626_s29 = scalar_lea.hbm %s5981_s4, 16384 }
  0x49   :  { %p5627_p4 = scmp.ne.s32.totalorder %s5981_s4, %s5626_s29  ;;  %p5630_p5 = scmp.lt.u32.totalorder %s5626_s29, %s5981_s4 }
  0x4b   :  { %p5632_p6 = pnand %p5630_p5, %p5627_p4 }
  0x4d   :  { %5635 = shalt.err (!%p5632_p6)
}
  0x4e   :  { %s5636_s2 = scalar_lea.vmem %s70_s24, 16384  ;;  %p5641_p8 = scmp.lt.s32.totalorder %s70_s24, %s70_s24 }
  0x4f   :  { %p5637_p7 = scmp.ne.s32.totalorder %s70_s24, %s5636_s2  ;;  %p5642_p9 = scmp.lt.s32.totalorder %s5636_s2, %s5636_s2 }
  0x51   :  { %p5643_p10 = por %p5642_p9, %p5641_p8 }
  0x53   :  { %p5644_p11 = pnand %p5643_p10, %p5637_p7 }
  0x55   :  { %5647 = shalt.err (!%p5644_p11)
}
  0x56   :  { %75 = dma.hbm_to_vmem [thread:$0]  %s5981_s4, 16384, %s70_s24, [#allocation9], %s5708_s0, %s5708_s0, %s5709_s19  }
  0x57   :  { %s5648_s1 = scalar_lea.hbm %s5983_s6, 16384 }
  0x58   :  { %p5649_p12 = scmp.ne.s32.totalorder %s5983_s6, %s5648_s1  ;;  %p5652_p13 = scmp.lt.u32.totalorder %s5648_s1, %s5983_s6 }
  0x5a   :  { %p5654_p0 = pnand %p5652_p13, %p5649_p12 }
  0x5c   :  { %5657 = shalt.err (!%p5654_p0)
}
  0x5d   :  { %s5658_s21 = scalar_lea.vmem %s5834_s26, 16384  ;;  %p5663_p2 = scmp.lt.s32.totalorder %s5834_s26, %s5834_s26 }
  0x5e   :  { %p5659_p1 = scmp.ne.s32.totalorder %s5834_s26, %s5658_s21  ;;  %p5664_p3 = scmp.lt.s32.totalorder %s5658_s21, %s5658_s21 }
  0x60   :  { %p5665_p4 = por %p5664_p3, %p5663_p2 }
  0x62   :  { %p5666_p5 = pnand %p5665_p4, %p5659_p1 }
  0x64   :  { %5669 = shalt.err (!%p5666_p5)
}
  0x65   :  { %89 = dma.hbm_to_vmem [thread:$0]  %s5983_s6, 16384, %s5834_s26, [#allocation12], %s5708_s0, %s5708_s0, %s5709_s19  }
  0x66   :  { %5692 = dma.done.wait [#allocation3], 512  }
  0x67   :  { %5693 = vsyncadd [#allocation3], 4294966784 }
  0x68   :  { %5694 = dma.done.wait [#allocation6], 32896  }
  0x69   :  { %5695 = vsyncadd [#allocation6], 4294934400 }
  0x6a   :  { %5696 = dma.done.wait [#allocation9], 17408  }
  0x6b   :  { %5697 = vsyncadd [#allocation9], 4294949888 }
  0x6c   :  { %5698 = dma.done.wait [#allocation12], 16384  }
  0x6d   :  { %5699 = vsyncadd [#allocation12], 4294950912  ;;  %v5712_v0 = vmov 0.0   ;;  %v376_v1 = vld [vmem:[#allocation8 + $0x8] sm:$0xff]  ;;  %v378_v3 = vld [vmem:[#allocation8 + $0x18] sm:$0xff]  ;;  %vm383_vm0 = vcmask 130048  }
  0x6e   :  { %522 = vmatprep.mubr.f32.mxu1 %v5712_v0  ;;  %451 = vmatprep.mubr.f32.mxu0 %v5712_v0  ;;  %v380_v2 = vld [vmem:[#allocation8 + $0x28] sm:$0xff]  ;;  %v382_v5 = vld [vmem:[#allocation8 + $0x38] sm:$0xff]  ;;  %v375_v6 = vld [vmem:[#allocation8] sm:$0xff]  ;;  %s5713_s26 = smov [#allocation13]  }
  0x6f   :  { %v4698_v4 = vpack.c.bf16 %v380_v2, %v376_v1  ;;  %v379_v7 = vld [vmem:[#allocation8 + $0x20] sm:$0xff]  ;;  %v4702_v8 = vpack.c.bf16 %v382_v5, %v378_v3  ;;  %v377_v10 = vld [vmem:[#allocation8 + $0x10] sm:$0xff]  ;;  %v374_v12 = vld [vmem:[#allocation5] sm:$0xff]  ;;  %s4163_s27 = sshll.u32 %s5713_s26, 4  ;;  %s4164_s27 = int_to_ptr.vmem [resolvable:$true] %s4163_s27 }
  0x70   :  { %v4700_v9 = vpack.c.bf16 %v379_v7, %v375_v6  ;;  %v381_v11 = vld [vmem:[#allocation8 + $0x30] sm:$0xff]  ;;  %v4765_v16 = vld [vmem:[#allocation7 + $0x8] ss:$16 sps:$4 sm:$0xff]   ;;  %v4767_v17 = vld [vmem:[#allocation7 + $0xc] ss:$16 sps:$4 sm:$0xff]   ;;  %s5670_s28 = scalar_lea.vmem %s4164_s27, 128  ;;  %p5675_p7 = scmp.lt.s32.totalorder %s4164_s27, %s4164_s27 }
  0x71   :  { %4699 = vmatprep.subr.bf16.mxu0 %v4698_v4  ;;  %v4704_v13 = vpack.c.bf16 %v381_v11, %v377_v10  ;;  %v4762_v14 = vld [vmem:[#allocation7] ss:$16 sps:$4 sm:$0xff]   ;;  %4703 = vmatprep.subr.bf16.mxu1 %v4702_v8  ;;  %v4764_v15 = vld [vmem:[#allocation7 + $0x4] ss:$16 sps:$4 sm:$0xff]   ;;  %v4771_v19 = vld [vmem:[#allocation7 + $0x28] ss:$16 sps:$4 sm:$0xff]   ;;  %p5671_p6 = scmp.ne.s32.totalorder %s4164_s27, %s5670_s28  ;;  %p5676_p8 = scmp.lt.s32.totalorder %s5670_s28, %s5670_s28 }
  0x72   :  { %4701 = vmatpush1.bf16.msra.mxu0 %v4700_v9  ;;  %v4770_v18 = vld [vmem:[#allocation7 + $0x24] ss:$16 sps:$4 sm:$0xff]   ;;  %v4773_v20 = vld [vmem:[#allocation7 + $0x2c] ss:$16 sps:$4 sm:$0xff]   ;;  %v4768_v21 = vld [vmem:[#allocation7 + $0x20] ss:$16 sps:$4 sm:$0xff]  }
  0x73   :  { %4705 = vmatpush1.bf16.msra.mxu1 %v4704_v13  ;;  %2001 = vmatprep.subr.bf16.mxu0 %v4767_v17  ;;  %v4776_v22 = vld [vmem:[#allocation7 + $0x44] ss:$16 sps:$4 sm:$0xff]   ;;  %v4779_v23 = vld [vmem:[#allocation7 + $0x4c] ss:$16 sps:$4 sm:$0xff]   ;;  %v4777_v24 = vld [vmem:[#allocation7 + $0x48] ss:$16 sps:$4 sm:$0xff]   ;;  %p5677_p9 = por %p5676_p8, %p5675_p7 }
  0x74   :  { %1837 = vmatprep.subr.bf16.mxu1 %v4764_v15  ;;  %v4774_v25 = vld [vmem:[#allocation7 + $0x40] ss:$16 sps:$4 sm:$0xff]   ;;  %v4785_v26 = vld [vmem:[#allocation7 + $0x6c] ss:$16 sps:$4 sm:$0xff]   ;;  %v4782_v27 = vld [vmem:[#allocation7 + $0x64] ss:$16 sps:$4 sm:$0xff]  }
  0x75   :  { %4175 = vmatmul.mubr.msk.f32.vlgmr.msra.gmra.mrb[0].mxu0 %vm383_vm0, %v374_v12  ;;  %v4783_v28 = vld [vmem:[#allocation7 + $0x68] ss:$16 sps:$4 sm:$0xff]   ;;  %v4780_v29 = vld [vmem:[#allocation7 + $0x60] ss:$16 sps:$4 sm:$0xff]   ;;  %v4791_v30 = vld [vmem:[#allocation7 + $0x8c] ss:$16 sps:$4 sm:$0xff]   ;;  %p5678_p10 = pnand %p5677_p9, %p5671_p6 }
  0x76   :  { %4176 = vmatmul.mubr.msk.f32.vlgmr.msra.gmra.mrb[0].mxu1 %vm383_vm0, %v374_v12  ;;  %2002 = vmatpush1.bf16.msra.mxu0 %v4765_v16  ;;  %v4788_v31 = vld [vmem:[#allocation7 + $0x84] ss:$16 sps:$4 sm:$0xff]   ;;  %v4789_v32 = vld [vmem:[#allocation7 + $0x88] ss:$16 sps:$4 sm:$0xff]   ;;  %v4786_v33 = vld [vmem:[#allocation7 + $0x80] ss:$16 sps:$4 sm:$0xff]  }
  0x77   :  { %1838 = vmatpush1.bf16.msra.mxu1 %v4762_v14  ;;  %2003 = vmatprep.subr.bf16.mxu0 %v4773_v20  ;;  %v4797_v34 = vld [vmem:[#allocation7 + $0xac] ss:$16 sps:$4 sm:$0xff]   ;;  %v4794_v35 = vld [vmem:[#allocation7 + $0xa4] ss:$16 sps:$4 sm:$0xff]   ;;  %v4795_v36 = vld [vmem:[#allocation7 + $0xa8] ss:$16 sps:$4 sm:$0xff]  }
  0x78   :  { %1839 = vmatprep.subr.bf16.mxu1 %v4770_v18  ;;  %v4792_v37 = vld [vmem:[#allocation7 + $0xa0] ss:$16 sps:$4 sm:$0xff]   ;;  %v4803_v38 = vld [vmem:[#allocation7 + $0xcc] ss:$16 sps:$4 sm:$0xff]   ;;  %v4800_v39 = vld [vmem:[#allocation7 + $0xc4] ss:$16 sps:$4 sm:$0xff]  }
  0x79   :  { %v4801_v40 = vld [vmem:[#allocation7 + $0xc8] ss:$16 sps:$4 sm:$0xff]   ;;  %v4798_v41 = vld [vmem:[#allocation7 + $0xc0] ss:$16 sps:$4 sm:$0xff]   ;;  %v4809_v42 = vld [vmem:[#allocation7 + $0xec] ss:$16 sps:$4 sm:$0xff]  }
  0x7a   :  { %2004 = vmatpush1.bf16.msra.mxu0 %v4771_v19  ;;  %v4806_v43 = vld [vmem:[#allocation7 + $0xe4] ss:$16 sps:$4 sm:$0xff]   ;;  %v4807_v44 = vld [vmem:[#allocation7 + $0xe8] ss:$16 sps:$4 sm:$0xff]   ;;  %v4804_v45 = vld [vmem:[#allocation7 + $0xe0] ss:$16 sps:$4 sm:$0xff]  }
  0x7b   :  { %1840 = vmatpush1.bf16.msra.mxu1 %v4768_v21  ;;  %2005 = vmatprep.subr.bf16.mxu0 %v4779_v23  ;;  %v4815_v46 = vld [vmem:[#allocation7 + $0x10c] ss:$16 sps:$4 sm:$0xff]   ;;  %v4812_v47 = vld [vmem:[#allocation7 + $0x104] ss:$16 sps:$4 sm:$0xff]   ;;  %v4813_v48 = vld [vmem:[#allocation7 + $0x108] ss:$16 sps:$4 sm:$0xff]  }
  0x7c   :  { %1841 = vmatprep.subr.bf16.mxu1 %v4776_v22  ;;  %v4810_v49 = vld [vmem:[#allocation7 + $0x100] ss:$16 sps:$4 sm:$0xff]   ;;  %v4821_v50 = vld [vmem:[#allocation7 + $0x12c] ss:$16 sps:$4 sm:$0xff]   ;;  %v4818_v51 = vld [vmem:[#allocation7 + $0x124] ss:$16 sps:$4 sm:$0xff]  }
  0x7d   :  { %v4819_v52 = vld [vmem:[#allocation7 + $0x128] ss:$16 sps:$4 sm:$0xff]   ;;  %v4816_v53 = vld [vmem:[#allocation7 + $0x120] ss:$16 sps:$4 sm:$0xff]   ;;  %v4827_v54 = vld [vmem:[#allocation7 + $0x14c] ss:$16 sps:$4 sm:$0xff]  }
  0x7e   :  { %2006 = vmatpush1.bf16.msra.mxu0 %v4777_v24  ;;  %v4824_v55 = vld [vmem:[#allocation7 + $0x144] ss:$16 sps:$4 sm:$0xff]   ;;  %v4825_v56 = vld [vmem:[#allocation7 + $0x148] ss:$16 sps:$4 sm:$0xff]   ;;  %v4822_v57 = vld [vmem:[#allocation7 + $0x140] ss:$16 sps:$4 sm:$0xff]  }
  0x7f   :  { %1842 = vmatpush1.bf16.msra.mxu1 %v4774_v25  ;;  %2007 = vmatprep.subr.bf16.mxu0 %v4785_v26  ;;  %v4833_v58 = vld [vmem:[#allocation7 + $0x16c] ss:$16 sps:$4 sm:$0xff]   ;;  %v4830_v60 = vld [vmem:[#allocation7 + $0x164] ss:$16 sps:$4 sm:$0xff]   ;;  %v4831_v62 = vld [vmem:[#allocation7 + $0x168] ss:$16 sps:$4 sm:$0xff]  }
  0x80   :  { %1843 = vmatprep.subr.bf16.mxu1 %v4782_v27  ;;  %v114_v59 = vld [vmem:[#allocation2] sm:$0xff]  ;;  %v4828_v63 = vld [vmem:[#allocation7 + $0x160] ss:$16 sps:$4 sm:$0xff]   ;;  %v4836_v1 = vld [vmem:[#allocation7 + $0x184] ss:$16 sps:$4 sm:$0xff]  }
  0x81   :  { %v4178_v61 = vcombine.high %v114_v59, %v114_v59  ;;  %v4839_v0 = vld [vmem:[#allocation7 + $0x18c] ss:$16 sps:$4 sm:$0xff]   ;;  %v4837_v2 = vld [vmem:[#allocation7 + $0x188] ss:$16 sps:$4 sm:$0xff]   ;;  %v4834_v3 = vld [vmem:[#allocation7 + $0x180] ss:$16 sps:$4 sm:$0xff]   ;;  %v4177_v18 = vcombine.low %v114_v59, %v114_v59 }
  0x82   :  { %2008 = vmatpush1.bf16.msra.mxu0 %v4783_v28  ;;  %v4845_v4 = vld [vmem:[#allocation7 + $0x1ac] ss:$16 sps:$4 sm:$0xff]   ;;  %v4842_v5 = vld [vmem:[#allocation7 + $0x1a4] ss:$16 sps:$4 sm:$0xff]   ;;  %v4843_v6 = vld [vmem:[#allocation7 + $0x1a8] ss:$16 sps:$4 sm:$0xff]  }
  0x83   :  { %1844 = vmatpush1.bf16.msra.mxu1 %v4780_v29  ;;  %2009 = vmatprep.subr.bf16.mxu0 %v4791_v30  ;;  %v4840_v7 = vld [vmem:[#allocation7 + $0x1a0] ss:$16 sps:$4 sm:$0xff]   ;;  %v4851_v8 = vld [vmem:[#allocation7 + $0x1cc] ss:$16 sps:$4 sm:$0xff]   ;;  %v4848_v9 = vld [vmem:[#allocation7 + $0x1c4] ss:$16 sps:$4 sm:$0xff]  }
  0x84   :  { %1845 = vmatprep.subr.bf16.mxu1 %v4788_v31  ;;  %1869 = vmatprep.mubr.bf16.mxu1 %v4178_v61  ;;  %v4849_v10 = vld [vmem:[#allocation7 + $0x1c8] ss:$16 sps:$4 sm:$0xff]   ;;  %v4846_v11 = vld [vmem:[#allocation7 + $0x1c0] ss:$16 sps:$4 sm:$0xff]   ;;  %v4857_v12 = vld [vmem:[#allocation7 + $0x1ec] ss:$16 sps:$4 sm:$0xff]  }
  0x85   :  { %2033 = vmatprep.mubr.bf16.mxu0 %v4178_v61  ;;  %v4854_v13 = vld [vmem:[#allocation7 + $0x1e4] ss:$16 sps:$4 sm:$0xff]   ;;  %v4855_v14 = vld [vmem:[#allocation7 + $0x1e8] ss:$16 sps:$4 sm:$0xff]   ;;  %v4852_v15 = vld [vmem:[#allocation7 + $0x1e0] ss:$16 sps:$4 sm:$0xff]  }
  0x86   :  { %2010 = vmatpush1.bf16.msra.mxu0 %v4789_v32  ;;  %v4865_v16 = vld [vmem:[#allocation7 + $0x20c] ss:$16 sps:$4 sm:$0xff]   ;;  %v4862_v17 = vld [vmem:[#allocation7 + $0x204] ss:$16 sps:$4 sm:$0xff]   ;;  %v4863_v19 = vld [vmem:[#allocation7 + $0x208] ss:$16 sps:$4 sm:$0xff]  }
  0x87   :  { %1846 = vmatpush1.bf16.msra.mxu1 %v4786_v33  ;;  %2011 = vmatprep.subr.bf16.mxu0 %v4797_v34  ;;  %v4860_v20 = vld [vmem:[#allocation7 + $0x200] ss:$16 sps:$4 sm:$0xff]   ;;  %v4871_v21 = vld [vmem:[#allocation7 + $0x22c] ss:$16 sps:$4 sm:$0xff]   ;;  %v4868_v22 = vld [vmem:[#allocation7 + $0x224] ss:$16 sps:$4 sm:$0xff]  }
  0x88   :  { %1847 = vmatprep.subr.bf16.mxu1 %v4794_v35  ;;  %v4869_v23 = vld [vmem:[#allocation7 + $0x228] ss:$16 sps:$4 sm:$0xff]   ;;  %v4866_v24 = vld [vmem:[#allocation7 + $0x220] ss:$16 sps:$4 sm:$0xff]   ;;  %v4877_v25 = vld [vmem:[#allocation7 + $0x24c] ss:$16 sps:$4 sm:$0xff]  }
  0x89   :  { %v4874_v26 = vld [vmem:[#allocation7 + $0x244] ss:$16 sps:$4 sm:$0xff]   ;;  %v4875_v27 = vld [vmem:[#allocation7 + $0x248] ss:$16 sps:$4 sm:$0xff]   ;;  %v4872_v28 = vld [vmem:[#allocation7 + $0x240] ss:$16 sps:$4 sm:$0xff]  }
  0x8a   :  { %2012 = vmatpush1.bf16.msra.mxu0 %v4795_v36  ;;  %v4883_v29 = vld [vmem:[#allocation7 + $0x26c] ss:$16 sps:$4 sm:$0xff]   ;;  %v4880_v30 = vld [vmem:[#allocation7 + $0x264] ss:$16 sps:$4 sm:$0xff]   ;;  %v4881_v31 = vld [vmem:[#allocation7 + $0x268] ss:$16 sps:$4 sm:$0xff]  }
  0x8b   :  { %1848 = vmatpush1.bf16.msra.mxu1 %v4792_v37  ;;  %2013 = vmatprep.subr.bf16.mxu0 %v4803_v38  ;;  %v4878_v32 = vld [vmem:[#allocation7 + $0x260] ss:$16 sps:$4 sm:$0xff]   ;;  %v4889_v33 = vld [vmem:[#allocation7 + $0x28c] ss:$16 sps:$4 sm:$0xff]   ;;  %v4886_v34 = vld [vmem:[#allocation7 + $0x284] ss:$16 sps:$4 sm:$0xff]  }
  0x8c   :  { %1849 = vmatprep.subr.bf16.mxu1 %v4800_v39  ;;  %v4887_v35 = vld [vmem:[#allocation7 + $0x288] ss:$16 sps:$4 sm:$0xff]   ;;  %v4884_v36 = vld [vmem:[#allocation7 + $0x280] ss:$16 sps:$4 sm:$0xff]   ;;  %v4895_v37 = vld [vmem:[#allocation7 + $0x2ac] ss:$16 sps:$4 sm:$0xff]  }
  0x8d   :  { %v4892_v38 = vld [vmem:[#allocation7 + $0x2a4] ss:$16 sps:$4 sm:$0xff]   ;;  %v4890_v39 = vld [vmem:[#allocation7 + $0x2a0] ss:$16 sps:$4 sm:$0xff]   ;;  %v4925_v59 = vld [vmem:[#allocation7 + $0x34c] ss:$16 sps:$4 sm:$0xff]  }
  0x8e   :  { %2014 = vmatpush1.bf16.msra.mxu0 %v4801_v40  ;;  %v4893_v40 = vld [vmem:[#allocation7 + $0x2a8] ss:$16 sps:$4 sm:$0xff]   ;;  %v4920_v61 = vld [vmem:[#allocation7 + $0x340] ss:$16 sps:$4 sm:$0xff]  }
  0x8f   :  { %1850 = vmatpush1.bf16.msra.mxu1 %v4798_v41  ;;  %2015 = vmatprep.subr.bf16.mxu0 %v4809_v42  ;;  %v5871_v41 = vld [vmem:[#allocation2 + $0x8] sm:$0xff]  ;;  %v4901_v42 = vld [vmem:[#allocation7 + $0x2cc] ss:$16 sps:$4 sm:$0xff]  }
  0x90   :  { %1851 = vmatprep.subr.bf16.mxu1 %v4806_v43  ;;  %v4180_v43 = vcombine.high %v5871_v41, %v5871_v41 }
  0x92   :  { %2016 = vmatpush1.bf16.msra.mxu0 %v4807_v44  ;;  %v4898_v44 = vld [vmem:[#allocation7 + $0x2c4] ss:$16 sps:$4 sm:$0xff]  }
  0x93   :  { %1852 = vmatpush1.bf16.msra.mxu1 %v4804_v45  ;;  %2017 = vmatprep.subr.bf16.mxu0 %v4815_v46  ;;  %v4896_v45 = vld [vmem:[#allocation7 + $0x2c0] ss:$16 sps:$4 sm:$0xff]   ;;  %v4899_v46 = vld [vmem:[#allocation7 + $0x2c8] ss:$16 sps:$4 sm:$0xff]  }
  0x94   :  { %1853 = vmatprep.subr.bf16.mxu1 %v4812_v47  ;;  %v4907_v47 = vld [vmem:[#allocation7 + $0x2ec] ss:$16 sps:$4 sm:$0xff]  }
  0x96   :  { %2018 = vmatpush1.bf16.msra.mxu0 %v4813_v48  ;;  %v4904_v48 = vld [vmem:[#allocation7 + $0x2e4] ss:$16 sps:$4 sm:$0xff]  }
  0x97   :  { %1854 = vmatpush1.bf16.msra.mxu1 %v4810_v49  ;;  %2019 = vmatprep.subr.bf16.mxu0 %v4821_v50  ;;  %v4902_v49 = vld [vmem:[#allocation7 + $0x2e0] ss:$16 sps:$4 sm:$0xff]   ;;  %v4905_v50 = vld [vmem:[#allocation7 + $0x2e8] ss:$16 sps:$4 sm:$0xff]  }
  0x98   :  { %1855 = vmatprep.subr.bf16.mxu1 %v4818_v51  ;;  %v4913_v51 = vld [vmem:[#allocation7 + $0x30c] ss:$16 sps:$4 sm:$0xff]  }
  0x9a   :  { %2020 = vmatpush1.bf16.msra.mxu0 %v4819_v52  ;;  %v4910_v52 = vld [vmem:[#allocation7 + $0x304] ss:$16 sps:$4 sm:$0xff]  }
  0x9b   :  { %1856 = vmatpush1.bf16.msra.mxu1 %v4816_v53  ;;  %2021 = vmatprep.subr.bf16.mxu0 %v4827_v54  ;;  %v4908_v53 = vld [vmem:[#allocation7 + $0x300] ss:$16 sps:$4 sm:$0xff]   ;;  %v4911_v54 = vld [vmem:[#allocation7 + $0x308] ss:$16 sps:$4 sm:$0xff]  }
  0x9c   :  { %1857 = vmatprep.subr.bf16.mxu1 %v4824_v55  ;;  %v4919_v55 = vld [vmem:[#allocation7 + $0x32c] ss:$16 sps:$4 sm:$0xff]  }
  0x9e   :  { %2022 = vmatpush1.bf16.msra.mxu0 %v4825_v56  ;;  %v4916_v56 = vld [vmem:[#allocation7 + $0x324] ss:$16 sps:$4 sm:$0xff]  }
  0x9f   :  { %1858 = vmatpush1.bf16.msra.mxu1 %v4822_v57  ;;  %2023 = vmatprep.subr.bf16.mxu0 %v4833_v58  ;;  %v4914_v57 = vld [vmem:[#allocation7 + $0x320] ss:$16 sps:$4 sm:$0xff]   ;;  %v4917_v58 = vld [vmem:[#allocation7 + $0x328] ss:$16 sps:$4 sm:$0xff]  }
  0xa0   :  { %1859 = vmatprep.subr.bf16.mxu1 %v4830_v60  ;;  %v4922_v60 = vld [vmem:[#allocation7 + $0x344] ss:$16 sps:$4 sm:$0xff]  }
  0xa2   :  { %2024 = vmatpush1.bf16.msra.mxu0 %v4831_v62  ;;  %v4923_v62 = vld [vmem:[#allocation7 + $0x348] ss:$16 sps:$4 sm:$0xff]  }
  0xa3   :  { %1860 = vmatpush1.bf16.msra.mxu1 %v4828_v63  ;;  %2025 = vmatprep.subr.bf16.mxu0 %v4839_v0  ;;  %v4931_v63 = vld [vmem:[#allocation7 + $0x36c] ss:$16 sps:$4 sm:$0xff]   ;;  %v4928_v0 = vld [vmem:[#allocation7 + $0x364] ss:$16 sps:$4 sm:$0xff]  }
  0xa4   :  { %1861 = vmatprep.subr.bf16.mxu1 %v4836_v1  ;;  %v4926_v1 = vld [vmem:[#allocation7 + $0x360] ss:$16 sps:$4 sm:$0xff]  }
  0xa6   :  { %2026 = vmatpush1.bf16.msra.mxu0 %v4837_v2  ;;  %v4929_v2 = vld [vmem:[#allocation7 + $0x368] ss:$16 sps:$4 sm:$0xff]  }
  0xa7   :  { %1862 = vmatpush1.bf16.msra.mxu1 %v4834_v3  ;;  %2027 = vmatprep.subr.bf16.mxu0 %v4845_v4  ;;  %v4937_v3 = vld [vmem:[#allocation7 + $0x38c] ss:$16 sps:$4 sm:$0xff]   ;;  %v4934_v4 = vld [vmem:[#allocation7 + $0x384] ss:$16 sps:$4 sm:$0xff]  }
  0xa8   :  { %1863 = vmatprep.subr.bf16.mxu1 %v4842_v5  ;;  %v4932_v5 = vld [vmem:[#allocation7 + $0x380] ss:$16 sps:$4 sm:$0xff]  }
  0xaa   :  { %2028 = vmatpush1.bf16.msra.mxu0 %v4843_v6  ;;  %v4935_v6 = vld [vmem:[#allocation7 + $0x388] ss:$16 sps:$4 sm:$0xff]  }
  0xab   :  { %1864 = vmatpush1.bf16.msra.mxu1 %v4840_v7  ;;  %2029 = vmatprep.subr.bf16.mxu0 %v4851_v8  ;;  %v4943_v7 = vld [vmem:[#allocation7 + $0x3ac] ss:$16 sps:$4 sm:$0xff]   ;;  %v4940_v8 = vld [vmem:[#allocation7 + $0x3a4] ss:$16 sps:$4 sm:$0xff]  }
  0xac   :  { %1865 = vmatprep.subr.bf16.mxu1 %v4848_v9  ;;  %v4938_v9 = vld [vmem:[#allocation7 + $0x3a0] ss:$16 sps:$4 sm:$0xff]  }
  0xae   :  { %2030 = vmatpush1.bf16.msra.mxu0 %v4849_v10  ;;  %v4941_v10 = vld [vmem:[#allocation7 + $0x3a8] ss:$16 sps:$4 sm:$0xff]  }
  0xaf   :  { %1866 = vmatpush1.bf16.msra.mxu1 %v4846_v11  ;;  %2031 = vmatprep.subr.bf16.mxu0 %v4857_v12  ;;  %v4949_v11 = vld [vmem:[#allocation7 + $0x3cc] ss:$16 sps:$4 sm:$0xff]   ;;  %v4946_v12 = vld [vmem:[#allocation7 + $0x3c4] ss:$16 sps:$4 sm:$0xff]  }
  0xb0   :  { %1867 = vmatprep.subr.bf16.mxu1 %v4854_v13  ;;  %v4944_v13 = vld [vmem:[#allocation7 + $0x3c0] ss:$16 sps:$4 sm:$0xff]  }
  0xb2   :  { %2032 = vmatpush1.bf16.msra.mxu0 %v4855_v14  ;;  %v4947_v14 = vld [vmem:[#allocation7 + $0x3c8] ss:$16 sps:$4 sm:$0xff]  }
  0xb3   :  { %1868 = vmatpush1.bf16.msra.mxu1 %v4852_v15  ;;  %2042 = vmatprep.subr.bf16.mxu0 %v4865_v16  ;;  %v4955_v15 = vld [vmem:[#allocation7 + $0x3ec] ss:$16 sps:$4 sm:$0xff]   ;;  %v4952_v16 = vld [vmem:[#allocation7 + $0x3e4] ss:$16 sps:$4 sm:$0xff]  }
  0xb4   :  { %1878 = vmatprep.subr.bf16.mxu1 %v4862_v17  ;;  %v4950_v17 = vld [vmem:[#allocation7 + $0x3e0] ss:$16 sps:$4 sm:$0xff]  }
  0xb5   :  { %2034 = vmatmul.mubr.bf16.vlgmr.msra.gmra.mrb[4].mxu0 %v4177_v18 }
  0xb6   :  { %1870 = vmatmul.mubr.bf16.vlgmr.msra.gmra.mrb[4].mxu1 %v4177_v18  ;;  %2043 = vmatpush1.bf16.msra.mxu0 %v4863_v19  ;;  %v4953_v18 = vld [vmem:[#allocation7 + $0x3e8] ss:$16 sps:$4 sm:$0xff]   ;;  %v4963_v19 = vld [vmem:[#allocation7 + $0x40c] ss:$16 sps:$4 sm:$0xff]  }
  0xb7   :  { %1879 = vmatpush1.bf16.msra.mxu1 %v4860_v20  ;;  %2044 = vmatprep.subr.bf16.mxu0 %v4871_v21  ;;  %v4960_v20 = vld [vmem:[#allocation7 + $0x404] ss:$16 sps:$4 sm:$0xff]   ;;  %v4179_v21 = vcombine.low %v5871_v41, %v5871_v41  ;;  %v4985_v41 = vld [vmem:[#allocation7 + $0x488] ss:$16 sps:$4 sm:$0xff]  }
  0xb8   :  { %1880 = vmatprep.subr.bf16.mxu1 %v4868_v22  ;;  %1910 = vmatprep.mubr.bf16.mxu1 %v4180_v43  ;;  %v4958_v22 = vld [vmem:[#allocation7 + $0x400] ss:$16 sps:$4 sm:$0xff]  }
  0xb9   :  { %2074 = vmatprep.mubr.bf16.mxu0 %v4180_v43  ;;  %v4990_v43 = vld [vmem:[#allocation7 + $0x4a4] ss:$16 sps:$4 sm:$0xff]  }
  0xba   :  { %2045 = vmatpush1.bf16.msra.mxu0 %v4869_v23  ;;  %v5877_v23 = vld [vmem:[#allocation2 + $0x10] sm:$0xff] }
  0xbb   :  { %1881 = vmatpush1.bf16.msra.mxu1 %v4866_v24  ;;  %2046 = vmatprep.subr.bf16.mxu0 %v4877_v25  ;;  %v4961_v24 = vld [vmem:[#allocation7 + $0x408] ss:$16 sps:$4 sm:$0xff]   ;;  %v4969_v25 = vld [vmem:[#allocation7 + $0x42c] ss:$16 sps:$4 sm:$0xff]  }
  0xbc   :  { %1882 = vmatprep.subr.bf16.mxu1 %v4874_v26  ;;  %v4966_v26 = vld [vmem:[#allocation7 + $0x424] ss:$16 sps:$4 sm:$0xff]  }
  0xbe   :  { %2047 = vmatpush1.bf16.msra.mxu0 %v4875_v27  ;;  %v4182_v27 = vcombine.high %v5877_v23, %v5877_v23 }
  0xbf   :  { %1883 = vmatpush1.bf16.msra.mxu1 %v4872_v28  ;;  %2048 = vmatprep.subr.bf16.mxu0 %v4883_v29  ;;  %v4964_v28 = vld [vmem:[#allocation7 + $0x420] ss:$16 sps:$4 sm:$0xff]   ;;  %v4967_v29 = vld [vmem:[#allocation7 + $0x428] ss:$16 sps:$4 sm:$0xff]  }
  0xc0   :  { %1884 = vmatprep.subr.bf16.mxu1 %v4880_v30  ;;  %v4975_v30 = vld [vmem:[#allocation7 + $0x44c] ss:$16 sps:$4 sm:$0xff]  }
  0xc2   :  { %2049 = vmatpush1.bf16.msra.mxu0 %v4881_v31  ;;  %v4972_v31 = vld [vmem:[#allocation7 + $0x444] ss:$16 sps:$4 sm:$0xff]  }
  0xc3   :  { %1885 = vmatpush1.bf16.msra.mxu1 %v4878_v32  ;;  %2050 = vmatprep.subr.bf16.mxu0 %v4889_v33  ;;  %v4970_v32 = vld [vmem:[#allocation7 + $0x440] ss:$16 sps:$4 sm:$0xff]   ;;  %v4973_v33 = vld [vmem:[#allocation7 + $0x448] ss:$16 sps:$4 sm:$0xff]  }
  0xc4   :  { %1886 = vmatprep.subr.bf16.mxu1 %v4886_v34  ;;  %v4981_v34 = vld [vmem:[#allocation7 + $0x46c] ss:$16 sps:$4 sm:$0xff]  }
  0xc6   :  { %2051 = vmatpush1.bf16.msra.mxu0 %v4887_v35  ;;  %v4978_v35 = vld [vmem:[#allocation7 + $0x464] ss:$16 sps:$4 sm:$0xff]  }
  0xc7   :  { %1887 = vmatpush1.bf16.msra.mxu1 %v4884_v36  ;;  %2052 = vmatprep.subr.bf16.mxu0 %v4895_v37  ;;  %v4976_v36 = vld [vmem:[#allocation7 + $0x460] ss:$16 sps:$4 sm:$0xff]   ;;  %v4979_v37 = vld [vmem:[#allocation7 + $0x468] ss:$16 sps:$4 sm:$0xff]  }
  0xc8   :  { %1888 = vmatprep.subr.bf16.mxu1 %v4892_v38  ;;  %v4987_v38 = vld [vmem:[#allocation7 + $0x48c] ss:$16 sps:$4 sm:$0xff]  }
  0xca   :  { %2053 = vmatpush1.bf16.msra.mxu0 %v4893_v40  ;;  %v4982_v40 = vld [vmem:[#allocation7 + $0x480] ss:$16 sps:$4 sm:$0xff]  }
  0xcb   :  { %1889 = vmatpush1.bf16.msra.mxu1 %v4890_v39  ;;  %2054 = vmatprep.subr.bf16.mxu0 %v4901_v42  ;;  %v4984_v39 = vld [vmem:[#allocation7 + $0x484] ss:$16 sps:$4 sm:$0xff]   ;;  %v4993_v42 = vld [vmem:[#allocation7 + $0x4ac] ss:$16 sps:$4 sm:$0xff]  }
  0xcc   :  { %1890 = vmatprep.subr.bf16.mxu1 %v4898_v44  ;;  %v4988_v44 = vld [vmem:[#allocation7 + $0x4a0] ss:$16 sps:$4 sm:$0xff]  }
  0xce   :  { %2055 = vmatpush1.bf16.msra.mxu0 %v4899_v46  ;;  %v4999_v46 = vld [vmem:[#allocation7 + $0x4cc] ss:$16 sps:$4 sm:$0xff]  }
  0xcf   :  { %1891 = vmatpush1.bf16.msra.mxu1 %v4896_v45  ;;  %2056 = vmatprep.subr.bf16.mxu0 %v4907_v47  ;;  %v4991_v45 = vld [vmem:[#allocation7 + $0x4a8] ss:$16 sps:$4 sm:$0xff]   ;;  %v4996_v47 = vld [vmem:[#allocation7 + $0x4c4] ss:$16 sps:$4 sm:$0xff]  }
  0xd0   :  { %1892 = vmatprep.subr.bf16.mxu1 %v4904_v48  ;;  %v4994_v48 = vld [vmem:[#allocation7 + $0x4c0] ss:$16 sps:$4 sm:$0xff]  }
  0xd2   :  { %2057 = vmatpush1.bf16.msra.mxu0 %v4905_v50  ;;  %v5005_v50 = vld [vmem:[#allocation7 + $0x4ec] ss:$16 sps:$4 sm:$0xff]  }
  0xd3   :  { %1893 = vmatpush1.bf16.msra.mxu1 %v4902_v49  ;;  %2058 = vmatprep.subr.bf16.mxu0 %v4913_v51  ;;  %v4997_v49 = vld [vmem:[#allocation7 + $0x4c8] ss:$16 sps:$4 sm:$0xff]   ;;  %v5002_v51 = vld [vmem:[#allocation7 + $0x4e4] ss:$16 sps:$4 sm:$0xff]  }
  0xd4   :  { %1894 = vmatprep.subr.bf16.mxu1 %v4910_v52  ;;  %v5000_v52 = vld [vmem:[#allocation7 + $0x4e0] ss:$16 sps:$4 sm:$0xff]  }
  0xd6   :  { %2059 = vmatpush1.bf16.msra.mxu0 %v4911_v54  ;;  %v5011_v54 = vld [vmem:[#allocation7 + $0x50c] ss:$16 sps:$4 sm:$0xff]  }
  0xd7   :  { %1895 = vmatpush1.bf16.msra.mxu1 %v4908_v53  ;;  %2060 = vmatprep.subr.bf16.mxu0 %v4919_v55  ;;  %v5003_v53 = vld [vmem:[#allocation7 + $0x4e8] ss:$16 sps:$4 sm:$0xff]   ;;  %v5008_v55 = vld [vmem:[#allocation7 + $0x504] ss:$16 sps:$4 sm:$0xff]  }
  0xd8   :  { %1896 = vmatprep.subr.bf16.mxu1 %v4916_v56  ;;  %v5006_v56 = vld [vmem:[#allocation7 + $0x500] ss:$16 sps:$4 sm:$0xff]  }
  0xda   :  { %2061 = vmatpush1.bf16.msra.mxu0 %v4917_v58  ;;  %v5017_v58 = vld [vmem:[#allocation7 + $0x52c] ss:$16 sps:$4 sm:$0xff]  }
  0xdb   :  { %1897 = vmatpush1.bf16.msra.mxu1 %v4914_v57  ;;  %2062 = vmatprep.subr.bf16.mxu0 %v4925_v59  ;;  %v5009_v57 = vld [vmem:[#allocation7 + $0x508] ss:$16 sps:$4 sm:$0xff]   ;;  %v5014_v59 = vld [vmem:[#allocation7 + $0x524] ss:$16 sps:$4 sm:$0xff]  }
  0xdc   :  { %1898 = vmatprep.subr.bf16.mxu1 %v4922_v60  ;;  %v5012_v60 = vld [vmem:[#allocation7 + $0x520] ss:$16 sps:$4 sm:$0xff]  }
  0xde   :  { %2063 = vmatpush1.bf16.msra.mxu0 %v4923_v62  ;;  %v5023_v62 = vld [vmem:[#allocation7 + $0x54c] ss:$16 sps:$4 sm:$0xff]  }
  0xdf   :  { %1899 = vmatpush1.bf16.msra.mxu1 %v4920_v61  ;;  %2064 = vmatprep.subr.bf16.mxu0 %v4931_v63  ;;  %v5015_v61 = vld [vmem:[#allocation7 + $0x528] ss:$16 sps:$4 sm:$0xff]   ;;  %v5020_v63 = vld [vmem:[#allocation7 + $0x544] ss:$16 sps:$4 sm:$0xff]  }
  0xe0   :  { %1900 = vmatprep.subr.bf16.mxu1 %v4928_v0  ;;  %v5018_v0 = vld [vmem:[#allocation7 + $0x540] ss:$16 sps:$4 sm:$0xff]  }
  0xe2   :  { %2065 = vmatpush1.bf16.msra.mxu0 %v4929_v2  ;;  %v5029_v2 = vld [vmem:[#allocation7 + $0x56c] ss:$16 sps:$4 sm:$0xff]  }
  0xe3   :  { %1901 = vmatpush1.bf16.msra.mxu1 %v4926_v1  ;;  %2066 = vmatprep.subr.bf16.mxu0 %v4937_v3  ;;  %v5021_v1 = vld [vmem:[#allocation7 + $0x548] ss:$16 sps:$4 sm:$0xff]   ;;  %v5026_v3 = vld [vmem:[#allocation7 + $0x564] ss:$16 sps:$4 sm:$0xff]  }
  0xe4   :  { %1902 = vmatprep.subr.bf16.mxu1 %v4934_v4  ;;  %v5027_v4 = vld [vmem:[#allocation7 + $0x568] ss:$16 sps:$4 sm:$0xff]  }
  0xe6   :  { %2067 = vmatpush1.bf16.msra.mxu0 %v4935_v6  ;;  %v5035_v6 = vld [vmem:[#allocation7 + $0x58c] ss:$16 sps:$4 sm:$0xff]  }
  0xe7   :  { %1903 = vmatpush1.bf16.msra.mxu1 %v4932_v5  ;;  %2068 = vmatprep.subr.bf16.mxu0 %v4943_v7  ;;  %v5024_v5 = vld [vmem:[#allocation7 + $0x560] ss:$16 sps:$4 sm:$0xff]   ;;  %v5032_v7 = vld [vmem:[#allocation7 + $0x584] ss:$16 sps:$4 sm:$0xff]  }
  0xe8   :  { %1904 = vmatprep.subr.bf16.mxu1 %v4940_v8  ;;  %v5033_v8 = vld [vmem:[#allocation7 + $0x588] ss:$16 sps:$4 sm:$0xff]  }
  0xea   :  { %2069 = vmatpush1.bf16.msra.mxu0 %v4941_v10  ;;  %v5041_v10 = vld [vmem:[#allocation7 + $0x5ac] ss:$16 sps:$4 sm:$0xff]  }
  0xeb   :  { %1905 = vmatpush1.bf16.msra.mxu1 %v4938_v9  ;;  %2070 = vmatprep.subr.bf16.mxu0 %v4949_v11  ;;  %v5030_v9 = vld [vmem:[#allocation7 + $0x580] ss:$16 sps:$4 sm:$0xff]   ;;  %v5038_v11 = vld [vmem:[#allocation7 + $0x5a4] ss:$16 sps:$4 sm:$0xff]  }
  0xec   :  { %1906 = vmatprep.subr.bf16.mxu1 %v4946_v12  ;;  %v5039_v12 = vld [vmem:[#allocation7 + $0x5a8] ss:$16 sps:$4 sm:$0xff]  }
  0xee   :  { %2071 = vmatpush1.bf16.msra.mxu0 %v4947_v14  ;;  %v5047_v14 = vld [vmem:[#allocation7 + $0x5cc] ss:$16 sps:$4 sm:$0xff]  }
  0xef   :  { %1907 = vmatpush1.bf16.msra.mxu1 %v4944_v13  ;;  %2072 = vmatprep.subr.bf16.mxu0 %v4955_v15  ;;  %v5036_v13 = vld [vmem:[#allocation7 + $0x5a0] ss:$16 sps:$4 sm:$0xff]   ;;  %v5044_v15 = vld [vmem:[#allocation7 + $0x5c4] ss:$16 sps:$4 sm:$0xff]  }
  0xf0   :  { %1908 = vmatprep.subr.bf16.mxu1 %v4952_v16  ;;  %v5045_v16 = vld [vmem:[#allocation7 + $0x5c8] ss:$16 sps:$4 sm:$0xff]  }
  0xf2   :  { %2073 = vmatpush1.bf16.msra.mxu0 %v4953_v18  ;;  %v5053_v18 = vld [vmem:[#allocation7 + $0x5ec] ss:$16 sps:$4 sm:$0xff]  }
  0xf3   :  { %1909 = vmatpush1.bf16.msra.mxu1 %v4950_v17  ;;  %2083 = vmatprep.subr.bf16.mxu0 %v4963_v19  ;;  %v5042_v17 = vld [vmem:[#allocation7 + $0x5c0] ss:$16 sps:$4 sm:$0xff]   ;;  %v5050_v19 = vld [vmem:[#allocation7 + $0x5e4] ss:$16 sps:$4 sm:$0xff]  }
  0xf4   :  { %1919 = vmatprep.subr.bf16.mxu1 %v4960_v20  ;;  %v5051_v20 = vld [vmem:[#allocation7 + $0x5e8] ss:$16 sps:$4 sm:$0xff]  }
  0xf5   :  { %2075 = vmatmul.mubr.bf16.vlgmr.msra.gmra.mrb[8].mxu0 %v4179_v21 }
  0xf6   :  { %1911 = vmatmul.mubr.bf16.vlgmr.msra.gmra.mrb[8].mxu1 %v4179_v21  ;;  %2084 = vmatpush1.bf16.msra.mxu0 %v4961_v24  ;;  %v5048_v21 = vld [vmem:[#allocation7 + $0x5e0] ss:$16 sps:$4 sm:$0xff]   ;;  %v5058_v24 = vld [vmem:[#allocation7 + $0x604] ss:$16 sps:$4 sm:$0xff]  }
  0xf7   :  { %1920 = vmatpush1.bf16.msra.mxu1 %v4958_v22  ;;  %2085 = vmatprep.subr.bf16.mxu0 %v4969_v25  ;;  %v5061_v22 = vld [vmem:[#allocation7 + $0x60c] ss:$16 sps:$4 sm:$0xff]   ;;  %v4181_v25 = vcombine.low %v5877_v23, %v5877_v23 }
  0xf8   :  { %1921 = vmatprep.subr.bf16.mxu1 %v4966_v26  ;;  %1951 = vmatprep.mubr.bf16.mxu1 %v4182_v27  ;;  %v5883_v26 = vld [vmem:[#allocation2 + $0x18] sm:$0xff]  ;;  %v5073_v23 = vld [vmem:[#allocation7 + $0x64c] ss:$16 sps:$4 sm:$0xff]  }
  0xf9   :  { %2115 = vmatprep.mubr.bf16.mxu0 %v4182_v27  ;;  %v5059_v27 = vld [vmem:[#allocation7 + $0x608] ss:$16 sps:$4 sm:$0xff]  }
  0xfa   :  { %2086 = vmatpush1.bf16.msra.mxu0 %v4967_v29  ;;  %v5067_v29 = vld [vmem:[#allocation7 + $0x62c] ss:$16 sps:$4 sm:$0xff]  }
  0xfb   :  { %1922 = vmatpush1.bf16.msra.mxu1 %v4964_v28  ;;  %2087 = vmatprep.subr.bf16.mxu0 %v4975_v30  ;;  %v5056_v28 = vld [vmem:[#allocation7 + $0x600] ss:$16 sps:$4 sm:$0xff]   ;;  %v5064_v30 = vld [vmem:[#allocation7 + $0x624] ss:$16 sps:$4 sm:$0xff]  }
  0xfc   :  { %1923 = vmatprep.subr.bf16.mxu1 %v4972_v31  ;;  %v4184_v31 = vcombine.high %v5883_v26, %v5883_v26 }
  0xfe   :  { %2088 = vmatpush1.bf16.msra.mxu0 %v4973_v33  ;;  %v5062_v33 = vld [vmem:[#allocation7 + $0x620] ss:$16 sps:$4 sm:$0xff]  }
  0xff   :  { %1924 = vmatpush1.bf16.msra.mxu1 %v4970_v32  ;;  %2089 = vmatprep.subr.bf16.mxu0 %v4981_v34  ;;  %v5065_v32 = vld [vmem:[#allocation7 + $0x628] ss:$16 sps:$4 sm:$0xff]   ;;  %v5070_v34 = vld [vmem:[#allocation7 + $0x644] ss:$16 sps:$4 sm:$0xff]  }
 0x100   :  { %1925 = vmatprep.subr.bf16.mxu1 %v4978_v35  ;;  %v5071_v35 = vld [vmem:[#allocation7 + $0x648] ss:$16 sps:$4 sm:$0xff]  }
 0x102   :  { %2090 = vmatpush1.bf16.msra.mxu0 %v4979_v37  ;;  %v5079_v37 = vld [vmem:[#allocation7 + $0x66c] ss:$16 sps:$4 sm:$0xff]  }
 0x103   :  { %1926 = vmatpush1.bf16.msra.mxu1 %v4976_v36  ;;  %2091 = vmatprep.subr.bf16.mxu0 %v4987_v38  ;;  %v5068_v36 = vld [vmem:[#allocation7 + $0x640] ss:$16 sps:$4 sm:$0xff]   ;;  %v5076_v38 = vld [vmem:[#allocation7 + $0x664] ss:$16 sps:$4 sm:$0xff]  }
 0x104   :  { %1927 = vmatprep.subr.bf16.mxu1 %v4984_v39  ;;  %v5077_v39 = vld [vmem:[#allocation7 + $0x668] ss:$16 sps:$4 sm:$0xff]  }
 0x106   :  { %2092 = vmatpush1.bf16.msra.mxu0 %v4985_v41  ;;  %v5085_v41 = vld [vmem:[#allocation7 + $0x68c] ss:$16 sps:$4 sm:$0xff]  }
 0x107   :  { %1928 = vmatpush1.bf16.msra.mxu1 %v4982_v40  ;;  %2093 = vmatprep.subr.bf16.mxu0 %v4993_v42  ;;  %v5074_v40 = vld [vmem:[#allocation7 + $0x660] ss:$16 sps:$4 sm:$0xff]   ;;  %v5082_v42 = vld [vmem:[#allocation7 + $0x684] ss:$16 sps:$4 sm:$0xff]  }
 0x108   :  { %1929 = vmatprep.subr.bf16.mxu1 %v4990_v43  ;;  %v5080_v43 = vld [vmem:[#allocation7 + $0x680] ss:$16 sps:$4 sm:$0xff]  }
 0x10a   :  { %2094 = vmatpush1.bf16.msra.mxu0 %v4991_v45  ;;  %v5088_v45 = vld [vmem:[#allocation7 + $0x6a4] ss:$16 sps:$4 sm:$0xff]  }
 0x10b   :  { %1930 = vmatpush1.bf16.msra.mxu1 %v4988_v44  ;;  %2095 = vmatprep.subr.bf16.mxu0 %v4999_v46  ;;  %v5083_v44 = vld [vmem:[#allocation7 + $0x688] ss:$16 sps:$4 sm:$0xff]   ;;  %v5091_v46 = vld [vmem:[#allocation7 + $0x6ac] ss:$16 sps:$4 sm:$0xff]  }
 0x10c   :  { %1931 = vmatprep.subr.bf16.mxu1 %v4996_v47  ;;  %v5089_v47 = vld [vmem:[#allocation7 + $0x6a8] ss:$16 sps:$4 sm:$0xff]  }
 0x10e   :  { %2096 = vmatpush1.bf16.msra.mxu0 %v4997_v49  ;;  %v5097_v49 = vld [vmem:[#allocation7 + $0x6cc] ss:$16 sps:$4 sm:$0xff]  }
 0x10f   :  { %1932 = vmatpush1.bf16.msra.mxu1 %v4994_v48  ;;  %2097 = vmatprep.subr.bf16.mxu0 %v5005_v50  ;;  %v5086_v48 = vld [vmem:[#allocation7 + $0x6a0] ss:$16 sps:$4 sm:$0xff]   ;;  %v5094_v50 = vld [vmem:[#allocation7 + $0x6c4] ss:$16 sps:$4 sm:$0xff]  }
 0x110   :  { %1933 = vmatprep.subr.bf16.mxu1 %v5002_v51  ;;  %v5095_v51 = vld [vmem:[#allocation7 + $0x6c8] ss:$16 sps:$4 sm:$0xff]  }
 0x112   :  { %2098 = vmatpush1.bf16.msra.mxu0 %v5003_v53 }
 0x113   :  { %1934 = vmatpush1.bf16.msra.mxu1 %v5000_v52  ;;  %2099 = vmatprep.subr.bf16.mxu0 %v5011_v54  ;;  %v5092_v54 = vld [vmem:[#allocation7 + $0x6c0] ss:$16 sps:$4 sm:$0xff]  }
 0x114   :  { %1935 = vmatprep.subr.bf16.mxu1 %v5008_v55  ;;  %v5103_v55 = vld [vmem:[#allocation7 + $0x6ec] ss:$16 sps:$4 sm:$0xff]  }
 0x116   :  { %2100 = vmatpush1.bf16.msra.mxu0 %v5009_v57 }
 0x117   :  { %1936 = vmatpush1.bf16.msra.mxu1 %v5006_v56  ;;  %2101 = vmatprep.subr.bf16.mxu0 %v5017_v58  ;;  %v5100_v58 = vld [vmem:[#allocation7 + $0x6e4] ss:$16 sps:$4 sm:$0xff]  }
 0x118   :  { %1937 = vmatprep.subr.bf16.mxu1 %v5014_v59  ;;  %v5101_v59 = vld [vmem:[#allocation7 + $0x6e8] ss:$16 sps:$4 sm:$0xff]  }
 0x11a   :  { %2102 = vmatpush1.bf16.msra.mxu0 %v5015_v61  ;;  %v5109_v61 = vld [vmem:[#allocation7 + $0x70c] ss:$16 sps:$4 sm:$0xff]  }
 0x11b   :  { %1938 = vmatpush1.bf16.msra.mxu1 %v5012_v60  ;;  %2103 = vmatprep.subr.bf16.mxu0 %v5023_v62  ;;  %v5098_v60 = vld [vmem:[#allocation7 + $0x6e0] ss:$16 sps:$4 sm:$0xff]   ;;  %v5106_v62 = vld [vmem:[#allocation7 + $0x704] ss:$16 sps:$4 sm:$0xff]  }
 0x11c   :  { %1939 = vmatprep.subr.bf16.mxu1 %v5020_v63  ;;  %v5107_v63 = vld [vmem:[#allocation7 + $0x708] ss:$16 sps:$4 sm:$0xff]  }
 0x11e   :  { %2104 = vmatpush1.bf16.msra.mxu0 %v5021_v1  ;;  %v5115_v1 = vld [vmem:[#allocation7 + $0x72c] ss:$16 sps:$4 sm:$0xff]  }
 0x11f   :  { %1940 = vmatpush1.bf16.msra.mxu1 %v5018_v0  ;;  %2105 = vmatprep.subr.bf16.mxu0 %v5029_v2  ;;  %v5104_v0 = vld [vmem:[#allocation7 + $0x700] ss:$16 sps:$4 sm:$0xff]   ;;  %v5112_v2 = vld [vmem:[#allocation7 + $0x724] ss:$16 sps:$4 sm:$0xff]  }
 0x120   :  { %1941 = vmatprep.subr.bf16.mxu1 %v5026_v3  ;;  %v5113_v3 = vld [vmem:[#allocation7 + $0x728] ss:$16 sps:$4 sm:$0xff]  }
 0x122   :  { %2106 = vmatpush1.bf16.msra.mxu0 %v5027_v4  ;;  %v5110_v4 = vld [vmem:[#allocation7 + $0x720] ss:$16 sps:$4 sm:$0xff]  }
 0x123   :  { %1942 = vmatpush1.bf16.msra.mxu1 %v5024_v5  ;;  %2107 = vmatprep.subr.bf16.mxu0 %v5035_v6  ;;  %v5121_v5 = vld [vmem:[#allocation7 + $0x74c] ss:$16 sps:$4 sm:$0xff]   ;;  %v5118_v6 = vld [vmem:[#allocation7 + $0x744] ss:$16 sps:$4 sm:$0xff]  }
 0x124   :  { %1943 = vmatprep.subr.bf16.mxu1 %v5032_v7  ;;  %v5119_v7 = vld [vmem:[#allocation7 + $0x748] ss:$16 sps:$4 sm:$0xff]  }
 0x126   :  { %2108 = vmatpush1.bf16.msra.mxu0 %v5033_v8  ;;  %v5116_v8 = vld [vmem:[#allocation7 + $0x740] ss:$16 sps:$4 sm:$0xff]  }
 0x127   :  { %1944 = vmatpush1.bf16.msra.mxu1 %v5030_v9  ;;  %2109 = vmatprep.subr.bf16.mxu0 %v5041_v10  ;;  %v5127_v9 = vld [vmem:[#allocation7 + $0x76c] ss:$16 sps:$4 sm:$0xff]   ;;  %v5124_v10 = vld [vmem:[#allocation7 + $0x764] ss:$16 sps:$4 sm:$0xff]  }
 0x128   :  { %1945 = vmatprep.subr.bf16.mxu1 %v5038_v11  ;;  %v5125_v11 = vld [vmem:[#allocation7 + $0x768] ss:$16 sps:$4 sm:$0xff]  }
 0x12a   :  { %2110 = vmatpush1.bf16.msra.mxu0 %v5039_v12  ;;  %v5122_v12 = vld [vmem:[#allocation7 + $0x760] ss:$16 sps:$4 sm:$0xff]  }
 0x12b   :  { %1946 = vmatpush1.bf16.msra.mxu1 %v5036_v13  ;;  %2111 = vmatprep.subr.bf16.mxu0 %v5047_v14  ;;  %v5133_v13 = vld [vmem:[#allocation7 + $0x78c] ss:$16 sps:$4 sm:$0xff]   ;;  %v5130_v14 = vld [vmem:[#allocation7 + $0x784] ss:$16 sps:$4 sm:$0xff]  }
 0x12c   :  { %1947 = vmatprep.subr.bf16.mxu1 %v5044_v15  ;;  %v5131_v15 = vld [vmem:[#allocation7 + $0x788] ss:$16 sps:$4 sm:$0xff]  }
 0x12e   :  { %2112 = vmatpush1.bf16.msra.mxu0 %v5045_v16  ;;  %v5128_v16 = vld [vmem:[#allocation7 + $0x780] ss:$16 sps:$4 sm:$0xff]  }
 0x12f   :  { %1948 = vmatpush1.bf16.msra.mxu1 %v5042_v17  ;;  %2113 = vmatprep.subr.bf16.mxu0 %v5053_v18  ;;  %v5139_v17 = vld [vmem:[#allocation7 + $0x7ac] ss:$16 sps:$4 sm:$0xff]   ;;  %v5136_v18 = vld [vmem:[#allocation7 + $0x7a4] ss:$16 sps:$4 sm:$0xff]  }
 0x130   :  { %1949 = vmatprep.subr.bf16.mxu1 %v5050_v19  ;;  %v5137_v19 = vld [vmem:[#allocation7 + $0x7a8] ss:$16 sps:$4 sm:$0xff]  }
 0x132   :  { %2114 = vmatpush1.bf16.msra.mxu0 %v5051_v20  ;;  %v5134_v20 = vld [vmem:[#allocation7 + $0x7a0] ss:$16 sps:$4 sm:$0xff]  }
 0x133   :  { %1950 = vmatpush1.bf16.msra.mxu1 %v5048_v21  ;;  %2124 = vmatprep.subr.bf16.mxu0 %v5061_v22  ;;  %v5145_v21 = vld [vmem:[#allocation7 + $0x7cc] ss:$16 sps:$4 sm:$0xff]   ;;  %v5142_v22 = vld [vmem:[#allocation7 + $0x7c4] ss:$16 sps:$4 sm:$0xff]  }
 0x134   :  { %1960 = vmatprep.subr.bf16.mxu1 %v5058_v24  ;;  %v5143_v24 = vld [vmem:[#allocation7 + $0x7c8] ss:$16 sps:$4 sm:$0xff]  }
 0x135   :  { %2116 = vmatmul.mubr.bf16.vlgmr.msra.gmra.mrb[8].mxu0 %v4181_v25 }
 0x136   :  { %1952 = vmatmul.mubr.bf16.vlgmr.msra.gmra.mrb[8].mxu1 %v4181_v25  ;;  %2125 = vmatpush1.bf16.msra.mxu0 %v5059_v27  ;;  %v5140_v25 = vld [vmem:[#allocation7 + $0x7c0] ss:$16 sps:$4 sm:$0xff]   ;;  %v5151_v27 = vld [vmem:[#allocation7 + $0x7ec] ss:$16 sps:$4 sm:$0xff]  }
 0x137   :  { %1961 = vmatpush1.bf16.msra.mxu1 %v5056_v28  ;;  %2126 = vmatprep.subr.bf16.mxu0 %v5067_v29  ;;  %v5148_v28 = vld [vmem:[#allocation7 + $0x7e4] ss:$16 sps:$4 sm:$0xff]   ;;  %v5149_v29 = vld [vmem:[#allocation7 + $0x7e8] ss:$16 sps:$4 sm:$0xff]  }
 0x138   :  { %1962 = vmatprep.subr.bf16.mxu1 %v5064_v30  ;;  %1992 = vmatprep.mubr.bf16.mxu1 %v4184_v31  ;;  %v5146_v30 = vld [vmem:[#allocation7 + $0x7e0] ss:$16 sps:$4 sm:$0xff]  }
 0x139   :  { %2156 = vmatprep.mubr.bf16.mxu0 %v4184_v31  ;;  %v5159_v31 = vld [vmem:[#allocation10 + $0xc] ss:$16 sps:$4 sm:$0xff]  }
 0x13a   :  { %2127 = vmatpush1.bf16.msra.mxu0 %v5065_v32  ;;  %v5156_v32 = vld [vmem:[#allocation10 + $0x4] ss:$16 sps:$4 sm:$0xff]  }
 0x13b   :  { %1963 = vmatpush1.bf16.msra.mxu1 %v5062_v33  ;;  %2128 = vmatprep.subr.bf16.mxu0 %v5073_v23  ;;  %v5157_v33 = vld [vmem:[#allocation10 + $0x8] ss:$16 sps:$4 sm:$0xff]   ;;  %v4183_v23 = vcombine.low %v5883_v26, %v5883_v26  ;;  %v5177_v26 = vld [vmem:[#allocation10 + $0x6c] ss:$16 sps:$4 sm:$0xff]  }
 0x13c   :  { %1964 = vmatprep.subr.bf16.mxu1 %v5070_v34  ;;  %v5154_v34 = vld [vmem:[#allocation10] ss:$16 sps:$4 sm:$0xff]  }
 0x13e   :  { %2129 = vmatpush1.bf16.msra.mxu0 %v5071_v35  ;;  %v5165_v35 = vld [vmem:[#allocation10 + $0x2c] ss:$16 sps:$4 sm:$0xff]  }
 0x13f   :  { %1965 = vmatpush1.bf16.msra.mxu1 %v5068_v36  ;;  %2130 = vmatprep.subr.bf16.mxu0 %v5079_v37  ;;  %v5162_v36 = vld [vmem:[#allocation10 + $0x24] ss:$16 sps:$4 sm:$0xff]   ;;  %v5163_v37 = vld [vmem:[#allocation10 + $0x28] ss:$16 sps:$4 sm:$0xff]  }
 0x140   :  { %1966 = vmatprep.subr.bf16.mxu1 %v5076_v38  ;;  %v5160_v38 = vld [vmem:[#allocation10 + $0x20] ss:$16 sps:$4 sm:$0xff]  }
 0x142   :  { %2131 = vmatpush1.bf16.msra.mxu0 %v5077_v39  ;;  %v5171_v39 = vld [vmem:[#allocation10 + $0x4c] ss:$16 sps:$4 sm:$0xff]  }
 0x143   :  { %1967 = vmatpush1.bf16.msra.mxu1 %v5074_v40  ;;  %2132 = vmatprep.subr.bf16.mxu0 %v5085_v41  ;;  %v5168_v40 = vld [vmem:[#allocation10 + $0x44] ss:$16 sps:$4 sm:$0xff]   ;;  %v5169_v41 = vld [vmem:[#allocation10 + $0x48] ss:$16 sps:$4 sm:$0xff]  }
 0x144   :  { %1968 = vmatprep.subr.bf16.mxu1 %v5082_v42  ;;  %v5166_v42 = vld [vmem:[#allocation10 + $0x40] ss:$16 sps:$4 sm:$0xff]  }
 0x146   :  { %2133 = vmatpush1.bf16.msra.mxu0 %v5083_v44  ;;  %v5175_v44 = vld [vmem:[#allocation10 + $0x68] ss:$16 sps:$4 sm:$0xff]  }
 0x147   :  { %1969 = vmatpush1.bf16.msra.mxu1 %v5080_v43  ;;  %2134 = vmatprep.subr.bf16.mxu0 %v5091_v46  ;;  %v5174_v43 = vld [vmem:[#allocation10 + $0x64] ss:$16 sps:$4 sm:$0xff]   ;;  %v5183_v46 = vld [vmem:[#allocation10 + $0x8c] ss:$16 sps:$4 sm:$0xff]  }
 0x148   :  { %1970 = vmatprep.subr.bf16.mxu1 %v5088_v45  ;;  %v5887_v52 = vpop.f32.mrb[0].mxu0  ;;  %v5172_v45 = vld [vmem:[#allocation10 + $0x60] ss:$16 sps:$4 sm:$0xff]  }
 0x149   :  { %v5889_v53 = vpop.f32.mrb[0].mxu1  ;;  %v5891_v56 = vpop.f32.mrb[1].mxu0 }
 0x14a   :  { %v5893_v57 = vpop.f32.mrb[1].mxu1  ;;  %2135 = vmatpush1.bf16.msra.mxu0 %v5089_v47  ;;  %v5180_v47 = vld [vmem:[#allocation10 + $0x84] ss:$16 sps:$4 sm:$0xff]  }
 0x14b   :  { %1971 = vmatpush1.bf16.msra.mxu1 %v5086_v48  ;;  %2136 = vmatprep.subr.bf16.mxu0 %v5097_v49  ;;  %v5181_v48 = vld [vmem:[#allocation10 + $0x88] ss:$16 sps:$4 sm:$0xff]   ;;  %v5178_v49 = vld [vmem:[#allocation10 + $0x80] ss:$16 sps:$4 sm:$0xff]  }
 0x14c   :  { %1972 = vmatprep.subr.bf16.mxu1 %v5094_v50  ;;  %v5189_v50 = vld [vmem:[#allocation10 + $0xac] ss:$16 sps:$4 sm:$0xff]  }
 0x14e   :  { %2137 = vmatpush1.bf16.msra.mxu0 %v5095_v51  ;;  %v5186_v51 = vld [vmem:[#allocation10 + $0xa4] ss:$16 sps:$4 sm:$0xff]  }
 0x14f   :  { %1973 = vmatpush1.bf16.msra.mxu1 %v5092_v54  ;;  %2138 = vmatprep.subr.bf16.mxu0 %v5103_v55  ;;  %v5187_v54 = vld [vmem:[#allocation10 + $0xa8] ss:$16 sps:$4 sm:$0xff]   ;;  %v5184_v55 = vld [vmem:[#allocation10 + $0xa0] ss:$16 sps:$4 sm:$0xff]  }
 0x150   :  { %1974 = vmatprep.subr.bf16.mxu1 %v5100_v58  ;;  %v5195_v58 = vld [vmem:[#allocation10 + $0xcc] ss:$16 sps:$4 sm:$0xff]  }
 0x152   :  { %2139 = vmatpush1.bf16.msra.mxu0 %v5101_v59 }
 0x153   :  { %1975 = vmatpush1.bf16.msra.mxu1 %v5098_v60  ;;  %2140 = vmatprep.subr.bf16.mxu0 %v5109_v61  ;;  %v5192_v60 = vld [vmem:[#allocation10 + $0xc4] ss:$16 sps:$4 sm:$0xff]  }
 0x154   :  { %1976 = vmatprep.subr.bf16.mxu1 %v5106_v62 }
 0x156   :  { %2141 = vmatpush1.bf16.msra.mxu0 %v5107_v63 }
 0x157   :  { %1977 = vmatpush1.bf16.msra.mxu1 %v5104_v0  ;;  %2142 = vmatprep.subr.bf16.mxu0 %v5115_v1 }
 0x158   :  { %1978 = vmatprep.subr.bf16.mxu1 %v5112_v2 }
 0x15a   :  { %2143 = vmatpush1.bf16.msra.mxu0 %v5113_v3 }
 0x15b   :  { %1979 = vmatpush1.bf16.msra.mxu1 %v5110_v4  ;;  %2144 = vmatprep.subr.bf16.mxu0 %v5121_v5  ;;  %v5193_v4 = vld [vmem:[#allocation10 + $0xc8] ss:$16 sps:$4 sm:$0xff]  }
 0x15c   :  { %1980 = vmatprep.subr.bf16.mxu1 %v5118_v6 }
 0x15e   :  { %2145 = vmatpush1.bf16.msra.mxu0 %v5119_v7 }
 0x15f   :  { %1981 = vmatpush1.bf16.msra.mxu1 %v5116_v8  ;;  %2146 = vmatprep.subr.bf16.mxu0 %v5127_v9  ;;  %v5190_v8 = vld [vmem:[#allocation10 + $0xc0] ss:$16 sps:$4 sm:$0xff]  }
 0x160   :  { %1982 = vmatprep.subr.bf16.mxu1 %v5124_v10  ;;  %v5199_v10 = vld [vmem:[#allocation10 + $0xe8] ss:$16 sps:$4 sm:$0xff]  }
 0x162   :  { %2147 = vmatpush1.bf16.msra.mxu0 %v5125_v11  ;;  %v5207_v11 = vld [vmem:[#allocation10 + $0x10c] ss:$16 sps:$4 sm:$0xff]  }
 0x163   :  { %1983 = vmatpush1.bf16.msra.mxu1 %v5122_v12  ;;  %2148 = vmatprep.subr.bf16.mxu0 %v5133_v13  ;;  %v5204_v12 = vld [vmem:[#allocation10 + $0x104] ss:$16 sps:$4 sm:$0xff]   ;;  %v5202_v13 = vld [vmem:[#allocation10 + $0x100] ss:$16 sps:$4 sm:$0xff]  }
 0x164   :  { %1984 = vmatprep.subr.bf16.mxu1 %v5130_v14  ;;  %v5213_v14 = vld [vmem:[#allocation10 + $0x12c] ss:$16 sps:$4 sm:$0xff]  }
 0x166   :  { %2149 = vmatpush1.bf16.msra.mxu0 %v5131_v15  ;;  %v5210_v15 = vld [vmem:[#allocation10 + $0x124] ss:$16 sps:$4 sm:$0xff]  }
 0x167   :  { %1985 = vmatpush1.bf16.msra.mxu1 %v5128_v16  ;;  %2150 = vmatprep.subr.bf16.mxu0 %v5139_v17  ;;  %v5211_v16 = vld [vmem:[#allocation10 + $0x128] ss:$16 sps:$4 sm:$0xff]   ;;  %v5208_v17 = vld [vmem:[#allocation10 + $0x120] ss:$16 sps:$4 sm:$0xff]  }
 0x168   :  { %1986 = vmatprep.subr.bf16.mxu1 %v5136_v18  ;;  %v5219_v18 = vld [vmem:[#allocation10 + $0x14c] ss:$16 sps:$4 sm:$0xff]  }
 0x16a   :  { %2151 = vmatpush1.bf16.msra.mxu0 %v5137_v19  ;;  %v5216_v19 = vld [vmem:[#allocation10 + $0x144] ss:$16 sps:$4 sm:$0xff]  }
 0x16b   :  { %1987 = vmatpush1.bf16.msra.mxu1 %v5134_v20  ;;  %2152 = vmatprep.subr.bf16.mxu0 %v5145_v21  ;;  %v5217_v20 = vld [vmem:[#allocation10 + $0x148] ss:$16 sps:$4 sm:$0xff]   ;;  %v5214_v21 = vld [vmem:[#allocation10 + $0x140] ss:$16 sps:$4 sm:$0xff]  }
 0x16c   :  { %1988 = vmatprep.subr.bf16.mxu1 %v5142_v22  ;;  %v5225_v22 = vld [vmem:[#allocation10 + $0x16c] ss:$16 sps:$4 sm:$0xff]  }
 0x16e   :  { %2153 = vmatpush1.bf16.msra.mxu0 %v5143_v24  ;;  %v5222_v24 = vld [vmem:[#allocation10 + $0x164] ss:$16 sps:$4 sm:$0xff]  }
 0x16f   :  { %1989 = vmatpush1.bf16.msra.mxu1 %v5140_v25  ;;  %2154 = vmatprep.subr.bf16.mxu0 %v5151_v27  ;;  %v5223_v25 = vld [vmem:[#allocation10 + $0x168] ss:$16 sps:$4 sm:$0xff]   ;;  %v5220_v27 = vld [vmem:[#allocation10 + $0x160] ss:$16 sps:$4 sm:$0xff]  }
 0x170   :  { %1990 = vmatprep.subr.bf16.mxu1 %v5148_v28  ;;  %v5231_v28 = vld [vmem:[#allocation10 + $0x18c] ss:$16 sps:$4 sm:$0xff]  }
 0x172   :  { %2155 = vmatpush1.bf16.msra.mxu0 %v5149_v29  ;;  %v5228_v29 = vld [vmem:[#allocation10 + $0x184] ss:$16 sps:$4 sm:$0xff]  }
 0x173   :  { %1991 = vmatpush1.bf16.msra.mxu1 %v5146_v30  ;;  %3053 = vmatprep.subr.bf16.mxu0 %v5159_v31  ;;  %v5229_v30 = vld [vmem:[#allocation10 + $0x188] ss:$16 sps:$4 sm:$0xff]   ;;  %v5226_v31 = vld [vmem:[#allocation10 + $0x180] ss:$16 sps:$4 sm:$0xff]  }
 0x174   :  { %2971 = vmatprep.subr.bf16.mxu1 %v5156_v32  ;;  %v5237_v32 = vld [vmem:[#allocation10 + $0x1ac] ss:$16 sps:$4 sm:$0xff]  }
 0x175   :  { %2157 = vmatmul.mubr.bf16.vlgmr.msra.gmra.mrb[8].mxu0 %v4183_v23 }
 0x176   :  { %1993 = vmatmul.mubr.bf16.vlgmr.msra.gmra.mrb[8].mxu1 %v4183_v23  ;;  %3054 = vmatpush1.bf16.msra.mxu0 %v5157_v33  ;;  %v5234_v33 = vld [vmem:[#allocation10 + $0x1a4] ss:$16 sps:$4 sm:$0xff]   ;;  %v5235_v23 = vld [vmem:[#allocation10 + $0x1a8] ss:$16 sps:$4 sm:$0xff]  }
 0x177   :  { %2972 = vmatpush1.bf16.msra.mxu1 %v5154_v34  ;;  %3055 = vmatprep.subr.bf16.mxu0 %v5165_v35  ;;  %v5232_v34 = vld [vmem:[#allocation10 + $0x1a0] ss:$16 sps:$4 sm:$0xff]   ;;  %v5240_v35 = vld [vmem:[#allocation10 + $0x1c4] ss:$16 sps:$4 sm:$0xff]  }
 0x178   :  { %2973 = vmatprep.subr.bf16.mxu1 %v5162_v36  ;;  %v5243_v36 = vld [vmem:[#allocation10 + $0x1cc] ss:$16 sps:$4 sm:$0xff]  }
 0x17a   :  { %3056 = vmatpush1.bf16.msra.mxu0 %v5163_v37  ;;  %v5238_v37 = vld [vmem:[#allocation10 + $0x1c0] ss:$16 sps:$4 sm:$0xff]  }
 0x17b   :  { %2974 = vmatpush1.bf16.msra.mxu1 %v5160_v38  ;;  %3057 = vmatprep.subr.bf16.mxu0 %v5171_v39  ;;  %v5241_v38 = vld [vmem:[#allocation10 + $0x1c8] ss:$16 sps:$4 sm:$0xff]   ;;  %v5246_v39 = vld [vmem:[#allocation10 + $0x1e4] ss:$16 sps:$4 sm:$0xff]  }
 0x17c   :  { %2975 = vmatprep.subr.bf16.mxu1 %v5168_v40  ;;  %v5249_v40 = vld [vmem:[#allocation10 + $0x1ec] ss:$16 sps:$4 sm:$0xff]  }
 0x17e   :  { %3058 = vmatpush1.bf16.msra.mxu0 %v5169_v41  ;;  %v5244_v41 = vld [vmem:[#allocation10 + $0x1e0] ss:$16 sps:$4 sm:$0xff]  }
 0x17f   :  { %2976 = vmatpush1.bf16.msra.mxu1 %v5166_v42  ;;  %3059 = vmatprep.subr.bf16.mxu0 %v5177_v26  ;;  %v5247_v42 = vld [vmem:[#allocation10 + $0x1e8] ss:$16 sps:$4 sm:$0xff]   ;;  %v5252_v26 = vld [vmem:[#allocation10 + $0x204] ss:$16 sps:$4 sm:$0xff]  }
 0x180   :  { %2977 = vmatprep.subr.bf16.mxu1 %v5174_v43  ;;  %v5255_v43 = vld [vmem:[#allocation10 + $0x20c] ss:$16 sps:$4 sm:$0xff]  }
 0x182   :  { %3060 = vmatpush1.bf16.msra.mxu0 %v5175_v44 }
 0x183   :  { %2978 = vmatpush1.bf16.msra.mxu1 %v5172_v45  ;;  %3061 = vmatprep.subr.bf16.mxu0 %v5183_v46 }
 0x184   :  { %2979 = vmatprep.subr.bf16.mxu1 %v5180_v47 }
 0x186   :  { %3062 = vmatpush1.bf16.msra.mxu0 %v5181_v48 }
 0x187   :  { %2980 = vmatpush1.bf16.msra.mxu1 %v5178_v49  ;;  %3063 = vmatprep.subr.bf16.mxu0 %v5189_v50 }
 0x188   :  { %v2035_v59 = vpop.f32.mrb[4].mxu0  ;;  %2981 = vmatprep.subr.bf16.mxu1 %v5186_v51 }
 0x189   :  { %v1871_v61 = vpop.f32.mrb[4].mxu1  ;;  %v5898_v62 = vadd.f32 %v2035_v59, %v5889_v53  ;;  %v2037_v63 = vpop.f32.mrb[5].mxu0  ;;  %v5201_v53 = vld [vmem:[#allocation10 + $0xec] ss:$16 sps:$4 sm:$0xff]  }
 0x18a   :  { %v5901_v0 = vadd.f32 %v1871_v61, %v5887_v52  ;;  %v1873_v1 = vpop.f32.mrb[5].mxu1  ;;  %v5904_v2 = vadd.f32 %v2037_v63, %v5893_v57  ;;  %v2039_v3 = vpop.f32.mrb[6].mxu0  ;;  %3064 = vmatpush1.bf16.msra.mxu0 %v5187_v54  ;;  %v5198_v52 = vld [vmem:[#allocation10 + $0xe4] ss:$16 sps:$4 sm:$0xff]   ;;  %v5196_v57 = vld [vmem:[#allocation10 + $0xe0] ss:$16 sps:$4 sm:$0xff]  }
 0x18b   :  { %v5907_v5 = vadd.f32 %v1873_v1, %v5891_v56  ;;  %v1875_v6 = vpop.f32.mrb[6].mxu1  ;;  %v2040_v7 = vpop.f32.mrb[7].mxu0  ;;  %2982 = vmatpush1.bf16.msra.mxu1 %v5184_v55  ;;  %3065 = vmatprep.subr.bf16.mxu0 %v5195_v58  ;;  %v5205_v56 = vld [vmem:[#allocation10 + $0x108] ss:$16 sps:$4 sm:$0xff]  }
 0x18c   :  { %v1876_v9 = vpop.f32.mrb[7].mxu1  ;;  %2983 = vmatprep.subr.bf16.mxu1 %v5192_v60 }
 0x18d   :  { %v5259_v9 = vld [vmem:[#allocation10 + $0x228] ss:$16 sps:$4 sm:$0xff]  }
 0x18e   :  { %3066 = vmatpush1.bf16.msra.mxu0 %v5193_v4  ;;  %v5250_v4 = vld [vmem:[#allocation10 + $0x200] ss:$16 sps:$4 sm:$0xff]  }
 0x18f   :  { %2984 = vmatpush1.bf16.msra.mxu1 %v5190_v8  ;;  %3067 = vmatprep.subr.bf16.mxu0 %v5201_v53  ;;  %v5256_v53 = vld [vmem:[#allocation10 + $0x220] ss:$16 sps:$4 sm:$0xff]  }
 0x190   :  { %2985 = vmatprep.subr.bf16.mxu1 %v5198_v52  ;;  %v5264_v52 = vld [vmem:[#allocation10 + $0x244] ss:$16 sps:$4 sm:$0xff]  }
 0x192   :  { %3068 = vmatpush1.bf16.msra.mxu0 %v5199_v10  ;;  %v5267_v10 = vld [vmem:[#allocation10 + $0x24c] ss:$16 sps:$4 sm:$0xff]  }
 0x193   :  { %2986 = vmatpush1.bf16.msra.mxu1 %v5196_v57  ;;  %3069 = vmatprep.subr.bf16.mxu0 %v5207_v11  ;;  %v5262_v57 = vld [vmem:[#allocation10 + $0x240] ss:$16 sps:$4 sm:$0xff]   ;;  %v5265_v11 = vld [vmem:[#allocation10 + $0x248] ss:$16 sps:$4 sm:$0xff]  }
 0x194   :  { %2987 = vmatprep.subr.bf16.mxu1 %v5204_v12  ;;  %v5270_v12 = vld [vmem:[#allocation10 + $0x264] ss:$16 sps:$4 sm:$0xff]  }
 0x196   :  { %3070 = vmatpush1.bf16.msra.mxu0 %v5205_v56  ;;  %v5273_v56 = vld [vmem:[#allocation10 + $0x26c] ss:$16 sps:$4 sm:$0xff]  }
 0x197   :  { %2988 = vmatpush1.bf16.msra.mxu1 %v5202_v13  ;;  %3071 = vmatprep.subr.bf16.mxu0 %v5213_v14  ;;  %v5268_v13 = vld [vmem:[#allocation10 + $0x260] ss:$16 sps:$4 sm:$0xff]   ;;  %v5271_v14 = vld [vmem:[#allocation10 + $0x268] ss:$16 sps:$4 sm:$0xff]  }
 0x198   :  { %2989 = vmatprep.subr.bf16.mxu1 %v5210_v15  ;;  %v5276_v15 = vld [vmem:[#allocation10 + $0x284] ss:$16 sps:$4 sm:$0xff]  }
 0x19a   :  { %3072 = vmatpush1.bf16.msra.mxu0 %v5211_v16  ;;  %v5279_v16 = vld [vmem:[#allocation10 + $0x28c] ss:$16 sps:$4 sm:$0xff]  }
 0x19b   :  { %2990 = vmatpush1.bf16.msra.mxu1 %v5208_v17  ;;  %3073 = vmatprep.subr.bf16.mxu0 %v5219_v18  ;;  %v5274_v17 = vld [vmem:[#allocation10 + $0x280] ss:$16 sps:$4 sm:$0xff]   ;;  %v5277_v18 = vld [vmem:[#allocation10 + $0x288] ss:$16 sps:$4 sm:$0xff]  }
 0x19c   :  { %2991 = vmatprep.subr.bf16.mxu1 %v5216_v19  ;;  %v5282_v19 = vld [vmem:[#allocation10 + $0x2a4] ss:$16 sps:$4 sm:$0xff]  }
 0x19e   :  { %3074 = vmatpush1.bf16.msra.mxu0 %v5217_v20  ;;  %v5285_v20 = vld [vmem:[#allocation10 + $0x2ac] ss:$16 sps:$4 sm:$0xff]  }
 0x19f   :  { %2992 = vmatpush1.bf16.msra.mxu1 %v5214_v21  ;;  %3075 = vmatprep.subr.bf16.mxu0 %v5225_v22  ;;  %v5280_v21 = vld [vmem:[#allocation10 + $0x2a0] ss:$16 sps:$4 sm:$0xff]   ;;  %v5283_v22 = vld [vmem:[#allocation10 + $0x2a8] ss:$16 sps:$4 sm:$0xff]  }
 0x1a0   :  { %2993 = vmatprep.subr.bf16.mxu1 %v5222_v24  ;;  %v5288_v24 = vld [vmem:[#allocation10 + $0x2c4] ss:$16 sps:$4 sm:$0xff]  }
 0x1a2   :  { %3076 = vmatpush1.bf16.msra.mxu0 %v5223_v25  ;;  %v5291_v25 = vld [vmem:[#allocation10 + $0x2cc] ss:$16 sps:$4 sm:$0xff]  }
 0x1a3   :  { %2994 = vmatpush1.bf16.msra.mxu1 %v5220_v27  ;;  %3077 = vmatprep.subr.bf16.mxu0 %v5231_v28  ;;  %v5286_v27 = vld [vmem:[#allocation10 + $0x2c0] ss:$16 sps:$4 sm:$0xff]   ;;  %v5289_v28 = vld [vmem:[#allocation10 + $0x2c8] ss:$16 sps:$4 sm:$0xff]  }
 0x1a4   :  { %2995 = vmatprep.subr.bf16.mxu1 %v5228_v29  ;;  %v5294_v29 = vld [vmem:[#allocation10 + $0x2e4] ss:$16 sps:$4 sm:$0xff]  }
 0x1a6   :  { %3078 = vmatpush1.bf16.msra.mxu0 %v5229_v30  ;;  %v5297_v30 = vld [vmem:[#allocation10 + $0x2ec] ss:$16 sps:$4 sm:$0xff]  }
 0x1a7   :  { %2996 = vmatpush1.bf16.msra.mxu1 %v5226_v31  ;;  %3079 = vmatprep.subr.bf16.mxu0 %v5237_v32  ;;  %v5292_v31 = vld [vmem:[#allocation10 + $0x2e0] ss:$16 sps:$4 sm:$0xff]   ;;  %v5295_v32 = vld [vmem:[#allocation10 + $0x2e8] ss:$16 sps:$4 sm:$0xff]  }
 0x1a8   :  { %2997 = vmatprep.subr.bf16.mxu1 %v5234_v33  ;;  %v5300_v33 = vld [vmem:[#allocation10 + $0x304] ss:$16 sps:$4 sm:$0xff]  }
 0x1aa   :  { %3080 = vmatpush1.bf16.msra.mxu0 %v5235_v23  ;;  %v5303_v23 = vld [vmem:[#allocation10 + $0x30c] ss:$16 sps:$4 sm:$0xff]  }
 0x1ab   :  { %2998 = vmatpush1.bf16.msra.mxu1 %v5232_v34  ;;  %3081 = vmatprep.subr.bf16.mxu0 %v5243_v36  ;;  %v5298_v34 = vld [vmem:[#allocation10 + $0x300] ss:$16 sps:$4 sm:$0xff]   ;;  %v5306_v36 = vld [vmem:[#allocation10 + $0x324] ss:$16 sps:$4 sm:$0xff]  }
 0x1ac   :  { %2999 = vmatprep.subr.bf16.mxu1 %v5240_v35  ;;  %v5301_v35 = vld [vmem:[#allocation10 + $0x308] ss:$16 sps:$4 sm:$0xff]  }
 0x1ae   :  { %3082 = vmatpush1.bf16.msra.mxu0 %v5241_v38  ;;  %v5304_v38 = vld [vmem:[#allocation10 + $0x320] ss:$16 sps:$4 sm:$0xff]  }
 0x1af   :  { %3000 = vmatpush1.bf16.msra.mxu1 %v5238_v37  ;;  %3083 = vmatprep.subr.bf16.mxu0 %v5249_v40  ;;  %v5309_v37 = vld [vmem:[#allocation10 + $0x32c] ss:$16 sps:$4 sm:$0xff]   ;;  %v5312_v40 = vld [vmem:[#allocation10 + $0x344] ss:$16 sps:$4 sm:$0xff]  }
 0x1b0   :  { %3001 = vmatprep.subr.bf16.mxu1 %v5246_v39  ;;  %v5307_v39 = vld [vmem:[#allocation10 + $0x328] ss:$16 sps:$4 sm:$0xff]  }
 0x1b2   :  { %3084 = vmatpush1.bf16.msra.mxu0 %v5247_v42  ;;  %v5310_v42 = vld [vmem:[#allocation10 + $0x340] ss:$16 sps:$4 sm:$0xff]  }
 0x1b3   :  { %3002 = vmatpush1.bf16.msra.mxu1 %v5244_v41  ;;  %3094 = vmatprep.subr.bf16.mxu0 %v5255_v43  ;;  %v5315_v41 = vld [vmem:[#allocation10 + $0x34c] ss:$16 sps:$4 sm:$0xff]   ;;  %v5318_v43 = vld [vmem:[#allocation10 + $0x364] ss:$16 sps:$4 sm:$0xff]  }
 0x1b4   :  { %3012 = vmatprep.subr.bf16.mxu1 %v5252_v26  ;;  %v5313_v26 = vld [vmem:[#allocation10 + $0x348] ss:$16 sps:$4 sm:$0xff]  }
 0x248   :  { %v2158_v44 = vpop.f32.mrb[8].mxu0 }
 0x249   :  { %v1994_v45 = vpop.f32.mrb[8].mxu1  ;;  %v5910_v46 = vadd.f32 %v2158_v44, %v5898_v62  ;;  %v2160_v47 = vpop.f32.mrb[9].mxu0  ;;  %v5321_v44 = vld [vmem:[#allocation10 + $0x36c] ss:$16 sps:$4 sm:$0xff]  }
 0x24a   :  { %v4706_v48 = vadd.f32 %v1994_v45, %v5901_v0  ;;  %v1996_v49 = vpop.f32.mrb[9].mxu1  ;;  %v4709_v50 = vadd.f32 %v2160_v47, %v5904_v2  ;;  %v2162_v51 = vpop.f32.mrb[10].mxu0  ;;  %v5253_v0 = vld [vmem:[#allocation10 + $0x208] ss:$16 sps:$4 sm:$0xff]   ;;  %v5258_v2 = vld [vmem:[#allocation10 + $0x224] ss:$16 sps:$4 sm:$0xff]  }
 0x24b   :  { %v4707_v54 = vadd.f32 %v1996_v49, %v5907_v5  ;;  %v1998_v55 = vpop.f32.mrb[10].mxu1  ;;  %v2163_v58 = vpop.f32.mrb[11].mxu0  ;;  %v5261_v5 = vld [vmem:[#allocation10 + $0x22c] ss:$16 sps:$4 sm:$0xff]   ;;  %v5316_v45 = vld [vmem:[#allocation10 + $0x360] ss:$16 sps:$4 sm:$0xff]  }
 0x24c   :  { %vm2165_vm1 = vcmp.gt.f32.partialorder %v4706_v48, 0.0  ;;  %v2169_v59 = vmul.f32 0.2, %v4706_v48  ;;  %v2172_v60 = vmul.f32 0.2, %v4709_v50  ;;  %vm2168_vm3 = vcmp.gt.f32.partialorder %v4709_v50, 0.0 }
 0x24d   :  { %vm2166_vm2 = vcmp.gt.f32.partialorder %v4707_v54, 0.0  ;;  %v2170_v61 = vmul.f32 0.2, %v4707_v54  ;;  %v1999_v63 = vpop.f32.mrb[11].mxu1  ;;  %v5319_v47 = vld [vmem:[#allocation10 + $0x368] ss:$16 sps:$4 sm:$0xff]  }
 0x24e   :  { %v2173_v62 = vsel %vm2165_vm1, %v4706_v48, %v2169_v59  ;;  %v2176_v6 = vsel %vm2168_vm3, %v4709_v50, %v2172_v60  ;;  %v5324_v48 = vld [vmem:[#allocation10 + $0x384] ss:$16 sps:$4 sm:$0xff]   ;;  %v5327_v49 = vld [vmem:[#allocation10 + $0x38c] ss:$16 sps:$4 sm:$0xff]   ;;  %v5322_v50 = vld [vmem:[#allocation10 + $0x380] ss:$16 sps:$4 sm:$0xff]  }
 0x24f   :  { %v2174_v1 = vsel %vm2166_vm2, %v4707_v54, %v2170_v61  ;;  %v2177_v7 = vpack.c.bf16 %v2173_v62, %v2173_v62  ;;  %v2180_v8 = vpack.c.bf16 %v2176_v6, %v2176_v6  ;;  %v5325_v51 = vld [vmem:[#allocation10 + $0x388] ss:$16 sps:$4 sm:$0xff]   ;;  %v5330_v54 = vld [vmem:[#allocation10 + $0x3a4] ss:$16 sps:$4 sm:$0xff]   ;;  %v5333_v55 = vld [vmem:[#allocation10 + $0x3ac] ss:$16 sps:$4 sm:$0xff]  }
 0x250   :  { %v2178_v3 = vpack.c.bf16 %v2174_v1, %v2174_v1  ;;  %v5328_v58 = vld [vmem:[#allocation10 + $0x3a0] ss:$16 sps:$4 sm:$0xff]   ;;  %v5331_v59 = vld [vmem:[#allocation10 + $0x3a8] ss:$16 sps:$4 sm:$0xff]   ;;  %v5336_v60 = vld [vmem:[#allocation10 + $0x3c4] ss:$16 sps:$4 sm:$0xff]  }
 0x251   :  { %v5339_v61 = vld [vmem:[#allocation10 + $0x3cc] ss:$16 sps:$4 sm:$0xff]   ;;  %v5334_v63 = vld [vmem:[#allocation10 + $0x3c0] ss:$16 sps:$4 sm:$0xff]   ;;  %v5337_v62 = vld [vmem:[#allocation10 + $0x3c8] ss:$16 sps:$4 sm:$0xff]  }
 0x252   :  { %3003 = vmatprep.mubr.bf16.mxu1 %v2178_v3  ;;  %3085 = vmatprep.mubr.bf16.mxu0 %v2178_v3  ;;  %v5342_v1 = vld [vmem:[#allocation10 + $0x3e4] ss:$16 sps:$4 sm:$0xff]   ;;  %v5345_v3 = vld [vmem:[#allocation10 + $0x3ec] ss:$16 sps:$4 sm:$0xff]   ;;  %vm2167_vm4 = vcmp.gt.f32.partialorder %v5910_v46, 0.0 }
 0x253   :  { %3004 = vmatmul.mubr.bf16.vlgmr.msra.gmra.mrb[12].mxu1 %v2177_v7  ;;  %3086 = vmatmul.mubr.bf16.vlgmr.msra.gmra.mrb[12].mxu0 %v2177_v7  ;;  %v5343_v6 = vld [vmem:[#allocation10 + $0x3e8] ss:$16 sps:$4 sm:$0xff]   ;;  %v5348_v7 = vld [vmem:[#allocation11 + $0x4] ss:$16 sps:$4 sm:$0xff]  }
 0x254   :  { %3013 = vmatpush1.bf16.msra.mxu1 %v5250_v4  ;;  %3095 = vmatpush1.bf16.msra.mxu0 %v5253_v0  ;;  %v2171_v4 = vmul.f32 0.2, %v5910_v46  ;;  %v5340_v0 = vld [vmem:[#allocation10 + $0x3e0] ss:$16 sps:$4 sm:$0xff]  }
 0x255   :  { %3044 = vmatprep.mubr.bf16.mxu1 %v2180_v8  ;;  %3126 = vmatprep.mubr.bf16.mxu0 %v2180_v8  ;;  %v5346_v8 = vld [vmem:[#allocation11] ss:$16 sps:$4 sm:$0xff]  }
 0x256   :  { %3014 = vmatprep.subr.bf16.mxu1 %v5258_v2  ;;  %3096 = vmatprep.subr.bf16.mxu0 %v5261_v5  ;;  %v5351_v2 = vld [vmem:[#allocation11 + $0xc] ss:$16 sps:$4 sm:$0xff]   ;;  %v2175_v5 = vsel %vm2167_vm4, %v5910_v46, %v2171_v4  ;;  %v5358_v46 = vld [vmem:[#allocation11 + $0x40] ss:$16 sps:$4 sm:$0xff]   ;;  %v5433_v4 = vld [vmem:[#allocation11 + $0x1c8] ss:$16 sps:$4 sm:$0xff]  }
 0x258   :  { %3015 = vmatpush1.bf16.msra.mxu1 %v5256_v53  ;;  %3097 = vmatpush1.bf16.msra.mxu0 %v5259_v9  ;;  %v5349_v53 = vld [vmem:[#allocation11 + $0x8] ss:$16 sps:$4 sm:$0xff]   ;;  %v2179_v9 = vpack.c.bf16 %v2175_v5, %v2175_v5  ;;  %v5444_v5 = vld [vmem:[#allocation11 + $0x204] ss:$16 sps:$4 sm:$0xff]  }
 0x259   :  { %3016 = vmatprep.subr.bf16.mxu1 %v5264_v52  ;;  %3098 = vmatprep.subr.bf16.mxu0 %v5267_v10  ;;  %v5354_v52 = vld [vmem:[#allocation11 + $0x24] ss:$16 sps:$4 sm:$0xff]   ;;  %v5357_v10 = vld [vmem:[#allocation11 + $0x2c] ss:$16 sps:$4 sm:$0xff]  }
 0x25c   :  { %3017 = vmatpush1.bf16.msra.mxu1 %v5262_v57  ;;  %3099 = vmatpush1.bf16.msra.mxu0 %v5265_v11  ;;  %v5352_v57 = vld [vmem:[#allocation11 + $0x20] ss:$16 sps:$4 sm:$0xff]   ;;  %v5355_v11 = vld [vmem:[#allocation11 + $0x28] ss:$16 sps:$4 sm:$0xff]  }
 0x25d   :  { %3018 = vmatprep.subr.bf16.mxu1 %v5270_v12  ;;  %3100 = vmatprep.subr.bf16.mxu0 %v5273_v56  ;;  %v5360_v12 = vld [vmem:[#allocation11 + $0x44] ss:$16 sps:$4 sm:$0xff]   ;;  %v5363_v56 = vld [vmem:[#allocation11 + $0x4c] ss:$16 sps:$4 sm:$0xff]  }
 0x260   :  { %3019 = vmatpush1.bf16.msra.mxu1 %v5268_v13  ;;  %3101 = vmatpush1.bf16.msra.mxu0 %v5271_v14  ;;  %v5361_v13 = vld [vmem:[#allocation11 + $0x48] ss:$16 sps:$4 sm:$0xff]   ;;  %v5366_v14 = vld [vmem:[#allocation11 + $0x64] ss:$16 sps:$4 sm:$0xff]  }
 0x261   :  { %3020 = vmatprep.subr.bf16.mxu1 %v5276_v15  ;;  %3102 = vmatprep.subr.bf16.mxu0 %v5279_v16  ;;  %v5369_v15 = vld [vmem:[#allocation11 + $0x6c] ss:$16 sps:$4 sm:$0xff]   ;;  %v5364_v16 = vld [vmem:[#allocation11 + $0x60] ss:$16 sps:$4 sm:$0xff]  }
 0x264   :  { %3021 = vmatpush1.bf16.msra.mxu1 %v5274_v17  ;;  %3103 = vmatpush1.bf16.msra.mxu0 %v5277_v18  ;;  %v5367_v17 = vld [vmem:[#allocation11 + $0x68] ss:$16 sps:$4 sm:$0xff]   ;;  %v5372_v18 = vld [vmem:[#allocation11 + $0x84] ss:$16 sps:$4 sm:$0xff]  }
 0x265   :  { %3022 = vmatprep.subr.bf16.mxu1 %v5282_v19  ;;  %3104 = vmatprep.subr.bf16.mxu0 %v5285_v20  ;;  %v5375_v19 = vld [vmem:[#allocation11 + $0x8c] ss:$16 sps:$4 sm:$0xff]   ;;  %v5370_v20 = vld [vmem:[#allocation11 + $0x80] ss:$16 sps:$4 sm:$0xff]  }
 0x268   :  { %3023 = vmatpush1.bf16.msra.mxu1 %v5280_v21  ;;  %3105 = vmatpush1.bf16.msra.mxu0 %v5283_v22  ;;  %v5373_v21 = vld [vmem:[#allocation11 + $0x88] ss:$16 sps:$4 sm:$0xff]   ;;  %v5378_v22 = vld [vmem:[#allocation11 + $0xa4] ss:$16 sps:$4 sm:$0xff]  }
 0x269   :  { %3024 = vmatprep.subr.bf16.mxu1 %v5288_v24  ;;  %3106 = vmatprep.subr.bf16.mxu0 %v5291_v25  ;;  %v5381_v24 = vld [vmem:[#allocation11 + $0xac] ss:$16 sps:$4 sm:$0xff]   ;;  %v5376_v25 = vld [vmem:[#allocation11 + $0xa0] ss:$16 sps:$4 sm:$0xff]  }
 0x26c   :  { %3025 = vmatpush1.bf16.msra.mxu1 %v5286_v27  ;;  %3107 = vmatpush1.bf16.msra.mxu0 %v5289_v28  ;;  %v5379_v27 = vld [vmem:[#allocation11 + $0xa8] ss:$16 sps:$4 sm:$0xff]   ;;  %v5384_v28 = vld [vmem:[#allocation11 + $0xc4] ss:$16 sps:$4 sm:$0xff]  }
 0x26d   :  { %3026 = vmatprep.subr.bf16.mxu1 %v5294_v29  ;;  %3108 = vmatprep.subr.bf16.mxu0 %v5297_v30  ;;  %v5387_v29 = vld [vmem:[#allocation11 + $0xcc] ss:$16 sps:$4 sm:$0xff]   ;;  %v5382_v30 = vld [vmem:[#allocation11 + $0xc0] ss:$16 sps:$4 sm:$0xff]  }
 0x270   :  { %3027 = vmatpush1.bf16.msra.mxu1 %v5292_v31  ;;  %3109 = vmatpush1.bf16.msra.mxu0 %v5295_v32  ;;  %v5385_v31 = vld [vmem:[#allocation11 + $0xc8] ss:$16 sps:$4 sm:$0xff]   ;;  %v5390_v32 = vld [vmem:[#allocation11 + $0xe4] ss:$16 sps:$4 sm:$0xff]  }
 0x271   :  { %3028 = vmatprep.subr.bf16.mxu1 %v5300_v33  ;;  %3110 = vmatprep.subr.bf16.mxu0 %v5303_v23  ;;  %v5393_v33 = vld [vmem:[#allocation11 + $0xec] ss:$16 sps:$4 sm:$0xff]   ;;  %v5388_v23 = vld [vmem:[#allocation11 + $0xe0] ss:$16 sps:$4 sm:$0xff]  }
 0x274   :  { %3029 = vmatpush1.bf16.msra.mxu1 %v5298_v34  ;;  %3111 = vmatpush1.bf16.msra.mxu0 %v5301_v35  ;;  %v5391_v34 = vld [vmem:[#allocation11 + $0xe8] ss:$16 sps:$4 sm:$0xff]   ;;  %v5396_v35 = vld [vmem:[#allocation11 + $0x104] ss:$16 sps:$4 sm:$0xff]  }
 0x275   :  { %3030 = vmatprep.subr.bf16.mxu1 %v5306_v36  ;;  %3112 = vmatprep.subr.bf16.mxu0 %v5309_v37  ;;  %v5399_v36 = vld [vmem:[#allocation11 + $0x10c] ss:$16 sps:$4 sm:$0xff]   ;;  %v5394_v37 = vld [vmem:[#allocation11 + $0x100] ss:$16 sps:$4 sm:$0xff]  }
 0x278   :  { %3031 = vmatpush1.bf16.msra.mxu1 %v5304_v38  ;;  %3113 = vmatpush1.bf16.msra.mxu0 %v5307_v39  ;;  %v5397_v38 = vld [vmem:[#allocation11 + $0x108] ss:$16 sps:$4 sm:$0xff]   ;;  %v5402_v39 = vld [vmem:[#allocation11 + $0x124] ss:$16 sps:$4 sm:$0xff]  }
 0x279   :  { %3032 = vmatprep.subr.bf16.mxu1 %v5312_v40  ;;  %3114 = vmatprep.subr.bf16.mxu0 %v5315_v41  ;;  %v5405_v40 = vld [vmem:[#allocation11 + $0x12c] ss:$16 sps:$4 sm:$0xff]   ;;  %v5400_v41 = vld [vmem:[#allocation11 + $0x120] ss:$16 sps:$4 sm:$0xff]  }
 0x27c   :  { %3033 = vmatpush1.bf16.msra.mxu1 %v5310_v42  ;;  %3115 = vmatpush1.bf16.msra.mxu0 %v5313_v26  ;;  %v5403_v42 = vld [vmem:[#allocation11 + $0x128] ss:$16 sps:$4 sm:$0xff]   ;;  %v5408_v26 = vld [vmem:[#allocation11 + $0x144] ss:$16 sps:$4 sm:$0xff]  }
 0x27d   :  { %3034 = vmatprep.subr.bf16.mxu1 %v5318_v43  ;;  %3116 = vmatprep.subr.bf16.mxu0 %v5321_v44  ;;  %v5411_v43 = vld [vmem:[#allocation11 + $0x14c] ss:$16 sps:$4 sm:$0xff]   ;;  %v5406_v44 = vld [vmem:[#allocation11 + $0x140] ss:$16 sps:$4 sm:$0xff]  }
 0x280   :  { %3035 = vmatpush1.bf16.msra.mxu1 %v5316_v45  ;;  %3117 = vmatpush1.bf16.msra.mxu0 %v5319_v47  ;;  %v5409_v45 = vld [vmem:[#allocation11 + $0x148] ss:$16 sps:$4 sm:$0xff]   ;;  %v5414_v47 = vld [vmem:[#allocation11 + $0x164] ss:$16 sps:$4 sm:$0xff]  }
 0x281   :  { %3036 = vmatprep.subr.bf16.mxu1 %v5324_v48  ;;  %3118 = vmatprep.subr.bf16.mxu0 %v5327_v49  ;;  %v5417_v48 = vld [vmem:[#allocation11 + $0x16c] ss:$16 sps:$4 sm:$0xff]   ;;  %v5412_v49 = vld [vmem:[#allocation11 + $0x160] ss:$16 sps:$4 sm:$0xff]  }
 0x284   :  { %3037 = vmatpush1.bf16.msra.mxu1 %v5322_v50  ;;  %3119 = vmatpush1.bf16.msra.mxu0 %v5325_v51  ;;  %v5415_v50 = vld [vmem:[#allocation11 + $0x168] ss:$16 sps:$4 sm:$0xff]   ;;  %v5420_v51 = vld [vmem:[#allocation11 + $0x184] ss:$16 sps:$4 sm:$0xff]  }
 0x285   :  { %3038 = vmatprep.subr.bf16.mxu1 %v5330_v54  ;;  %3120 = vmatprep.subr.bf16.mxu0 %v5333_v55  ;;  %v5423_v54 = vld [vmem:[#allocation11 + $0x18c] ss:$16 sps:$4 sm:$0xff]   ;;  %v5418_v55 = vld [vmem:[#allocation11 + $0x180] ss:$16 sps:$4 sm:$0xff]  }
 0x288   :  { %3039 = vmatpush1.bf16.msra.mxu1 %v5328_v58  ;;  %3121 = vmatpush1.bf16.msra.mxu0 %v5331_v59  ;;  %v5421_v58 = vld [vmem:[#allocation11 + $0x188] ss:$16 sps:$4 sm:$0xff]   ;;  %v5426_v59 = vld [vmem:[#allocation11 + $0x1a4] ss:$16 sps:$4 sm:$0xff]  }
 0x289   :  { %3040 = vmatprep.subr.bf16.mxu1 %v5336_v60  ;;  %3122 = vmatprep.subr.bf16.mxu0 %v5339_v61  ;;  %v5429_v60 = vld [vmem:[#allocation11 + $0x1ac] ss:$16 sps:$4 sm:$0xff]   ;;  %v5424_v61 = vld [vmem:[#allocation11 + $0x1a0] ss:$16 sps:$4 sm:$0xff]  }
 0x28c   :  { %3041 = vmatpush1.bf16.msra.mxu1 %v5334_v63  ;;  %3123 = vmatpush1.bf16.msra.mxu0 %v5337_v62  ;;  %v5427_v63 = vld [vmem:[#allocation11 + $0x1a8] ss:$16 sps:$4 sm:$0xff]   ;;  %v5432_v62 = vld [vmem:[#allocation11 + $0x1c4] ss:$16 sps:$4 sm:$0xff]  }
 0x28d   :  { %3042 = vmatprep.subr.bf16.mxu1 %v5342_v1  ;;  %3124 = vmatprep.subr.bf16.mxu0 %v5345_v3  ;;  %v5435_v1 = vld [vmem:[#allocation11 + $0x1cc] ss:$16 sps:$4 sm:$0xff]   ;;  %v5430_v3 = vld [vmem:[#allocation11 + $0x1c0] ss:$16 sps:$4 sm:$0xff]  }
 0x290   :  { %3043 = vmatpush1.bf16.msra.mxu1 %v5340_v0  ;;  %3125 = vmatpush1.bf16.msra.mxu0 %v5343_v6  ;;  %v5438_v0 = vld [vmem:[#allocation11 + $0x1e4] ss:$16 sps:$4 sm:$0xff]   ;;  %v5441_v6 = vld [vmem:[#allocation11 + $0x1ec] ss:$16 sps:$4 sm:$0xff]  }
 0x291   :  { %3941 = vmatprep.subr.bf16.mxu1 %v5348_v7  ;;  %4023 = vmatprep.subr.bf16.mxu0 %v5351_v2  ;;  %v5436_v7 = vld [vmem:[#allocation11 + $0x1e0] ss:$16 sps:$4 sm:$0xff]   ;;  %v5439_v2 = vld [vmem:[#allocation11 + $0x1e8] ss:$16 sps:$4 sm:$0xff]  }
 0x293   :  { %3045 = vmatmul.mubr.bf16.vlgmr.msra.gmra.mrb[12].mxu1 %v2179_v9  ;;  %3127 = vmatmul.mubr.bf16.vlgmr.msra.gmra.mrb[12].mxu0 %v2179_v9 }
 0x294   :  { %3942 = vmatpush1.bf16.msra.mxu1 %v5346_v8  ;;  %4024 = vmatpush1.bf16.msra.mxu0 %v5349_v53  ;;  %v5447_v8 = vld [vmem:[#allocation11 + $0x20c] ss:$16 sps:$4 sm:$0xff]   ;;  %v2311_v53 = vlaneseq }
 0x295   :  { %3943 = vmatprep.subr.bf16.mxu1 %v5354_v52  ;;  %4025 = vmatprep.subr.bf16.mxu0 %v5357_v10  ;;  %v5926_v10 = vld [vmem:[%s5982_s5] sm:$0xf] }
 0x296   :  { %v5918_v9 = vshrl.u32 %v2311_v53, 7  ;;  %v5501_v53 = vld [vmem:[#allocation11 + $0x32c] ss:$16 sps:$4 sm:$0xff]  }
 0x298   :  { %3944 = vmatpush1.bf16.msra.mxu1 %v5352_v57  ;;  %4026 = vmatpush1.bf16.msra.mxu0 %v5355_v11  ;;  %v5921_v52 = vsub.s32 0, %v5918_v9  ;;  %v5929_v57 = vsub.s32 1, %v5918_v9  ;;  %v5932_v11 = vsub.s32 3, %v5918_v9 }
 0x299   :  { %3945 = vmatprep.subr.bf16.mxu1 %v5360_v12  ;;  %4027 = vmatprep.subr.bf16.mxu0 %v5363_v56 }
 0x29a   :  { %v2314_v12 = vrot.slane %v5926_v10, %v5921_v52  ;;  %v2318_v56 = vrot.slane %v5926_v10, %v5929_v57 }
 0x29c   :  { %3946 = vmatpush1.bf16.msra.mxu1 %v5358_v46  ;;  %4028 = vmatpush1.bf16.msra.mxu0 %v5361_v13  ;;  %v2326_v46 = vrot.slane %v5926_v10, %v5932_v11 }
 0x29d   :  { %3947 = vmatprep.subr.bf16.mxu1 %v5366_v14  ;;  %4029 = vmatprep.subr.bf16.mxu0 %v5369_v15 }
 0x2a0   :  { %3948 = vmatpush1.bf16.msra.mxu1 %v5364_v16  ;;  %4030 = vmatpush1.bf16.msra.mxu0 %v5367_v17 }
 0x2a1   :  { %3949 = vmatprep.subr.bf16.mxu1 %v5372_v18  ;;  %4031 = vmatprep.subr.bf16.mxu0 %v5375_v19 }
 0x2a4   :  { %3950 = vmatpush1.bf16.msra.mxu1 %v5370_v20  ;;  %4032 = vmatpush1.bf16.msra.mxu0 %v5373_v21 }
 0x2a5   :  { %3951 = vmatprep.subr.bf16.mxu1 %v5378_v22  ;;  %4033 = vmatprep.subr.bf16.mxu0 %v5381_v24 }
 0x2a8   :  { %3952 = vmatpush1.bf16.msra.mxu1 %v5376_v25  ;;  %4034 = vmatpush1.bf16.msra.mxu0 %v5379_v27 }
 0x2a9   :  { %3953 = vmatprep.subr.bf16.mxu1 %v5384_v28  ;;  %4035 = vmatprep.subr.bf16.mxu0 %v5387_v29 }
 0x2ac   :  { %3954 = vmatpush1.bf16.msra.mxu1 %v5382_v30  ;;  %4036 = vmatpush1.bf16.msra.mxu0 %v5385_v31 }
 0x2ad   :  { %3955 = vmatprep.subr.bf16.mxu1 %v5390_v32  ;;  %4037 = vmatprep.subr.bf16.mxu0 %v5393_v33  ;;  %v5442_v32 = vld [vmem:[#allocation11 + $0x200] ss:$16 sps:$4 sm:$0xff]   ;;  %v5445_v33 = vld [vmem:[#allocation11 + $0x208] ss:$16 sps:$4 sm:$0xff]  }
 0x2b0   :  { %3956 = vmatpush1.bf16.msra.mxu1 %v5388_v23  ;;  %4038 = vmatpush1.bf16.msra.mxu0 %v5391_v34 }
 0x2b1   :  { %3957 = vmatprep.subr.bf16.mxu1 %v5396_v35  ;;  %4039 = vmatprep.subr.bf16.mxu0 %v5399_v36  ;;  %v5450_v35 = vld [vmem:[#allocation11 + $0x224] ss:$16 sps:$4 sm:$0xff]   ;;  %v5453_v36 = vld [vmem:[#allocation11 + $0x22c] ss:$16 sps:$4 sm:$0xff]  }
 0x2b4   :  { %3958 = vmatpush1.bf16.msra.mxu1 %v5394_v37  ;;  %4040 = vmatpush1.bf16.msra.mxu0 %v5397_v38  ;;  %v5448_v38 = vld [vmem:[#allocation11 + $0x220] ss:$16 sps:$4 sm:$0xff]  }
 0x2b5   :  { %3959 = vmatprep.subr.bf16.mxu1 %v5402_v39  ;;  %4041 = vmatprep.subr.bf16.mxu0 %v5405_v40  ;;  %v5451_v39 = vld [vmem:[#allocation11 + $0x228] ss:$16 sps:$4 sm:$0xff]   ;;  %v5456_v40 = vld [vmem:[#allocation11 + $0x244] ss:$16 sps:$4 sm:$0xff]  }
 0x2b8   :  { %3960 = vmatpush1.bf16.msra.mxu1 %v5400_v41  ;;  %4042 = vmatpush1.bf16.msra.mxu0 %v5403_v42  ;;  %v5459_v41 = vld [vmem:[#allocation11 + $0x24c] ss:$16 sps:$4 sm:$0xff]   ;;  %v5454_v42 = vld [vmem:[#allocation11 + $0x240] ss:$16 sps:$4 sm:$0xff]  }
 0x2b9   :  { %3961 = vmatprep.subr.bf16.mxu1 %v5408_v26  ;;  %4043 = vmatprep.subr.bf16.mxu0 %v5411_v43  ;;  %v5457_v26 = vld [vmem:[#allocation11 + $0x248] ss:$16 sps:$4 sm:$0xff]   ;;  %v5462_v43 = vld [vmem:[#allocation11 + $0x264] ss:$16 sps:$4 sm:$0xff]  }
 0x2bc   :  { %3962 = vmatpush1.bf16.msra.mxu1 %v5406_v44  ;;  %4044 = vmatpush1.bf16.msra.mxu0 %v5409_v45  ;;  %v5465_v44 = vld [vmem:[#allocation11 + $0x26c] ss:$16 sps:$4 sm:$0xff]   ;;  %v5460_v45 = vld [vmem:[#allocation11 + $0x260] ss:$16 sps:$4 sm:$0xff]  }
 0x2bd   :  { %3963 = vmatprep.subr.bf16.mxu1 %v5414_v47  ;;  %4045 = vmatprep.subr.bf16.mxu0 %v5417_v48  ;;  %v5463_v47 = vld [vmem:[#allocation11 + $0x268] ss:$16 sps:$4 sm:$0xff]   ;;  %v5468_v48 = vld [vmem:[#allocation11 + $0x284] ss:$16 sps:$4 sm:$0xff]  }
 0x2c0   :  { %3964 = vmatpush1.bf16.msra.mxu1 %v5412_v49  ;;  %4046 = vmatpush1.bf16.msra.mxu0 %v5415_v50  ;;  %v5471_v49 = vld [vmem:[#allocation11 + $0x28c] ss:$16 sps:$4 sm:$0xff]   ;;  %v5466_v50 = vld [vmem:[#allocation11 + $0x280] ss:$16 sps:$4 sm:$0xff]  }
 0x2c1   :  { %3965 = vmatprep.subr.bf16.mxu1 %v5420_v51  ;;  %4047 = vmatprep.subr.bf16.mxu0 %v5423_v54  ;;  %v5469_v51 = vld [vmem:[#allocation11 + $0x288] ss:$16 sps:$4 sm:$0xff]   ;;  %v5474_v54 = vld [vmem:[#allocation11 + $0x2a4] ss:$16 sps:$4 sm:$0xff]  }
 0x2c4   :  { %3966 = vmatpush1.bf16.msra.mxu1 %v5418_v55  ;;  %4048 = vmatpush1.bf16.msra.mxu0 %v5421_v58  ;;  %v5477_v55 = vld [vmem:[#allocation11 + $0x2ac] ss:$16 sps:$4 sm:$0xff]   ;;  %v5472_v58 = vld [vmem:[#allocation11 + $0x2a0] ss:$16 sps:$4 sm:$0xff]  }
 0x2c5   :  { %3967 = vmatprep.subr.bf16.mxu1 %v5426_v59  ;;  %4049 = vmatprep.subr.bf16.mxu0 %v5429_v60  ;;  %v5475_v59 = vld [vmem:[#allocation11 + $0x2a8] ss:$16 sps:$4 sm:$0xff]   ;;  %v5480_v60 = vld [vmem:[#allocation11 + $0x2c4] ss:$16 sps:$4 sm:$0xff]  }
 0x2c8   :  { %3968 = vmatpush1.bf16.msra.mxu1 %v5424_v61  ;;  %4050 = vmatpush1.bf16.msra.mxu0 %v5427_v63  ;;  %v5483_v61 = vld [vmem:[#allocation11 + $0x2cc] ss:$16 sps:$4 sm:$0xff]   ;;  %v5478_v63 = vld [vmem:[#allocation11 + $0x2c0] ss:$16 sps:$4 sm:$0xff]  }
 0x2c9   :  { %3969 = vmatprep.subr.bf16.mxu1 %v5432_v62  ;;  %4051 = vmatprep.subr.bf16.mxu0 %v5435_v1  ;;  %v5481_v62 = vld [vmem:[#allocation11 + $0x2c8] ss:$16 sps:$4 sm:$0xff]   ;;  %v5486_v1 = vld [vmem:[#allocation11 + $0x2e4] ss:$16 sps:$4 sm:$0xff]  }
 0x2cc   :  { %3970 = vmatpush1.bf16.msra.mxu1 %v5430_v3  ;;  %4052 = vmatpush1.bf16.msra.mxu0 %v5433_v4  ;;  %v5489_v3 = vld [vmem:[#allocation11 + $0x2ec] ss:$16 sps:$4 sm:$0xff]   ;;  %v5484_v4 = vld [vmem:[#allocation11 + $0x2e0] ss:$16 sps:$4 sm:$0xff]  }
 0x2cd   :  { %3971 = vmatprep.subr.bf16.mxu1 %v5438_v0  ;;  %4053 = vmatprep.subr.bf16.mxu0 %v5441_v6  ;;  %v5487_v0 = vld [vmem:[#allocation11 + $0x2e8] ss:$16 sps:$4 sm:$0xff]   ;;  %v5492_v6 = vld [vmem:[#allocation11 + $0x304] ss:$16 sps:$4 sm:$0xff]  }
 0x2d0   :  { %3972 = vmatpush1.bf16.msra.mxu1 %v5436_v7  ;;  %4054 = vmatpush1.bf16.msra.mxu0 %v5439_v2  ;;  %v5495_v7 = vld [vmem:[#allocation11 + $0x30c] ss:$16 sps:$4 sm:$0xff]   ;;  %v5490_v2 = vld [vmem:[#allocation11 + $0x300] ss:$16 sps:$4 sm:$0xff]  }
 0x2d1   :  { %3982 = vmatprep.subr.bf16.mxu1 %v5444_v5  ;;  %4064 = vmatprep.subr.bf16.mxu0 %v5447_v8  ;;  %v5493_v5 = vld [vmem:[#allocation11 + $0x308] ss:$16 sps:$4 sm:$0xff]   ;;  %v5498_v8 = vld [vmem:[#allocation11 + $0x324] ss:$16 sps:$4 sm:$0xff]  }
 0x366   :  { %v3046_v13 = vpop.f32.mrb[12].mxu1  ;;  %v5940_v14 = vpop.f32.mrb[12].mxu0 }
 0x367   :  { %v4710_v15 = vadd.f32 %v3046_v13, %v2314_v12  ;;  %v3048_v16 = vpop.f32.mrb[13].mxu1  ;;  %v3130_v17 = vpop.f32.mrb[13].mxu0  ;;  %v5496_v12 = vld [vmem:[#allocation11 + $0x320] ss:$16 sps:$4 sm:$0xff]   ;;  %v5507_v13 = vld [vmem:[#allocation11 + $0x34c] ss:$16 sps:$4 sm:$0xff]  }
 0x368   :  { %v4711_v18 = vadd.f32 %v3048_v16, %v2318_v56  ;;  %v4713_v19 = vadd.f32 %v3130_v17, %v2326_v46  ;;  %v3050_v20 = vpop.f32.mrb[14].mxu1  ;;  %v3132_v21 = vpop.f32.mrb[14].mxu0  ;;  %v5499_v56 = vld [vmem:[#allocation11 + $0x328] ss:$16 sps:$4 sm:$0xff]   ;;  %v5504_v46 = vld [vmem:[#allocation11 + $0x344] ss:$16 sps:$4 sm:$0xff]  }
 0x369   :  { %vm3135_vm5 = vcmp.gt.f32.partialorder %v4710_v15, 0.0  ;;  %v3139_v22 = vmul.f32 0.2, %v4710_v15  ;;  %v3051_v28 = vpop.f32.mrb[15].mxu1  ;;  %v3133_v29 = vpop.f32.mrb[15].mxu0 }
 0x36a   :  { %vm3136_vm6 = vcmp.gt.f32.partialorder %v4711_v18, 0.0  ;;  %v3140_v24 = vmul.f32 0.2, %v4711_v18  ;;  %vm3138_vm7 = vcmp.gt.f32.partialorder %v4713_v19, 0.0  ;;  %v3142_v25 = vmul.f32 0.2, %v4713_v19 }
 0x36b   :  { %v3143_v27 = vsel %vm3135_vm5, %v4710_v15, %v3139_v22  ;;  %v5502_v15 = vld [vmem:[#allocation11 + $0x340] ss:$16 sps:$4 sm:$0xff]   ;;  %v5505_v16 = vld [vmem:[#allocation11 + $0x348] ss:$16 sps:$4 sm:$0xff]   ;;  %v5510_v17 = vld [vmem:[#allocation11 + $0x364] ss:$16 sps:$4 sm:$0xff]  }
 0x36c   :  { %v3144_v30 = vsel %vm3136_vm6, %v4711_v18, %v3140_v24  ;;  %v3146_v23 = vsel %vm3138_vm7, %v4713_v19, %v3142_v25  ;;  %v3147_v34 = vpack.c.bf16 %v3143_v27, %v3143_v27  ;;  %v5513_v18 = vld [vmem:[#allocation11 + $0x36c] ss:$16 sps:$4 sm:$0xff]   ;;  %v5508_v19 = vld [vmem:[#allocation11 + $0x360] ss:$16 sps:$4 sm:$0xff]   ;;  %v5511_v20 = vld [vmem:[#allocation11 + $0x368] ss:$16 sps:$4 sm:$0xff]  }
 0x36d   :  { %v3148_v31 = vpack.c.bf16 %v3144_v30, %v3144_v30  ;;  %v3150_v37 = vpack.c.bf16 %v3146_v23, %v3146_v23  ;;  %v5516_v21 = vld [vmem:[#allocation11 + $0x384] ss:$16 sps:$4 sm:$0xff]   ;;  %v5519_v22 = vld [vmem:[#allocation11 + $0x38c] ss:$16 sps:$4 sm:$0xff]   ;;  %v5943_v24 = vsub.s32 2, %v5918_v9 }
 0x36e   :  { %v5514_v25 = vld [vmem:[#allocation11 + $0x380] ss:$16 sps:$4 sm:$0xff]   ;;  %v5517_v27 = vld [vmem:[#allocation11 + $0x388] ss:$16 sps:$4 sm:$0xff]   ;;  %v5522_v28 = vld [vmem:[#allocation11 + $0x3a4] ss:$16 sps:$4 sm:$0xff]  }
 0x36f   :  { %3973 = vmatprep.mubr.bf16.mxu1 %v3148_v31  ;;  %4055 = vmatprep.mubr.bf16.mxu0 %v3148_v31  ;;  %v5525_v29 = vld [vmem:[#allocation11 + $0x3ac] ss:$16 sps:$4 sm:$0xff]   ;;  %v2322_v30 = vrot.slane %v5926_v10, %v5943_v24  ;;  %v5520_v31 = vld [vmem:[#allocation11 + $0x3a0] ss:$16 sps:$4 sm:$0xff]  }
 0x370   :  { %3974 = vmatmul.mubr.bf16.vlgmr.msra.gmra.mrb[16].mxu1 %v3147_v34  ;;  %4056 = vmatmul.mubr.bf16.vlgmr.msra.gmra.mrb[16].mxu0 %v3147_v34  ;;  %v5531_v9 = vld [vmem:[#allocation11 + $0x3cc] ss:$16 sps:$4 sm:$0xff]   ;;  %v5526_v34 = vld [vmem:[#allocation11 + $0x3c0] ss:$16 sps:$4 sm:$0xff]  }
 0x371   :  { %3983 = vmatpush1.bf16.msra.mxu1 %v5442_v32  ;;  %4065 = vmatpush1.bf16.msra.mxu0 %v5445_v33  ;;  %v5523_v32 = vld [vmem:[#allocation11 + $0x3a8] ss:$16 sps:$4 sm:$0xff]   ;;  %v5528_v33 = vld [vmem:[#allocation11 + $0x3c4] ss:$16 sps:$4 sm:$0xff]   ;;  %v4712_v23 = vadd.f32 %v5940_v14, %v2322_v30  ;;  %v5532_v10 = vld [vmem:[#allocation11 + $0x3e0] ss:$16 sps:$4 sm:$0xff]  }
 0x372   :  { %4014 = vmatprep.mubr.bf16.mxu1 %v3150_v37  ;;  %4096 = vmatprep.mubr.bf16.mxu0 %v3150_v37  ;;  %v5537_v37 = vld [vmem:[#allocation11 + $0x3ec] ss:$16 sps:$4 sm:$0xff]  }
 0x373   :  { %3984 = vmatprep.subr.bf16.mxu1 %v5450_v35  ;;  %4066 = vmatprep.subr.bf16.mxu0 %v5453_v36  ;;  %v5529_v35 = vld [vmem:[#allocation11 + $0x3c8] ss:$16 sps:$4 sm:$0xff]   ;;  %v5534_v36 = vld [vmem:[#allocation11 + $0x3e4] ss:$16 sps:$4 sm:$0xff]   ;;  %vm3137_vm8 = vcmp.gt.f32.partialorder %v4712_v23, 0.0 }
 0x375   :  { %3985 = vmatpush1.bf16.msra.mxu1 %v5448_v38  ;;  %4067 = vmatpush1.bf16.msra.mxu0 %v5451_v39  ;;  %v3141_v38 = vmul.f32 0.2, %v4712_v23  ;;  %v5535_v39 = vld [vmem:[#allocation11 + $0x3e8] ss:$16 sps:$4 sm:$0xff]  }
 0x376   :  { %3986 = vmatprep.subr.bf16.mxu1 %v5456_v40  ;;  %4068 = vmatprep.subr.bf16.mxu0 %v5459_v41  ;;  %v3279_v41 = vld [vmem:[%s5984_s7] sm:$0xf] }
 0x377   :  { %v3145_v40 = vsel %vm3137_vm8, %v4712_v23, %v3141_v38 }
 0x378   :  { %v3149_v14 = vpack.c.bf16 %v3145_v40, %v3145_v40 }
 0x379   :  { %3987 = vmatpush1.bf16.msra.mxu1 %v5454_v42  ;;  %4069 = vmatpush1.bf16.msra.mxu0 %v5457_v26  ;;  %v3284_v42 = vrot.slane %v3279_v41, %v5921_v52  ;;  %v3292_v26 = vrot.slane %v3279_v41, %v5943_v24 }
 0x37a   :  { %3988 = vmatprep.subr.bf16.mxu1 %v5462_v43  ;;  %4070 = vmatprep.subr.bf16.mxu0 %v5465_v44  ;;  %v3288_v43 = vrot.slane %v3279_v41, %v5929_v57  ;;  %v3296_v44 = vrot.slane %v3279_v41, %v5932_v11 }
 0x37d   :  { %3989 = vmatpush1.bf16.msra.mxu1 %v5460_v45  ;;  %4071 = vmatpush1.bf16.msra.mxu0 %v5463_v47  ;;  %v4117_v45 = vld [vmem:[%s5985_s8] sm:$0xf] }
 0x37e   :  { %3990 = vmatprep.subr.bf16.mxu1 %v5468_v48  ;;  %4072 = vmatprep.subr.bf16.mxu0 %v5471_v49 }
 0x381   :  { %3991 = vmatpush1.bf16.msra.mxu1 %v5466_v50  ;;  %4073 = vmatpush1.bf16.msra.mxu0 %v5469_v51 }
 0x382   :  { %3992 = vmatprep.subr.bf16.mxu1 %v5474_v54  ;;  %4074 = vmatprep.subr.bf16.mxu0 %v5477_v55 }
 0x385   :  { %3993 = vmatpush1.bf16.msra.mxu1 %v5472_v58  ;;  %4075 = vmatpush1.bf16.msra.mxu0 %v5475_v59 }
 0x386   :  { %3994 = vmatprep.subr.bf16.mxu1 %v5480_v60  ;;  %4076 = vmatprep.subr.bf16.mxu0 %v5483_v61  ;;  %v4122_v61 = vrot.slane %v4117_v45, %v5921_v52  ;;  %v4134_v52 = vrot.slane %v4117_v45, %v5932_v11 }
 0x389   :  { %3995 = vmatpush1.bf16.msra.mxu1 %v5478_v63  ;;  %4077 = vmatpush1.bf16.msra.mxu0 %v5481_v62  ;;  %v4126_v63 = vrot.slane %v4117_v45, %v5929_v57 }
 0x38a   :  { %3996 = vmatprep.subr.bf16.mxu1 %v5486_v1  ;;  %4078 = vmatprep.subr.bf16.mxu0 %v5489_v3 }
 0x38d   :  { %3997 = vmatpush1.bf16.msra.mxu1 %v5484_v4  ;;  %4079 = vmatpush1.bf16.msra.mxu0 %v5487_v0 }
 0x38e   :  { %3998 = vmatprep.subr.bf16.mxu1 %v5492_v6  ;;  %4080 = vmatprep.subr.bf16.mxu0 %v5495_v7 }
 0x391   :  { %3999 = vmatpush1.bf16.msra.mxu1 %v5490_v2  ;;  %4081 = vmatpush1.bf16.msra.mxu0 %v5493_v5  ;;  %v4130_v2 = vrot.slane %v4117_v45, %v5943_v24 }
 0x392   :  { %4000 = vmatprep.subr.bf16.mxu1 %v5498_v8  ;;  %4082 = vmatprep.subr.bf16.mxu0 %v5501_v53 }
 0x395   :  { %4001 = vmatpush1.bf16.msra.mxu1 %v5496_v12  ;;  %4083 = vmatpush1.bf16.msra.mxu0 %v5499_v56 }
 0x396   :  { %4002 = vmatprep.subr.bf16.mxu1 %v5504_v46  ;;  %4084 = vmatprep.subr.bf16.mxu0 %v5507_v13 }
 0x399   :  { %4003 = vmatpush1.bf16.msra.mxu1 %v5502_v15  ;;  %4085 = vmatpush1.bf16.msra.mxu0 %v5505_v16 }
 0x39a   :  { %4004 = vmatprep.subr.bf16.mxu1 %v5510_v17  ;;  %4086 = vmatprep.subr.bf16.mxu0 %v5513_v18  ;;  %v4697_v17 = vld [vmem:[%s5986_s9] ss:$0 sm:$0xff] }
 0x39d   :  { %4005 = vmatpush1.bf16.msra.mxu1 %v5508_v19  ;;  %4087 = vmatpush1.bf16.msra.mxu0 %v5511_v20 }
 0x39e   :  { %4006 = vmatprep.subr.bf16.mxu1 %v5516_v21  ;;  %4088 = vmatprep.subr.bf16.mxu0 %v5519_v22 }
 0x3a1   :  { %4007 = vmatpush1.bf16.msra.mxu1 %v5514_v25  ;;  %4089 = vmatpush1.bf16.msra.mxu0 %v5517_v27 }
 0x3a2   :  { %4008 = vmatprep.subr.bf16.mxu1 %v5522_v28  ;;  %4090 = vmatprep.subr.bf16.mxu0 %v5525_v29 }
 0x3a5   :  { %4009 = vmatpush1.bf16.msra.mxu1 %v5520_v31  ;;  %4091 = vmatpush1.bf16.msra.mxu0 %v5523_v32 }
 0x3a6   :  { %4010 = vmatprep.subr.bf16.mxu1 %v5528_v33  ;;  %4092 = vmatprep.subr.bf16.mxu0 %v5531_v9 }
 0x3a9   :  { %4011 = vmatpush1.bf16.msra.mxu1 %v5526_v34  ;;  %4093 = vmatpush1.bf16.msra.mxu0 %v5529_v35 }
 0x3aa   :  { %4012 = vmatprep.subr.bf16.mxu1 %v5534_v36  ;;  %4094 = vmatprep.subr.bf16.mxu0 %v5537_v37 }
 0x3ad   :  { %4013 = vmatpush1.bf16.msra.mxu1 %v5532_v10  ;;  %4095 = vmatpush1.bf16.msra.mxu0 %v5535_v39 }
 0x3b0   :  { %4015 = vmatmul.mubr.bf16.vlgmr.msra.gmra.mrb[16].mxu1 %v3149_v14  ;;  %4097 = vmatmul.mubr.bf16.vlgmr.msra.gmra.mrb[16].mxu0 %v3149_v14 }
 0x483   :  { %v4016_v47 = vpop.f32.mrb[16].mxu1  ;;  %v4098_v48 = vpop.f32.mrb[16].mxu0 }
 0x484   :  { %v4714_v49 = vadd.f32 %v4016_v47, %v3284_v42  ;;  %v4716_v50 = vadd.f32 %v4098_v48, %v3292_v26  ;;  %v4018_v51 = vpop.f32.mrb[17].mxu1  ;;  %v4100_v54 = vpop.f32.mrb[17].mxu0 }
 0x485   :  { %v4715_v55 = vadd.f32 %v4018_v51, %v3288_v43  ;;  %v4717_v58 = vadd.f32 %v4100_v54, %v3296_v44  ;;  %v4020_v59 = vpop.f32.mrb[18].mxu1  ;;  %v4102_v60 = vpop.f32.mrb[18].mxu0 }
 0x486   :  { %vm4105_vm9 = vcmp.gt.f32.partialorder %v4714_v49, 0.0  ;;  %v4109_v62 = vmul.f32 0.2, %v4714_v49  ;;  %vm4107_vm10 = vcmp.gt.f32.partialorder %v4716_v50, 0.0  ;;  %v4111_v1 = vmul.f32 0.2, %v4716_v50 }
 0x487   :  { %vm4106_vm11 = vcmp.gt.f32.partialorder %v4715_v55, 0.0  ;;  %v4110_v3 = vmul.f32 0.2, %v4715_v55  ;;  %v4112_v4 = vmul.f32 0.2, %v4717_v58  ;;  %vm4108_vm12 = vcmp.gt.f32.partialorder %v4717_v58, 0.0 }
 0x488   :  { %v4113_v0 = vsel %vm4105_vm9, %v4714_v49, %v4109_v62  ;;  %v4021_v6 = vpop.f32.mrb[19].mxu1  ;;  %v4103_v7 = vpop.f32.mrb[19].mxu0  ;;  %v4115_v8 = vsel %vm4107_vm10, %v4716_v50, %v4111_v1 }
 0x489   :  { %v4114_v5 = vsel %vm4106_vm11, %v4715_v55, %v4110_v3  ;;  %v4139_v53 = vmul.f32 %v4122_v61, %v4113_v0  ;;  %v4116_v57 = vsel %vm4108_vm12, %v4717_v58, %v4112_v4  ;;  %v4141_v56 = vmul.f32 %v4130_v2, %v4115_v8 }
 0x48a   :  { %v4140_v12 = vmul.f32 %v4126_v63, %v4114_v5  ;;  %v4142_v13 = vmul.f32 %v4134_v52, %v4116_v57 }
 0x48c   :  { %v4143_v46 = vadd.f32 %v4140_v12, %v4139_v53 }
 0x48e   :  { %v4144_v15 = vadd.f32 %v4143_v46, %v4141_v56 }
 0x490   :  { %v4145_v16 = vadd.f32 %v4144_v15, %v4142_v13 }
 0x492   :  { %4146 = vadd.xlane.f32.xlu0 %v4145_v16 }
 0x51f   :  { %v4147_v18 = vpop.xlane.xlu0 %4146 }
 0x520   :  { %v4155_v19 = vadd.f32 %v4697_v17, %v4147_v18 }
 0x522   :  { %4156 = vst [vmem:[#allocation13] sm:$0xff] %v4155_v19 }
 0x523   :  { %5681 = shalt.err (!%p5678_p10)
}
 0x524   :  { %s5682_s16 = scalar_lea.hbm %s5987_s10, 128 }
 0x525   :  { %p5683_p11 = scmp.ne.s32.totalorder %s5987_s10, %s5682_s16  ;;  %p5686_p12 = scmp.lt.u32.totalorder %s5682_s16, %s5987_s10 }
 0x527   :  { %p5688_p13 = pnand %p5686_p12, %p5683_p11 }
 0x529   :  { %5691 = shalt.err (!%p5688_p13)
}
 0x52a   :  { %4166 = dma.vmem_to_hbm [thread:$0]  %s4164_s27, 128, %s5987_s10, [#allocation4]  }
 0x52b   :  { %5700 = dma.done.wait [#allocation4], 128  }
 0x52c   :  { %5701 = vsyncadd [#allocation4], 4294967168 }
 0x52d   :  { %4170 = vsyncpa [#allocation3], 1 }
 0x52e   :  { %4171 = vsyncpa [#allocation6], 1 }
 0x52f   :  { %4172 = vsyncpa [#allocation9], 1 }
 0x530   :  { %4173 = vsyncpa [#allocation12], 1 }
 0x531   :  { %4174 = vsyncpa [#allocation4], 1 }

// kernel: tpu_custom_call.1
= control target key start
LH: loop header
LB: loop body
LE: loop exit
PB: predicated region body
PF: predicated region fallthrough
CT: control target
= control target key end

     0   :  { %15 = vsyncpa [#allocation3], 0  ;;  %s5977_s0 = inlined_call_operand.hbm [shape: bf16[8,1024], index: 0, kind: input, shape index: {}]   ;;  %s5978_s1 = inlined_call_operand.hbm [shape: f32[8,16], index: 1, kind: input, shape index: {}]   ;;  %s5979_s2 = inlined_call_operand.hbm [shape: bf16[1024,512], index: 2, kind: input, shape index: {}]   ;;  %s5980_s3 = inlined_call_operand.hbm [shape: f32[16,512], index: 3, kind: input, shape index: {}]   ;;  %s5981_s4 = inlined_call_operand.hbm [shape: bf16[512,512], index: 4, kind: input, shape index: {}]   ;;  %s5982_s5 = inlined_call_operand.vmem [shape: f32[1,512], index: 5, kind: input, shape index: {}]   ;;  %s5983_s6 = inlined_call_operand.hbm [shape: bf16[512,512], index: 6, kind: input, shape index: {}]   ;;  %s5984_s7 = inlined_call_operand.vmem [shape: f32[1,512], index: 7, kind: input, shape index: {}]   ;;  %s5985_s8 = inlined_call_operand.vmem [shape: f32[1,512], index: 8, kind: input, shape index: {}]   ;;  %s5986_s9 = inlined_call_operand.vmem [shape: f32[1,128], index: 9, kind: input, shape index: {}]   ;;  %s5987_s10 = inlined_call_operand.hbm [shape: f32[8,128], index: 10, kind: output, shape index: {}]  }
   0x1   :  { %16 = vsyncpa [#allocation6], 0 }
   0x2   :  { %17 = vsyncpa [#allocation9], 0 }
   0x3   :  { %18 = vsyncpa [#allocation12], 0 }
   0x4   :  { %19 = vsyncpa [#allocation4], 0  ;;  %s5702_s13 = smov [#allocation5]   ;;  %s5703_s15 = smov [#allocation8]  }
   0x5   :  { %s36_s14 = sshll.u32 %s5702_s13, 4  ;;  %s57_s16 = sshll.u32 %s5703_s15, 4  ;;  %s37_s14 = int_to_ptr.vmem [resolvable:$true] %s36_s14  ;;  %s5769_s16 = int_to_ptr.vmem [resolvable:$true] %s57_s16 }
   0x6   :  { %s5538_s19 = scalar_lea.hbm %s5978_s1, 128 }
   0x7   :  { %p5539_p0 = scmp.ne.s32.totalorder %s5978_s1, %s5538_s19  ;;  %p5542_p1 = scmp.lt.u32.totalorder %s5538_s19, %s5978_s1 }
   0x9   :  { %p5544_p2 = pnand %p5542_p1, %p5539_p0 }
   0xb   :  { %5547 = shalt.err (!%p5544_p2)
}
   0xc   :  { %s5548_s24 = scalar_lea.vmem %s37_s14, 128  ;;  %p5553_p4 = scmp.lt.s32.totalorder %s37_s14, %s37_s14 }
   0xd   :  { %p5549_p3 = scmp.ne.s32.totalorder %s37_s14, %s5548_s24  ;;  %p5554_p5 = scmp.lt.s32.totalorder %s5548_s24, %s5548_s24 }
   0xf   :  { %p5555_p6 = por %p5554_p5, %p5553_p4 }
  0x11   :  { %p5556_p7 = pnand %p5555_p6, %p5549_p3 }
  0x13   :  { %5559 = shalt.err (!%p5556_p7)
}
  0x14   :  { %39 = dma.hbm_to_vmem [thread:$0]  %s5978_s1, 128, %s37_s14, [#allocation6]  }
  0x15   :  { %s5560_s29 = scalar_lea.hbm %s5980_s3, 1024 }
  0x16   :  { %p5561_p8 = scmp.ne.s32.totalorder %s5980_s3, %s5560_s29  ;;  %p5564_p9 = scmp.lt.u32.totalorder %s5560_s29, %s5980_s3 }
  0x18   :  { %p5566_p10 = pnand %p5564_p9, %p5561_p8 }
  0x1a   :  { %5569 = shalt.err (!%p5566_p10)
}
  0x1b   :  { %s5570_s15 = scalar_lea.vmem %s5769_s16, 1024  ;;  %p5575_p12 = scmp.lt.s32.totalorder %s5769_s16, %s5769_s16 }
  0x1c   :  { %p5571_p11 = scmp.ne.s32.totalorder %s5769_s16, %s5570_s15  ;;  %p5576_p13 = scmp.lt.s32.totalorder %s5570_s15, %s5570_s15 }
  0x1e   :  { %p5577_p0 = por %p5576_p13, %p5575_p12 }
  0x20   :  { %p5578_p1 = pnand %p5577_p0, %p5571_p11 }
  0x22   :  { %5581 = shalt.err (!%p5578_p1)
}
  0x23   :  { %s5704_s1 = smov 512   ;;  %s5705_s14 = smov 32  }
  0x24   :  { %63 = dma.hbm_to_vmem [thread:$0]  %s5980_s3, 1024, %s5769_s16, [#allocation9], %s5704_s1, %s5704_s1, %s5705_s14  }
  0x25   :  { %s5706_s19 = smov [#allocation2]   ;;  %s5707_s21 = smov [#allocation7]  }
  0x26   :  { %s26_s20 = sshll.u32 %s5706_s19, 4  ;;  %s45_s22 = sshll.u32 %s5707_s21, 4  ;;  %s27_s20 = int_to_ptr.vmem [resolvable:$true] %s26_s20  ;;  %s5800_s22 = int_to_ptr.vmem [resolvable:$true] %s45_s22 }
  0x27   :  { %s5582_s25 = scalar_lea.hbm %s5977_s0, 512 }
  0x28   :  { %p5583_p2 = scmp.ne.s32.totalorder %s5977_s0, %s5582_s25  ;;  %p5586_p3 = scmp.lt.u32.totalorder %s5582_s25, %s5977_s0 }
  0x2a   :  { %p5588_p4 = pnand %p5586_p3, %p5583_p2 }
  0x2c   :  { %5591 = shalt.err (!%p5588_p4)
}
  0x2d   :  { %s5592_s3 = scalar_lea.vmem %s27_s20, 512  ;;  %p5597_p6 = scmp.lt.s32.totalorder %s27_s20, %s27_s20 }
  0x2e   :  { %p5593_p5 = scmp.ne.s32.totalorder %s27_s20, %s5592_s3  ;;  %p5598_p7 = scmp.lt.s32.totalorder %s5592_s3, %s5592_s3 }
  0x30   :  { %p5599_p8 = por %p5598_p7, %p5597_p6 }
  0x32   :  { %p5600_p9 = pnand %p5599_p8, %p5593_p5 }
  0x34   :  { %5603 = shalt.err (!%p5600_p9)
}
  0x35   :  { %29 = dma.hbm_to_vmem [thread:$0]  %s5977_s0, 512, %s27_s20, [#allocation3]  }
  0x36   :  { %s5604_s13 = scalar_lea.hbm %s5979_s2, 32768 }
  0x37   :  { %p5605_p10 = scmp.ne.s32.totalorder %s5979_s2, %s5604_s13  ;;  %p5608_p11 = scmp.lt.u32.totalorder %s5604_s13, %s5979_s2 }
  0x39   :  { %p5610_p12 = pnand %p5608_p11, %p5605_p10 }
  0x3b   :  { %5613 = shalt.err (!%p5610_p12)
}
  0x3c   :  { %s5614_s18 = scalar_lea.vmem %s5800_s22, 32768  ;;  %p5619_p0 = scmp.lt.s32.totalorder %s5800_s22, %s5800_s22 }
  0x3d   :  { %p5615_p13 = scmp.ne.s32.totalorder %s5800_s22, %s5614_s18  ;;  %p5620_p1 = scmp.lt.s32.totalorder %s5614_s18, %s5614_s18 }
  0x3f   :  { %p5621_p2 = por %p5620_p1, %p5619_p0 }
  0x41   :  { %p5622_p3 = pnand %p5621_p2, %p5615_p13 }
  0x43   :  { %5625 = shalt.err (!%p5622_p3)
}
  0x44   :  { %s5708_s0 = smov 256   ;;  %s5709_s19 = smov 16  }
  0x45   :  { %51 = dma.hbm_to_vmem [thread:$0]  %s5979_s2, 32768, %s5800_s22, [#allocation6], %s5708_s0, %s5708_s0, %s5709_s19  }
  0x46   :  { %s5710_s23 = smov [#allocation10]   ;;  %s5711_s25 = smov [#allocation11]  }
  0x47   :  { %s69_s24 = sshll.u32 %s5710_s23, 4  ;;  %s83_s26 = sshll.u32 %s5711_s25, 4  ;;  %s70_s24 = int_to_ptr.vmem [resolvable:$true] %s69_s24  ;;  %s5834_s26 = int_to_ptr.vmem [resolvable:$true] %s83_s26 }
  0x48   :  { %s5626_s29 = scalar_lea.hbm %s5981_s4, 16384 }
  0x49   :  { %p5627_p4 = scmp.ne.s32.totalorder %s5981_s4, %s5626_s29  ;;  %p5630_p5 = scmp.lt.u32.totalorder %s5626_s29, %s5981_s4 }
  0x4b   :  { %p5632_p6 = pnand %p5630_p5, %p5627_p4 }
  0x4d   :  { %5635 = shalt.err (!%p5632_p6)
}
  0x4e   :  { %s5636_s2 = scalar_lea.vmem %s70_s24, 16384  ;;  %p5641_p8 = scmp.lt.s32.totalorder %s70_s24, %s70_s24 }
  0x4f   :  { %p5637_p7 = scmp.ne.s32.totalorder %s70_s24, %s5636_s2  ;;  %p5642_p9 = scmp.lt.s32.totalorder %s5636_s2, %s5636_s2 }
  0x51   :  { %p5643_p10 = por %p5642_p9, %p5641_p8 }
  0x53   :  { %p5644_p11 = pnand %p5643_p10, %p5637_p7 }
  0x55   :  { %5647 = shalt.err (!%p5644_p11)
}
  0x56   :  { %75 = dma.hbm_to_vmem [thread:$0]  %s5981_s4, 16384, %s70_s24, [#allocation9], %s5708_s0, %s5708_s0, %s5709_s19  }
  0x57   :  { %s5648_s1 = scalar_lea.hbm %s5983_s6, 16384 }
  0x58   :  { %p5649_p12 = scmp.ne.s32.totalorder %s5983_s6, %s5648_s1  ;;  %p5652_p13 = scmp.lt.u32.totalorder %s5648_s1, %s5983_s6 }
  0x5a   :  { %p5654_p0 = pnand %p5652_p13, %p5649_p12 }
  0x5c   :  { %5657 = shalt.err (!%p5654_p0)
}
  0x5d   :  { %s5658_s21 = scalar_lea.vmem %s5834_s26, 16384  ;;  %p5663_p2 = scmp.lt.s32.totalorder %s5834_s26, %s5834_s26 }
  0x5e   :  { %p5659_p1 = scmp.ne.s32.totalorder %s5834_s26, %s5658_s21  ;;  %p5664_p3 = scmp.lt.s32.totalorder %s5658_s21, %s5658_s21 }
  0x60   :  { %p5665_p4 = por %p5664_p3, %p5663_p2 }
  0x62   :  { %p5666_p5 = pnand %p5665_p4, %p5659_p1 }
  0x64   :  { %5669 = shalt.err (!%p5666_p5)
}
  0x65   :  { %89 = dma.hbm_to_vmem [thread:$0]  %s5983_s6, 16384, %s5834_s26, [#allocation12], %s5708_s0, %s5708_s0, %s5709_s19  }
  0x66   :  { %5692 = dma.done.wait [#allocation3], 512  }
  0x67   :  { %5693 = vsyncadd [#allocation3], 4294966784 }
  0x68   :  { %5694 = dma.done.wait [#allocation6], 32896  }
  0x69   :  { %5695 = vsyncadd [#allocation6], 4294934400 }
  0x6a   :  { %5696 = dma.done.wait [#allocation9], 17408  }
  0x6b   :  { %5697 = vsyncadd [#allocation9], 4294949888 }
  0x6c   :  { %5698 = dma.done.wait [#allocation12], 16384  }
  0x6d   :  { %5699 = vsyncadd [#allocation12], 4294950912  ;;  %v5712_v0 = vmov 0.0   ;;  %v376_v1 = vld [vmem:[#allocation8 + $0x8] sm:$0xff]  ;;  %v378_v3 = vld [vmem:[#allocation8 + $0x18] sm:$0xff]  ;;  %vm383_vm0 = vcmask 130048  }
  0x6e   :  { %522 = vmatprep.mubr.f32.mxu1 %v5712_v0  ;;  %451 = vmatprep.mubr.f32.mxu0 %v5712_v0  ;;  %v380_v2 = vld [vmem:[#allocation8 + $0x28] sm:$0xff]  ;;  %v382_v5 = vld [vmem:[#allocation8 + $0x38] sm:$0xff]  ;;  %v375_v6 = vld [vmem:[#allocation8] sm:$0xff]  ;;  %s5713_s26 = smov [#allocation13]  }
  0x6f   :  { %v4698_v4 = vpack.c.bf16 %v380_v2, %v376_v1  ;;  %v379_v7 = vld [vmem:[#allocation8 + $0x20] sm:$0xff]  ;;  %v4702_v8 = vpack.c.bf16 %v382_v5, %v378_v3  ;;  %v377_v10 = vld [vmem:[#allocation8 + $0x10] sm:$0xff]  ;;  %v374_v12 = vld [vmem:[#allocation5] sm:$0xff]  ;;  %s4163_s27 = sshll.u32 %s5713_s26, 4  ;;  %s4164_s27 = int_to_ptr.vmem [resolvable:$true] %s4163_s27 }
  0x70   :  { %v4700_v9 = vpack.c.bf16 %v379_v7, %v375_v6  ;;  %v381_v11 = vld [vmem:[#allocation8 + $0x30] sm:$0xff]  ;;  %v4765_v16 = vld [vmem:[#allocation7 + $0x8] ss:$16 sps:$4 sm:$0xff]   ;;  %v4767_v17 = vld [vmem:[#allocation7 + $0xc] ss:$16 sps:$4 sm:$0xff]   ;;  %s5670_s28 = scalar_lea.vmem %s4164_s27, 128  ;;  %p5675_p7 = scmp.lt.s32.totalorder %s4164_s27, %s4164_s27 }
  0x71   :  { %4699 = vmatprep.subr.bf16.mxu0 %v4698_v4  ;;  %v4704_v13 = vpack.c.bf16 %v381_v11, %v377_v10  ;;  %v4762_v14 = vld [vmem:[#allocation7] ss:$16 sps:$4 sm:$0xff]   ;;  %4703 = vmatprep.subr.bf16.mxu1 %v4702_v8  ;;  %v4764_v15 = vld [vmem:[#allocation7 + $0x4] ss:$16 sps:$4 sm:$0xff]   ;;  %v4771_v19 = vld [vmem:[#allocation7 + $0x28] ss:$16 sps:$4 sm:$0xff]   ;;  %p5671_p6 = scmp.ne.s32.totalorder %s4164_s27, %s5670_s28  ;;  %p5676_p8 = scmp.lt.s32.totalorder %s5670_s28, %s5670_s28 }
  0x72   :  { %4701 = vmatpush1.bf16.msra.mxu0 %v4700_v9  ;;  %v4770_v18 = vld [vmem:[#allocation7 + $0x24] ss:$16 sps:$4 sm:$0xff]   ;;  %v4773_v20 = vld [vmem:[#allocation7 + $0x2c] ss:$16 sps:$4 sm:$0xff]   ;;  %v4768_v21 = vld [vmem:[#allocation7 + $0x20] ss:$16 sps:$4 sm:$0xff]  }
  0x73   :  { %4705 = vmatpush1.bf16.msra.mxu1 %v4704_v13  ;;  %2001 = vmatprep.subr.bf16.mxu0 %v4767_v17  ;;  %v4776_v22 = vld [vmem:[#allocation7 + $0x44] ss:$16 sps:$4 sm:$0xff]   ;;  %v4779_v23 = vld [vmem:[#allocation7 + $0x4c] ss:$16 sps:$4 sm:$0xff]   ;;  %v4777_v24 = vld [vmem:[#allocation7 + $0x48] ss:$16 sps:$4 sm:$0xff]   ;;  %p5677_p9 = por %p5676_p8, %p5675_p7 }
  0x74   :  { %1837 = vmatprep.subr.bf16.mxu1 %v4764_v15  ;;  %v4774_v25 = vld [vmem:[#allocation7 + $0x40] ss:$16 sps:$4 sm:$0xff]   ;;  %v4785_v26 = vld [vmem:[#allocation7 + $0x6c] ss:$16 sps:$4 sm:$0xff]   ;;  %v4782_v27 = vld [vmem:[#allocation7 + $0x64] ss:$16 sps:$4 sm:$0xff]  }
  0x75   :  { %4175 = vmatmul.mubr.msk.f32.vlgmr.msra.gmra.mrb[0].mxu0 %vm383_vm0, %v374_v12  ;;  %v4783_v28 = vld [vmem:[#allocation7 + $0x68] ss:$16 sps:$4 sm:$0xff]   ;;  %v4780_v29 = vld [vmem:[#allocation7 + $0x60] ss:$16 sps:$4 sm:$0xff]   ;;  %v4791_v30 = vld [vmem:[#allocation7 + $0x8c] ss:$16 sps:$4 sm:$0xff]   ;;  %p5678_p10 = pnand %p5677_p9, %p5671_p6 }
  0x76   :  { %4176 = vmatmul.mubr.msk.f32.vlgmr.msra.gmra.mrb[0].mxu1 %vm383_vm0, %v374_v12  ;;  %2002 = vmatpush1.bf16.msra.mxu0 %v4765_v16  ;;  %v4788_v31 = vld [vmem:[#allocation7 + $0x84] ss:$16 sps:$4 sm:$0xff]   ;;  %v4789_v32 = vld [vmem:[#allocation7 + $0x88] ss:$16 sps:$4 sm:$0xff]   ;;  %v4786_v33 = vld [vmem:[#allocation7 + $0x80] ss:$16 sps:$4 sm:$0xff]  }
  0x77   :  { %1838 = vmatpush1.bf16.msra.mxu1 %v4762_v14  ;;  %2003 = vmatprep.subr.bf16.mxu0 %v4773_v20  ;;  %v4797_v34 = vld [vmem:[#allocation7 + $0xac] ss:$16 sps:$4 sm:$0xff]   ;;  %v4794_v35 = vld [vmem:[#allocation7 + $0xa4] ss:$16 sps:$4 sm:$0xff]   ;;  %v4795_v36 = vld [vmem:[#allocation7 + $0xa8] ss:$16 sps:$4 sm:$0xff]  }
  0x78   :  { %1839 = vmatprep.subr.bf16.mxu1 %v4770_v18  ;;  %v4792_v37 = vld [vmem:[#allocation7 + $0xa0] ss:$16 sps:$4 sm:$0xff]   ;;  %v4803_v38 = vld [vmem:[#allocation7 + $0xcc] ss:$16 sps:$4 sm:$0xff]   ;;  %v4800_v39 = vld [vmem:[#allocation7 + $0xc4] ss:$16 sps:$4 sm:$0xff]  }
  0x79   :  { %v4801_v40 = vld [vmem:[#allocation7 + $0xc8] ss:$16 sps:$4 sm:$0xff]   ;;  %v4798_v41 = vld [vmem:[#allocation7 + $0xc0] ss:$16 sps:$4 sm:$0xff]   ;;  %v4809_v42 = vld [vmem:[#allocation7 + $0xec] ss:$16 sps:$4 sm:$0xff]  }
  0x7a   :  { %2004 = vmatpush1.bf16.msra.mxu0 %v4771_v19  ;;  %v4806_v43 = vld [vmem:[#allocation7 + $0xe4] ss:$16 sps:$4 sm:$0xff]   ;;  %v4807_v44 = vld [vmem:[#allocation7 + $0xe8] ss:$16 sps:$4 sm:$0xff]   ;;  %v4804_v45 = vld [vmem:[#allocation7 + $0xe0] ss:$16 sps:$4 sm:$0xff]  }
  0x7b   :  { %1840 = vmatpush1.bf16.msra.mxu1 %v4768_v21  ;;  %2005 = vmatprep.subr.bf16.mxu0 %v4779_v23  ;;  %v4815_v46 = vld [vmem:[#allocation7 + $0x10c] ss:$16 sps:$4 sm:$0xff]   ;;  %v4812_v47 = vld [vmem:[#allocation7 + $0x104] ss:$16 sps:$4 sm:$0xff]   ;;  %v4813_v48 = vld [vmem:[#allocation7 + $0x108] ss:$16 sps:$4 sm:$0xff]  }
  0x7c   :  { %1841 = vmatprep.subr.bf16.mxu1 %v4776_v22  ;;  %v4810_v49 = vld [vmem:[#allocation7 + $0x100] ss:$16 sps:$4 sm:$0xff]   ;;  %v4821_v50 = vld [vmem:[#allocation7 + $0x12c] ss:$16 sps:$4 sm:$0xff]   ;;  %v4818_v51 = vld [vmem:[#allocation7 + $0x124] ss:$16 sps:$4 sm:$0xff]  }
  0x7d   :  { %v4819_v52 = vld [vmem:[#allocation7 + $0x128] ss:$16 sps:$4 sm:$0xff]   ;;  %v4816_v53 = vld [vmem:[#allocation7 + $0x120] ss:$16 sps:$4 sm:$0xff]   ;;  %v4827_v54 = vld [vmem:[#allocation7 + $0x14c] ss:$16 sps:$4 sm:$0xff]  }
  0x7e   :  { %2006 = vmatpush1.bf16.msra.mxu0 %v4777_v24  ;;  %v4824_v55 = vld [vmem:[#allocation7 + $0x144] ss:$16 sps:$4 sm:$0xff]   ;;  %v4825_v56 = vld [vmem:[#allocation7 + $0x148] ss:$16 sps:$4 sm:$0xff]   ;;  %v4822_v57 = vld [vmem:[#allocation7 + $0x140] ss:$16 sps:$4 sm:$0xff]  }
  0x7f   :  { %1842 = vmatpush1.bf16.msra.mxu1 %v4774_v25  ;;  %2007 = vmatprep.subr.bf16.mxu0 %v4785_v26  ;;  %v4833_v58 = vld [vmem:[#allocation7 + $0x16c] ss:$16 sps:$4 sm:$0xff]   ;;  %v4830_v60 = vld [vmem:[#allocation7 + $0x164] ss:$16 sps:$4 sm:$0xff]   ;;  %v4831_v62 = vld [vmem:[#allocation7 + $0x168] ss:$16 sps:$4 sm:$0xff]  }
  0x80   :  { %1843 = vmatprep.subr.bf16.mxu1 %v4782_v27  ;;  %v114_v59 = vld [vmem:[#allocation2] sm:$0xff]  ;;  %v4828_v63 = vld [vmem:[#allocation7 + $0x160] ss:$16 sps:$4 sm:$0xff]   ;;  %v4836_v1 = vld [vmem:[#allocation7 + $0x184] ss:$16 sps:$4 sm:$0xff]  }
  0x81   :  { %v4178_v61 = vcombine.high %v114_v59, %v114_v59  ;;  %v4839_v0 = vld [vmem:[#allocation7 + $0x18c] ss:$16 sps:$4 sm:$0xff]   ;;  %v4837_v2 = vld [vmem:[#allocation7 + $0x188] ss:$16 sps:$4 sm:$0xff]   ;;  %v4834_v3 = vld [vmem:[#allocation7 + $0x180] ss:$16 sps:$4 sm:$0xff]   ;;  %v4177_v18 = vcombine.low %v114_v59, %v114_v59 }
  0x82   :  { %2008 = vmatpush1.bf16.msra.mxu0 %v4783_v28  ;;  %v4845_v4 = vld [vmem:[#allocation7 + $0x1ac] ss:$16 sps:$4 sm:$0xff]   ;;  %v4842_v5 = vld [vmem:[#allocation7 + $0x1a4] ss:$16 sps:$4 sm:$0xff]   ;;  %v4843_v6 = vld [vmem:[#allocation7 + $0x1a8] ss:$16 sps:$4 sm:$0xff]  }
  0x83   :  { %1844 = vmatpush1.bf16.msra.mxu1 %v4780_v29  ;;  %2009 = vmatprep.subr.bf16.mxu0 %v4791_v30  ;;  %v4840_v7 = vld [vmem:[#allocation7 + $0x1a0] ss:$16 sps:$4 sm:$0xff]   ;;  %v4851_v8 = vld [vmem:[#allocation7 + $0x1cc] ss:$16 sps:$4 sm:$0xff]   ;;  %v4848_v9 = vld [vmem:[#allocation7 + $0x1c4] ss:$16 sps:$4 sm:$0xff]  }
  0x84   :  { %1845 = vmatprep.subr.bf16.mxu1 %v4788_v31  ;;  %1869 = vmatprep.mubr.bf16.mxu1 %v4178_v61  ;;  %v4849_v10 = vld [vmem:[#allocation7 + $0x1c8] ss:$16 sps:$4 sm:$0xff]   ;;  %v4846_v11 = vld [vmem:[#allocation7 + $0x1c0] ss:$16 sps:$4 sm:$0xff]   ;;  %v4857_v12 = vld [vmem:[#allocation7 + $0x1ec] ss:$16 sps:$4 sm:$0xff]  }
  0x85   :  { %2033 = vmatprep.mubr.bf16.mxu0 %v4178_v61  ;;  %v4854_v13 = vld [vmem:[#allocation7 + $0x1e4] ss:$16 sps:$4 sm:$0xff]   ;;  %v4855_v14 = vld [vmem:[#allocation7 + $0x1e8] ss:$16 sps:$4 sm:$0xff]   ;;  %v4852_v15 = vld [vmem:[#allocation7 + $0x1e0] ss:$16 sps:$4 sm:$0xff]  }
  0x86   :  { %2010 = vmatpush1.bf16.msra.mxu0 %v4789_v32  ;;  %v4865_v16 = vld [vmem:[#allocation7 + $0x20c] ss:$16 sps:$4 sm:$0xff]   ;;  %v4862_v17 = vld [vmem:[#allocation7 + $0x204] ss:$16 sps:$4 sm:$0xff]   ;;  %v4863_v19 = vld [vmem:[#allocation7 + $0x208] ss:$16 sps:$4 sm:$0xff]  }
  0x87   :  { %1846 = vmatpush1.bf16.msra.mxu1 %v4786_v33  ;;  %2011 = vmatprep.subr.bf16.mxu0 %v4797_v34  ;;  %v4860_v20 = vld [vmem:[#allocation7 + $0x200] ss:$16 sps:$4 sm:$0xff]   ;;  %v4871_v21 = vld [vmem:[#allocation7 + $0x22c] ss:$16 sps:$4 sm:$0xff]   ;;  %v4868_v22 = vld [vmem:[#allocation7 + $0x224] ss:$16 sps:$4 sm:$0xff]  }
  0x88   :  { %1847 = vmatprep.subr.bf16.mxu1 %v4794_v35  ;;  %v4869_v23 = vld [vmem:[#allocation7 + $0x228] ss:$16 sps:$4 sm:$0xff]   ;;  %v4866_v24 = vld [vmem:[#allocation7 + $0x220] ss:$16 sps:$4 sm:$0xff]   ;;  %v4877_v25 = vld [vmem:[#allocation7 + $0x24c] ss:$16 sps:$4 sm:$0xff]  }
  0x89   :  { %v4874_v26 = vld [vmem:[#allocation7 + $0x244] ss:$16 sps:$4 sm:$0xff]   ;;  %v4875_v27 = vld [vmem:[#allocation7 + $0x248] ss:$16 sps:$4 sm:$0xff]   ;;  %v4872_v28 = vld [vmem:[#allocation7 + $0x240] ss:$16 sps:$4 sm:$0xff]  }
  0x8a   :  { %2012 = vmatpush1.bf16.msra.mxu0 %v4795_v36  ;;  %v4883_v29 = vld [vmem:[#allocation7 + $0x26c] ss:$16 sps:$4 sm:$0xff]   ;;  %v4880_v30 = vld [vmem:[#allocation7 + $0x264] ss:$16 sps:$4 sm:$0xff]   ;;  %v4881_v31 = vld [vmem:[#allocation7 + $0x268] ss:$16 sps:$4 sm:$0xff]  }
  0x8b   :  { %1848 = vmatpush1.bf16.msra.mxu1 %v4792_v37  ;;  %2013 = vmatprep.subr.bf16.mxu0 %v4803_v38  ;;  %v4878_v32 = vld [vmem:[#allocation7 + $0x260] ss:$16 sps:$4 sm:$0xff]   ;;  %v4889_v33 = vld [vmem:[#allocation7 + $0x28c] ss:$16 sps:$4 sm:$0xff]   ;;  %v4886_v34 = vld [vmem:[#allocation7 + $0x284] ss:$16 sps:$4 sm:$0xff]  }
  0x8c   :  { %1849 = vmatprep.subr.bf16.mxu1 %v4800_v39  ;;  %v4887_v35 = vld [vmem:[#allocation7 + $0x288] ss:$16 sps:$4 sm:$0xff]   ;;  %v4884_v36 = vld [vmem:[#allocation7 + $0x280] ss:$16 sps:$4 sm:$0xff]   ;;  %v4895_v37 = vld [vmem:[#allocation7 + $0x2ac] ss:$16 sps:$4 sm:$0xff]  }
  0x8d   :  { %v4892_v38 = vld [vmem:[#allocation7 + $0x2a4] ss:$16 sps:$4 sm:$0xff]   ;;  %v4890_v39 = vld [vmem:[#allocation7 + $0x2a0] ss:$16 sps:$4 sm:$0xff]   ;;  %v4925_v59 = vld [vmem:[#allocation7 + $0x34c] ss:$16 sps:$4 sm:$0xff]  }
  0x8e   :  { %2014 = vmatpush1.bf16.msra.mxu0 %v4801_v40  ;;  %v4893_v40 = vld [vmem:[#allocation7 + $0x2a8] ss:$16 sps:$4 sm:$0xff]   ;;  %v4920_v61 = vld [vmem:[#allocation7 + $0x340] ss:$16 sps:$4 sm:$0xff]  }
  0x8f   :  { %1850 = vmatpush1.bf16.msra.mxu1 %v4798_v41  ;;  %2015 = vmatprep.subr.bf16.mxu0 %v4809_v42  ;;  %v5871_v41 = vld [vmem:[#allocation2 + $0x8] sm:$0xff]  ;;  %v4901_v42 = vld [vmem:[#allocation7 + $0x2cc] ss:$16 sps:$4 sm:$0xff]  }
  0x90   :  { %1851 = vmatprep.subr.bf16.mxu1 %v4806_v43  ;;  %v4180_v43 = vcombine.high %v5871_v41, %v5871_v41 }
  0x92   :  { %2016 = vmatpush1.bf16.msra.mxu0 %v4807_v44  ;;  %v4898_v44 = vld [vmem:[#allocation7 + $0x2c4] ss:$16 sps:$4 sm:$0xff]  }
  0x93   :  { %1852 = vmatpush1.bf16.msra.mxu1 %v4804_v45  ;;  %2017 = vmatprep.subr.bf16.mxu0 %v4815_v46  ;;  %v4896_v45 = vld [vmem:[#allocation7 + $0x2c0] ss:$16 sps:$4 sm:$0xff]   ;;  %v4899_v46 = vld [vmem:[#allocation7 + $0x2c8] ss:$16 sps:$4 sm:$0xff]  }
  0x94   :  { %1853 = vmatprep.subr.bf16.mxu1 %v4812_v47  ;;  %v4907_v47 = vld [vmem:[#allocation7 + $0x2ec] ss:$16 sps:$4 sm:$0xff]  }
  0x96   :  { %2018 = vmatpush1.bf16.msra.mxu0 %v4813_v48  ;;  %v4904_v48 = vld [vmem:[#allocation7 + $0x2e4] ss:$16 sps:$4 sm:$0xff]  }
  0x97   :  { %1854 = vmatpush1.bf16.msra.mxu1 %v4810_v49  ;;  %2019 = vmatprep.subr.bf16.mxu0 %v4821_v50  ;;  %v4902_v49 = vld [vmem:[#allocation7 + $0x2e0] ss:$16 sps:$4 sm:$0xff]   ;;  %v4905_v50 = vld [vmem:[#allocation7 + $0x2e8] ss:$16 sps:$4 sm:$0xff]  }
  0x98   :  { %1855 = vmatprep.subr.bf16.mxu1 %v4818_v51  ;;  %v4913_v51 = vld [vmem:[#allocation7 + $0x30c] ss:$16 sps:$4 sm:$0xff]  }
  0x9a   :  { %2020 = vmatpush1.bf16.msra.mxu0 %v4819_v52  ;;  %v4910_v52 = vld [vmem:[#allocation7 + $0x304] ss:$16 sps:$4 sm:$0xff]  }
  0x9b   :  { %1856 = vmatpush1.bf16.msra.mxu1 %v4816_v53  ;;  %2021 = vmatprep.subr.bf16.mxu0 %v4827_v54  ;;  %v4908_v53 = vld [vmem:[#allocation7 + $0x300] ss:$16 sps:$4 sm:$0xff]   ;;  %v4911_v54 = vld [vmem:[#allocation7 + $0x308] ss:$16 sps:$4 sm:$0xff]  }
  0x9c   :  { %1857 = vmatprep.subr.bf16.mxu1 %v4824_v55  ;;  %v4919_v55 = vld [vmem:[#allocation7 + $0x32c] ss:$16 sps:$4 sm:$0xff]  }
  0x9e   :  { %2022 = vmatpush1.bf16.msra.mxu0 %v4825_v56  ;;  %v4916_v56 = vld [vmem:[#allocation7 + $0x324] ss:$16 sps:$4 sm:$0xff]  }
  0x9f   :  { %1858 = vmatpush1.bf16.msra.mxu1 %v4822_v57  ;;  %2023 = vmatprep.subr.bf16.mxu0 %v4833_v58  ;;  %v4914_v57 = vld [vmem:[#allocation7 + $0x320] ss:$16 sps:$4 sm:$0xff]   ;;  %v4917_v58 = vld [vmem:[#allocation7 + $0x328] ss:$16 sps:$4 sm:$0xff]  }
  0xa0   :  { %1859 = vmatprep.subr.bf16.mxu1 %v4830_v60  ;;  %v4922_v60 = vld [vmem:[#allocation7 + $0x344] ss:$16 sps:$4 sm:$0xff]  }
  0xa2   :  { %2024 = vmatpush1.bf16.msra.mxu0 %v4831_v62  ;;  %v4923_v62 = vld [vmem:[#allocation7 + $0x348] ss:$16 sps:$4 sm:$0xff]  }
  0xa3   :  { %1860 = vmatpush1.bf16.msra.mxu1 %v4828_v63  ;;  %2025 = vmatprep.subr.bf16.mxu0 %v4839_v0  ;;  %v4931_v63 = vld [vmem:[#allocation7 + $0x36c] ss:$16 sps:$4 sm:$0xff]   ;;  %v4928_v0 = vld [vmem:[#allocation7 + $0x364] ss:$16 sps:$4 sm:$0xff]  }
  0xa4   :  { %1861 = vmatprep.subr.bf16.mxu1 %v4836_v1  ;;  %v4926_v1 = vld [vmem:[#allocation7 + $0x360] ss:$16 sps:$4 sm:$0xff]  }
  0xa6   :  { %2026 = vmatpush1.bf16.msra.mxu0 %v4837_v2  ;;  %v4929_v2 = vld [vmem:[#allocation7 + $0x368] ss:$16 sps:$4 sm:$0xff]  }
  0xa7   :  { %1862 = vmatpush1.bf16.msra.mxu1 %v4834_v3  ;;  %2027 = vmatprep.subr.bf16.mxu0 %v4845_v4  ;;  %v4937_v3 = vld [vmem:[#allocation7 + $0x38c] ss:$16 sps:$4 sm:$0xff]   ;;  %v4934_v4 = vld [vmem:[#allocation7 + $0x384] ss:$16 sps:$4 sm:$0xff]  }
  0xa8   :  { %1863 = vmatprep.subr.bf16.mxu1 %v4842_v5  ;;  %v4932_v5 = vld [vmem:[#allocation7 + $0x380] ss:$16 sps:$4 sm:$0xff]  }
  0xaa   :  { %2028 = vmatpush1.bf16.msra.mxu0 %v4843_v6  ;;  %v4935_v6 = vld [vmem:[#allocation7 + $0x388] ss:$16 sps:$4 sm:$0xff]  }
  0xab   :  { %1864 = vmatpush1.bf16.msra.mxu1 %v4840_v7  ;;  %2029 = vmatprep.subr.bf16.mxu0 %v4851_v8  ;;  %v4943_v7 = vld [vmem:[#allocation7 + $0x3ac] ss:$16 sps:$4 sm:$0xff]   ;;  %v4940_v8 = vld [vmem:[#allocation7 + $0x3a4] ss:$16 sps:$4 sm:$0xff]  }
  0xac   :  { %1865 = vmatprep.subr.bf16.mxu1 %v4848_v9  ;;  %v4938_v9 = vld [vmem:[#allocation7 + $0x3a0] ss:$16 sps:$4 sm:$0xff]  }
  0xae   :  { %2030 = vmatpush1.bf16.msra.mxu0 %v4849_v10  ;;  %v4941_v10 = vld [vmem:[#allocation7 + $0x3a8] ss:$16 sps:$4 sm:$0xff]  }
  0xaf   :  { %1866 = vmatpush1.bf16.msra.mxu1 %v4846_v11  ;;  %2031 = vmatprep.subr.bf16.mxu0 %v4857_v12  ;;  %v4949_v11 = vld [vmem:[#allocation7 + $0x3cc] ss:$16 sps:$4 sm:$0xff]   ;;  %v4946_v12 = vld [vmem:[#allocation7 + $0x3c4] ss:$16 sps:$4 sm:$0xff]  }
  0xb0   :  { %1867 = vmatprep.subr.bf16.mxu1 %v4854_v13  ;;  %v4944_v13 = vld [vmem:[#allocation7 + $0x3c0] ss:$16 sps:$4 sm:$0xff]  }
  0xb2   :  { %2032 = vmatpush1.bf16.msra.mxu0 %v4855_v14  ;;  %v4947_v14 = vld [vmem:[#allocation7 + $0x3c8] ss:$16 sps:$4 sm:$0xff]  }
  0xb3   :  { %1868 = vmatpush1.bf16.msra.mxu1 %v4852_v15  ;;  %2042 = vmatprep.subr.bf16.mxu0 %v4865_v16  ;;  %v4955_v15 = vld [vmem:[#allocation7 + $0x3ec] ss:$16 sps:$4 sm:$0xff]   ;;  %v4952_v16 = vld [vmem:[#allocation7 + $0x3e4] ss:$16 sps:$4 sm:$0xff]  }
  0xb4   :  { %1878 = vmatprep.subr.bf16.mxu1 %v4862_v17  ;;  %v4950_v17 = vld [vmem:[#allocation7 + $0x3e0] ss:$16 sps:$4 sm:$0xff]  }
  0xb5   :  { %2034 = vmatmul.mubr.bf16.vlgmr.msra.gmra.mrb[4].mxu0 %v4177_v18 }
  0xb6   :  { %1870 = vmatmul.mubr.bf16.vlgmr.msra.gmra.mrb[4].mxu1 %v4177_v18  ;;  %2043 = vmatpush1.bf16.msra.mxu0 %v4863_v19  ;;  %v4953_v18 = vld [vmem:[#allocation7 + $0x3e8] ss:$16 sps:$4 sm:$0xff]   ;;  %v4963_v19 = vld [vmem:[#allocation7 + $0x40c] ss:$16 sps:$4 sm:$0xff]  }
  0xb7   :  { %1879 = vmatpush1.bf16.msra.mxu1 %v4860_v20  ;;  %2044 = vmatprep.subr.bf16.mxu0 %v4871_v21  ;;  %v4960_v20 = vld [vmem:[#allocation7 + $0x404] ss:$16 sps:$4 sm:$0xff]   ;;  %v4179_v21 = vcombine.low %v5871_v41, %v5871_v41  ;;  %v4985_v41 = vld [vmem:[#allocation7 + $0x488] ss:$16 sps:$4 sm:$0xff]  }
  0xb8   :  { %1880 = vmatprep.subr.bf16.mxu1 %v4868_v22  ;;  %1910 = vmatprep.mubr.bf16.mxu1 %v4180_v43  ;;  %v4958_v22 = vld [vmem:[#allocation7 + $0x400] ss:$16 sps:$4 sm:$0xff]  }
  0xb9   :  { %2074 = vmatprep.mubr.bf16.mxu0 %v4180_v43  ;;  %v4990_v43 = vld [vmem:[#allocation7 + $0x4a4] ss:$16 sps:$4 sm:$0xff]  }
  0xba   :  { %2045 = vmatpush1.bf16.msra.mxu0 %v4869_v23  ;;  %v5877_v23 = vld [vmem:[#allocation2 + $0x10] sm:$0xff] }
  0xbb   :  { %1881 = vmatpush1.bf16.msra.mxu1 %v4866_v24  ;;  %2046 = vmatprep.subr.bf16.mxu0 %v4877_v25  ;;  %v4961_v24 = vld [vmem:[#allocation7 + $0x408] ss:$16 sps:$4 sm:$0xff]   ;;  %v4969_v25 = vld [vmem:[#allocation7 + $0x42c] ss:$16 sps:$4 sm:$0xff]  }
  0xbc   :  { %1882 = vmatprep.subr.bf16.mxu1 %v4874_v26  ;;  %v4966_v26 = vld [vmem:[#allocation7 + $0x424] ss:$16 sps:$4 sm:$0xff]  }
  0xbe   :  { %2047 = vmatpush1.bf16.msra.mxu0 %v4875_v27  ;;  %v4182_v27 = vcombine.high %v5877_v23, %v5877_v23 }
  0xbf   :  { %1883 = vmatpush1.bf16.msra.mxu1 %v4872_v28  ;;  %2048 = vmatprep.subr.bf16.mxu0 %v4883_v29  ;;  %v4964_v28 = vld [vmem:[#allocation7 + $0x420] ss:$16 sps:$4 sm:$0xff]   ;;  %v4967_v29 = vld [vmem:[#allocation7 + $0x428] ss:$16 sps:$4 sm:$0xff]  }
  0xc0   :  { %1884 = vmatprep.subr.bf16.mxu1 %v4880_v30  ;;  %v4975_v30 = vld [vmem:[#allocation7 + $0x44c] ss:$16 sps:$4 sm:$0xff]  }
  0xc2   :  { %2049 = vmatpush1.bf16.msra.mxu0 %v4881_v31  ;;  %v4972_v31 = vld [vmem:[#allocation7 + $0x444] ss:$16 sps:$4 sm:$0xff]  }
  0xc3   :  { %1885 = vmatpush1.bf16.msra.mxu1 %v4878_v32  ;;  %2050 = vmatprep.subr.bf16.mxu0 %v4889_v33  ;;  %v4970_v32 = vld [vmem:[#allocation7 + $0x440] ss:$16 sps:$4 sm:$0xff]   ;;  %v4973_v33 = vld [vmem:[#allocation7 + $0x448] ss:$16 sps:$4 sm:$0xff]  }
  0xc4   :  { %1886 = vmatprep.subr.bf16.mxu1 %v4886_v34  ;;  %v4981_v34 = vld [vmem:[#allocation7 + $0x46c] ss:$16 sps:$4 sm:$0xff]  }
  0xc6   :  { %2051 = vmatpush1.bf16.msra.mxu0 %v4887_v35  ;;  %v4978_v35 = vld [vmem:[#allocation7 + $0x464] ss:$16 sps:$4 sm:$0xff]  }
  0xc7   :  { %1887 = vmatpush1.bf16.msra.mxu1 %v4884_v36  ;;  %2052 = vmatprep.subr.bf16.mxu0 %v4895_v37  ;;  %v4976_v36 = vld [vmem:[#allocation7 + $0x460] ss:$16 sps:$4 sm:$0xff]   ;;  %v4979_v37 = vld [vmem:[#allocation7 + $0x468] ss:$16 sps:$4 sm:$0xff]  }
  0xc8   :  { %1888 = vmatprep.subr.bf16.mxu1 %v4892_v38  ;;  %v4987_v38 = vld [vmem:[#allocation7 + $0x48c] ss:$16 sps:$4 sm:$0xff]  }
  0xca   :  { %2053 = vmatpush1.bf16.msra.mxu0 %v4893_v40  ;;  %v4982_v40 = vld [vmem:[#allocation7 + $0x480] ss:$16 sps:$4 sm:$0xff]  }
  0xcb   :  { %1889 = vmatpush1.bf16.msra.mxu1 %v4890_v39  ;;  %2054 = vmatprep.subr.bf16.mxu0 %v4901_v42  ;;  %v4984_v39 = vld [vmem:[#allocation7 + $0x484] ss:$16 sps:$4 sm:$0xff]   ;;  %v4993_v42 = vld [vmem:[#allocation7 + $0x4ac] ss:$16 sps:$4 sm:$0xff]  }
  0xcc   :  { %1890 = vmatprep.subr.bf16.mxu1 %v4898_v44  ;;  %v4988_v44 = vld [vmem:[#allocation7 + $0x4a0] ss:$16 sps:$4 sm:$0xff]  }
  0xce   :  { %2055 = vmatpush1.bf16.msra.mxu0 %v4899_v46  ;;  %v4999_v46 = vld [vmem:[#allocation7 + $0x4cc] ss:$16 sps:$4 sm:$0xff]  }
  0xcf   :  { %1891 = vmatpush1.bf16.msra.mxu1 %v4896_v45  ;;  %2056 = vmatprep.subr.bf16.mxu0 %v4907_v47  ;;  %v4991_v45 = vld [vmem:[#allocation7 + $0x4a8] ss:$16 sps:$4 sm:$0xff]   ;;  %v4996_v47 = vld [vmem:[#allocation7 + $0x4c4] ss:$16 sps:$4 sm:$0xff]  }
  0xd0   :  { %1892 = vmatprep.subr.bf16.mxu1 %v4904_v48  ;;  %v4994_v48 = vld [vmem:[#allocation7 + $0x4c0] ss:$16 sps:$4 sm:$0xff]  }
  0xd2   :  { %2057 = vmatpush1.bf16.msra.mxu0 %v4905_v50  ;;  %v5005_v50 = vld [vmem:[#allocation7 + $0x4ec] ss:$16 sps:$4 sm:$0xff]  }
  0xd3   :  { %1893 = vmatpush1.bf16.msra.mxu1 %v4902_v49  ;;  %2058 = vmatprep.subr.bf16.mxu0 %v4913_v51  ;;  %v4997_v49 = vld [vmem:[#allocation7 + $0x4c8] ss:$16 sps:$4 sm:$0xff]   ;;  %v5002_v51 = vld [vmem:[#allocation7 + $0x4e4] ss:$16 sps:$4 sm:$0xff]  }
  0xd4   :  { %1894 = vmatprep.subr.bf16.mxu1 %v4910_v52  ;;  %v5000_v52 = vld [vmem:[#allocation7 + $0x4e0] ss:$16 sps:$4 sm:$0xff]  }
  0xd6   :  { %2059 = vmatpush1.bf16.msra.mxu0 %v4911_v54  ;;  %v5011_v54 = vld [vmem:[#allocation7 + $0x50c] ss:$16 sps:$4 sm:$0xff]  }
  0xd7   :  { %1895 = vmatpush1.bf16.msra.mxu1 %v4908_v53  ;;  %2060 = vmatprep.subr.bf16.mxu0 %v4919_v55  ;;  %v5003_v53 = vld [vmem:[#allocation7 + $0x4e8] ss:$16 sps:$4 sm:$0xff]   ;;  %v5008_v55 = vld [vmem:[#allocation7 + $0x504] ss:$16 sps:$4 sm:$0xff]  }
  0xd8   :  { %1896 = vmatprep.subr.bf16.mxu1 %v4916_v56  ;;  %v5006_v56 = vld [vmem:[#allocation7 + $0x500] ss:$16 sps:$4 sm:$0xff]  }
  0xda   :  { %2061 = vmatpush1.bf16.msra.mxu0 %v4917_v58  ;;  %v5017_v58 = vld [vmem:[#allocation7 + $0x52c] ss:$16 sps:$4 sm:$0xff]  }
  0xdb   :  { %1897 = vmatpush1.bf16.msra.mxu1 %v4914_v57  ;;  %2062 = vmatprep.subr.bf16.mxu0 %v4925_v59  ;;  %v5009_v57 = vld [vmem:[#allocation7 + $0x508] ss:$16 sps:$4 sm:$0xff]   ;;  %v5014_v59 = vld [vmem:[#allocation7 + $0x524] ss:$16 sps:$4 sm:$0xff]  }
  0xdc   :  { %1898 = vmatprep.subr.bf16.mxu1 %v4922_v60  ;;  %v5012_v60 = vld [vmem:[#allocation7 + $0x520] ss:$16 sps:$4 sm:$0xff]  }
  0xde   :  { %2063 = vmatpush1.bf16.msra.mxu0 %v4923_v62  ;;  %v5023_v62 = vld [vmem:[#allocation7 + $0x54c] ss:$16 sps:$4 sm:$0xff]  }
  0xdf   :  { %1899 = vmatpush1.bf16.msra.mxu1 %v4920_v61  ;;  %2064 = vmatprep.subr.bf16.mxu0 %v4931_v63  ;;  %v5015_v61 = vld [vmem:[#allocation7 + $0x528] ss:$16 sps:$4 sm:$0xff]   ;;  %v5020_v63 = vld [vmem:[#allocation7 + $0x544] ss:$16 sps:$4 sm:$0xff]  }
  0xe0   :  { %1900 = vmatprep.subr.bf16.mxu1 %v4928_v0  ;;  %v5018_v0 = vld [vmem:[#allocation7 + $0x540] ss:$16 sps:$4 sm:$0xff]  }
  0xe2   :  { %2065 = vmatpush1.bf16.msra.mxu0 %v4929_v2  ;;  %v5029_v2 = vld [vmem:[#allocation7 + $0x56c] ss:$16 sps:$4 sm:$0xff]  }
  0xe3   :  { %1901 = vmatpush1.bf16.msra.mxu1 %v4926_v1  ;;  %2066 = vmatprep.subr.bf16.mxu0 %v4937_v3  ;;  %v5021_v1 = vld [vmem:[#allocation7 + $0x548] ss:$16 sps:$4 sm:$0xff]   ;;  %v5026_v3 = vld [vmem:[#allocation7 + $0x564] ss:$16 sps:$4 sm:$0xff]  }
  0xe4   :  { %1902 = vmatprep.subr.bf16.mxu1 %v4934_v4  ;;  %v5027_v4 = vld [vmem:[#allocation7 + $0x568] ss:$16 sps:$4 sm:$0xff]  }
  0xe6   :  { %2067 = vmatpush1.bf16.msra.mxu0 %v4935_v6  ;;  %v5035_v6 = vld [vmem:[#allocation7 + $0x58c] ss:$16 sps:$4 sm:$0xff]  }
  0xe7   :  { %1903 = vmatpush1.bf16.msra.mxu1 %v4932_v5  ;;  %2068 = vmatprep.subr.bf16.mxu0 %v4943_v7  ;;  %v5024_v5 = vld [vmem:[#allocation7 + $0x560] ss:$16 sps:$4 sm:$0xff]   ;;  %v5032_v7 = vld [vmem:[#allocation7 + $0x584] ss:$16 sps:$4 sm:$0xff]  }
  0xe8   :  { %1904 = vmatprep.subr.bf16.mxu1 %v4940_v8  ;;  %v5033_v8 = vld [vmem:[#allocation7 + $0x588] ss:$16 sps:$4 sm:$0xff]  }
  0xea   :  { %2069 = vmatpush1.bf16.msra.mxu0 %v4941_v10  ;;  %v5041_v10 = vld [vmem:[#allocation7 + $0x5ac] ss:$16 sps:$4 sm:$0xff]  }
  0xeb   :  { %1905 = vmatpush1.bf16.msra.mxu1 %v4938_v9  ;;  %2070 = vmatprep.subr.bf16.mxu0 %v4949_v11  ;;  %v5030_v9 = vld [vmem:[#allocation7 + $0x580] ss:$16 sps:$4 sm:$0xff]   ;;  %v5038_v11 = vld [vmem:[#allocation7 + $0x5a4] ss:$16 sps:$4 sm:$0xff]  }
  0xec   :  { %1906 = vmatprep.subr.bf16.mxu1 %v4946_v12  ;;  %v5039_v12 = vld [vmem:[#allocation7 + $0x5a8] ss:$16 sps:$4 sm:$0xff]  }
  0xee   :  { %2071 = vmatpush1.bf16.msra.mxu0 %v4947_v14  ;;  %v5047_v14 = vld [vmem:[#allocation7 + $0x5cc] ss:$16 sps:$4 sm:$0xff]  }
  0xef   :  { %1907 = vmatpush1.bf16.msra.mxu1 %v4944_v13  ;;  %2072 = vmatprep.subr.bf16.mxu0 %v4955_v15  ;;  %v5036_v13 = vld [vmem:[#allocation7 + $0x5a0] ss:$16 sps:$4 sm:$0xff]   ;;  %v5044_v15 = vld [vmem:[#allocation7 + $0x5c4] ss:$16 sps:$4 sm:$0xff]  }
  0xf0   :  { %1908 = vmatprep.subr.bf16.mxu1 %v4952_v16  ;;  %v5045_v16 = vld [vmem:[#allocation7 + $0x5c8] ss:$16 sps:$4 sm:$0xff]  }
  0xf2   :  { %2073 = vmatpush1.bf16.msra.mxu0 %v4953_v18  ;;  %v5053_v18 = vld [vmem:[#allocation7 + $0x5ec] ss:$16 sps:$4 sm:$0xff]  }
  0xf3   :  { %1909 = vmatpush1.bf16.msra.mxu1 %v4950_v17  ;;  %2083 = vmatprep.subr.bf16.mxu0 %v4963_v19  ;;  %v5042_v17 = vld [vmem:[#allocation7 + $0x5c0] ss:$16 sps:$4 sm:$0xff]   ;;  %v5050_v19 = vld [vmem:[#allocation7 + $0x5e4] ss:$16 sps:$4 sm:$0xff]  }
  0xf4   :  { %1919 = vmatprep.subr.bf16.mxu1 %v4960_v20  ;;  %v5051_v20 = vld [vmem:[#allocation7 + $0x5e8] ss:$16 sps:$4 sm:$0xff]  }
  0xf5   :  { %2075 = vmatmul.mubr.bf16.vlgmr.msra.gmra.mrb[8].mxu0 %v4179_v21 }
  0xf6   :  { %1911 = vmatmul.mubr.bf16.vlgmr.msra.gmra.mrb[8].mxu1 %v4179_v21  ;;  %2084 = vmatpush1.bf16.msra.mxu0 %v4961_v24  ;;  %v5048_v21 = vld [vmem:[#allocation7 + $0x5e0] ss:$16 sps:$4 sm:$0xff]   ;;  %v5058_v24 = vld [vmem:[#allocation7 + $0x604] ss:$16 sps:$4 sm:$0xff]  }
  0xf7   :  { %1920 = vmatpush1.bf16.msra.mxu1 %v4958_v22  ;;  %2085 = vmatprep.subr.bf16.mxu0 %v4969_v25  ;;  %v5061_v22 = vld [vmem:[#allocation7 + $0x60c] ss:$16 sps:$4 sm:$0xff]   ;;  %v4181_v25 = vcombine.low %v5877_v23, %v5877_v23 }
  0xf8   :  { %1921 = vmatprep.subr.bf16.mxu1 %v4966_v26  ;;  %1951 = vmatprep.mubr.bf16.mxu1 %v4182_v27  ;;  %v5883_v26 = vld [vmem:[#allocation2 + $0x18] sm:$0xff]  ;;  %v5073_v23 = vld [vmem:[#allocation7 + $0x64c] ss:$16 sps:$4 sm:$0xff]  }
  0xf9   :  { %2115 = vmatprep.mubr.bf16.mxu0 %v4182_v27  ;;  %v5059_v27 = vld [vmem:[#allocation7 + $0x608] ss:$16 sps:$4 sm:$0xff]  }
  0xfa   :  { %2086 = vmatpush1.bf16.msra.mxu0 %v4967_v29  ;;  %v5067_v29 = vld [vmem:[#allocation7 + $0x62c] ss:$16 sps:$4 sm:$0xff]  }
  0xfb   :  { %1922 = vmatpush1.bf16.msra.mxu1 %v4964_v28  ;;  %2087 = vmatprep.subr.bf16.mxu0 %v4975_v30  ;;  %v5056_v28 = vld [vmem:[#allocation7 + $0x600] ss:$16 sps:$4 sm:$0xff]   ;;  %v5064_v30 = vld [vmem:[#allocation7 + $0x624] ss:$16 sps:$4 sm:$0xff]  }
  0xfc   :  { %1923 = vmatprep.subr.bf16.mxu1 %v4972_v31  ;;  %v4184_v31 = vcombine.high %v5883_v26, %v5883_v26 }
  0xfe   :  { %2088 = vmatpush1.bf16.msra.mxu0 %v4973_v33  ;;  %v5062_v33 = vld [vmem:[#allocation7 + $0x620] ss:$16 sps:$4 sm:$0xff]  }
  0xff   :  { %1924 = vmatpush1.bf16.msra.mxu1 %v4970_v32  ;;  %2089 = vmatprep.subr.bf16.mxu0 %v4981_v34  ;;  %v5065_v32 = vld [vmem:[#allocation7 + $0x628] ss:$16 sps:$4 sm:$0xff]   ;;  %v5070_v34 = vld [vmem:[#allocation7 + $0x644] ss:$16 sps:$4 sm:$0xff]  }
 0x100   :  { %1925 = vmatprep.subr.bf16.mxu1 %v4978_v35  ;;  %v5071_v35 = vld [vmem:[#allocation7 + $0x648] ss:$16 sps:$4 sm:$0xff]  }
 0x102   :  { %2090 = vmatpush1.bf16.msra.mxu0 %v4979_v37  ;;  %v5079_v37 = vld [vmem:[#allocation7 + $0x66c] ss:$16 sps:$4 sm:$0xff]  }
 0x103   :  { %1926 = vmatpush1.bf16.msra.mxu1 %v4976_v36  ;;  %2091 = vmatprep.subr.bf16.mxu0 %v4987_v38  ;;  %v5068_v36 = vld [vmem:[#allocation7 + $0x640] ss:$16 sps:$4 sm:$0xff]   ;;  %v5076_v38 = vld [vmem:[#allocation7 + $0x664] ss:$16 sps:$4 sm:$0xff]  }
 0x104   :  { %1927 = vmatprep.subr.bf16.mxu1 %v4984_v39  ;;  %v5077_v39 = vld [vmem:[#allocation7 + $0x668] ss:$16 sps:$4 sm:$0xff]  }
 0x106   :  { %2092 = vmatpush1.bf16.msra.mxu0 %v4985_v41  ;;  %v5085_v41 = vld [vmem:[#allocation7 + $0x68c] ss:$16 sps:$4 sm:$0xff]  }
 0x107   :  { %1928 = vmatpush1.bf16.msra.mxu1 %v4982_v40  ;;  %2093 = vmatprep.subr.bf16.mxu0 %v4993_v42  ;;  %v5074_v40 = vld [vmem:[#allocation7 + $0x660] ss:$16 sps:$4 sm:$0xff]   ;;  %v5082_v42 = vld [vmem:[#allocation7 + $0x684] ss:$16 sps:$4 sm:$0xff]  }
 0x108   :  { %1929 = vmatprep.subr.bf16.mxu1 %v4990_v43  ;;  %v5080_v43 = vld [vmem:[#allocation7 + $0x680] ss:$16 sps:$4 sm:$0xff]  }
 0x10a   :  { %2094 = vmatpush1.bf16.msra.mxu0 %v4991_v45  ;;  %v5088_v45 = vld [vmem:[#allocation7 + $0x6a4] ss:$16 sps:$4 sm:$0xff]  }
 0x10b   :  { %1930 = vmatpush1.bf16.msra.mxu1 %v4988_v44  ;;  %2095 = vmatprep.subr.bf16.mxu0 %v4999_v46  ;;  %v5083_v44 = vld [vmem:[#allocation7 + $0x688] ss:$16 sps:$4 sm:$0xff]   ;;  %v5091_v46 = vld [vmem:[#allocation7 + $0x6ac] ss:$16 sps:$4 sm:$0xff]  }
 0x10c   :  { %1931 = vmatprep.subr.bf16.mxu1 %v4996_v47  ;;  %v5089_v47 = vld [vmem:[#allocation7 + $0x6a8] ss:$16 sps:$4 sm:$0xff]  }
 0x10e   :  { %2096 = vmatpush1.bf16.msra.mxu0 %v4997_v49  ;;  %v5097_v49 = vld [vmem:[#allocation7 + $0x6cc] ss:$16 sps:$4 sm:$0xff]  }
 0x10f   :  { %1932 = vmatpush1.bf16.msra.mxu1 %v4994_v48  ;;  %2097 = vmatprep.subr.bf16.mxu0 %v5005_v50  ;;  %v5086_v48 = vld [vmem:[#allocation7 + $0x6a0] ss:$16 sps:$4 sm:$0xff]   ;;  %v5094_v50 = vld [vmem:[#allocation7 + $0x6c4] ss:$16 sps:$4 sm:$0xff]  }
 0x110   :  { %1933 = vmatprep.subr.bf16.mxu1 %v5002_v51  ;;  %v5095_v51 = vld [vmem:[#allocation7 + $0x6c8] ss:$16 sps:$4 sm:$0xff]  }
 0x112   :  { %2098 = vmatpush1.bf16.msra.mxu0 %v5003_v53 }
 0x113   :  { %1934 = vmatpush1.bf16.msra.mxu1 %v5000_v52  ;;  %2099 = vmatprep.subr.bf16.mxu0 %v5011_v54  ;;  %v5092_v54 = vld [vmem:[#allocation7 + $0x6c0] ss:$16 sps:$4 sm:$0xff]  }
 0x114   :  { %1935 = vmatprep.subr.bf16.mxu1 %v5008_v55  ;;  %v5103_v55 = vld [vmem:[#allocation7 + $0x6ec] ss:$16 sps:$4 sm:$0xff]  }
 0x116   :  { %2100 = vmatpush1.bf16.msra.mxu0 %v5009_v57 }
 0x117   :  { %1936 = vmatpush1.bf16.msra.mxu1 %v5006_v56  ;;  %2101 = vmatprep.subr.bf16.mxu0 %v5017_v58  ;;  %v5100_v58 = vld [vmem:[#allocation7 + $0x6e4] ss:$16 sps:$4 sm:$0xff]  }
 0x118   :  { %1937 = vmatprep.subr.bf16.mxu1 %v5014_v59  ;;  %v5101_v59 = vld [vmem:[#allocation7 + $0x6e8] ss:$16 sps:$4 sm:$0xff]  }
 0x11a   :  { %2102 = vmatpush1.bf16.msra.mxu0 %v5015_v61  ;;  %v5109_v61 = vld [vmem:[#allocation7 + $0x70c] ss:$16 sps:$4 sm:$0xff]  }
 0x11b   :  { %1938 = vmatpush1.bf16.msra.mxu1 %v5012_v60  ;;  %2103 = vmatprep.subr.bf16.mxu0 %v5023_v62  ;;  %v5098_v60 = vld [vmem:[#allocation7 + $0x6e0] ss:$16 sps:$4 sm:$0xff]   ;;  %v5106_v62 = vld [vmem:[#allocation7 + $0x704] ss:$16 sps:$4 sm:$0xff]  }
 0x11c   :  { %1939 = vmatprep.subr.bf16.mxu1 %v5020_v63  ;;  %v5107_v63 = vld [vmem:[#allocation7 + $0x708] ss:$16 sps:$4 sm:$0xff]  }
 0x11e   :  { %2104 = vmatpush1.bf16.msra.mxu0 %v5021_v1  ;;  %v5115_v1 = vld [vmem:[#allocation7 + $0x72c] ss:$16 sps:$4 sm:$0xff]  }
 0x11f   :  { %1940 = vmatpush1.bf16.msra.mxu1 %v5018_v0  ;;  %2105 = vmatprep.subr.bf16.mxu0 %v5029_v2  ;;  %v5104_v0 = vld [vmem:[#allocation7 + $0x700] ss:$16 sps:$4 sm:$0xff]   ;;  %v5112_v2 = vld [vmem:[#allocation7 + $0x724] ss:$16 sps:$4 sm:$0xff]  }
 0x120   :  { %1941 = vmatprep.subr.bf16.mxu1 %v5026_v3  ;;  %v5113_v3 = vld [vmem:[#allocation7 + $0x728] ss:$16 sps:$4 sm:$0xff]  }
 0x122   :  { %2106 = vmatpush1.bf16.msra.mxu0 %v5027_v4  ;;  %v5110_v4 = vld [vmem:[#allocation7 + $0x720] ss:$16 sps:$4 sm:$0xff]  }
 0x123   :  { %1942 = vmatpush1.bf16.msra.mxu1 %v5024_v5  ;;  %2107 = vmatprep.subr.bf16.mxu0 %v5035_v6  ;;  %v5121_v5 = vld [vmem:[#allocation7 + $0x74c] ss:$16 sps:$4 sm:$0xff]   ;;  %v5118_v6 = vld [vmem:[#allocation7 + $0x744] ss:$16 sps:$4 sm:$0xff]  }
 0x124   :  { %1943 = vmatprep.subr.bf16.mxu1 %v5032_v7  ;;  %v5119_v7 = vld [vmem:[#allocation7 + $0x748] ss:$16 sps:$4 sm:$0xff]  }
 0x126   :  { %2108 = vmatpush1.bf16.msra.mxu0 %v5033_v8  ;;  %v5116_v8 = vld [vmem:[#allocation7 + $0x740] ss:$16 sps:$4 sm:$0xff]  }
 0x127   :  { %1944 = vmatpush1.bf16.msra.mxu1 %v5030_v9  ;;  %2109 = vmatprep.subr.bf16.mxu0 %v5041_v10  ;;  %v5127_v9 = vld [vmem:[#allocation7 + $0x76c] ss:$16 sps:$4 sm:$0xff]   ;;  %v5124_v10 = vld [vmem:[#allocation7 + $0x764] ss:$16 sps:$4 sm:$0xff]  }
 0x128   :  { %1945 = vmatprep.subr.bf16.mxu1 %v5038_v11  ;;  %v5125_v11 = vld [vmem:[#allocation7 + $0x768] ss:$16 sps:$4 sm:$0xff]  }
 0x12a   :  { %2110 = vmatpush1.bf16.msra.mxu0 %v5039_v12  ;;  %v5122_v12 = vld [vmem:[#allocation7 + $0x760] ss:$16 sps:$4 sm:$0xff]  }
 0x12b   :  { %1946 = vmatpush1.bf16.msra.mxu1 %v5036_v13  ;;  %2111 = vmatprep.subr.bf16.mxu0 %v5047_v14  ;;  %v5133_v13 = vld [vmem:[#allocation7 + $0x78c] ss:$16 sps:$4 sm:$0xff]   ;;  %v5130_v14 = vld [vmem:[#allocation7 + $0x784] ss:$16 sps:$4 sm:$0xff]  }
 0x12c   :  { %1947 = vmatprep.subr.bf16.mxu1 %v5044_v15  ;;  %v5131_v15 = vld [vmem:[#allocation7 + $0x788] ss:$16 sps:$4 sm:$0xff]  }
 0x12e   :  { %2112 = vmatpush1.bf16.msra.mxu0 %v5045_v16  ;;  %v5128_v16 = vld [vmem:[#allocation7 + $0x780] ss:$16 sps:$4 sm:$0xff]  }
 0x12f   :  { %1948 = vmatpush1.bf16.msra.mxu1 %v5042_v17  ;;  %2113 = vmatprep.subr.bf16.mxu0 %v5053_v18  ;;  %v5139_v17 = vld [vmem:[#allocation7 + $0x7ac] ss:$16 sps:$4 sm:$0xff]   ;;  %v5136_v18 = vld [vmem:[#allocation7 + $0x7a4] ss:$16 sps:$4 sm:$0xff]  }
 0x130   :  { %1949 = vmatprep.subr.bf16.mxu1 %v5050_v19  ;;  %v5137_v19 = vld [vmem:[#allocation7 + $0x7a8] ss:$16 sps:$4 sm:$0xff]  }
 0x132   :  { %2114 = vmatpush1.bf16.msra.mxu0 %v5051_v20  ;;  %v5134_v20 = vld [vmem:[#allocation7 + $0x7a0] ss:$16 sps:$4 sm:$0xff]  }
 0x133   :  { %1950 = vmatpush1.bf16.msra.mxu1 %v5048_v21  ;;  %2124 = vmatprep.subr.bf16.mxu0 %v5061_v22  ;;  %v5145_v21 = vld [vmem:[#allocation7 + $0x7cc] ss:$16 sps:$4 sm:$0xff]   ;;  %v5142_v22 = vld [vmem:[#allocation7 + $0x7c4] ss:$16 sps:$4 sm:$0xff]  }
 0x134   :  { %1960 = vmatprep.subr.bf16.mxu1 %v5058_v24  ;;  %v5143_v24 = vld [vmem:[#allocation7 + $0x7c8] ss:$16 sps:$4 sm:$0xff]  }
 0x135   :  { %2116 = vmatmul.mubr.bf16.vlgmr.msra.gmra.mrb[8].mxu0 %v4181_v25 }
 0x136   :  { %1952 = vmatmul.mubr.bf16.vlgmr.msra.gmra.mrb[8].mxu1 %v4181_v25  ;;  %2125 = vmatpush1.bf16.msra.mxu0 %v5059_v27  ;;  %v5140_v25 = vld [vmem:[#allocation7 + $0x7c0] ss:$16 sps:$4 sm:$0xff]   ;;  %v5151_v27 = vld [vmem:[#allocation7 + $0x7ec] ss:$16 sps:$4 sm:$0xff]  }
 0x137   :  { %1961 = vmatpush1.bf16.msra.mxu1 %v5056_v28  ;;  %2126 = vmatprep.subr.bf16.mxu0 %v5067_v29  ;;  %v5148_v28 = vld [vmem:[#allocation7 + $0x7e4] ss:$16 sps:$4 sm:$0xff]   ;;  %v5149_v29 = vld [vmem:[#allocation7 + $0x7e8] ss:$16 sps:$4 sm:$0xff]  }
 0x138   :  { %1962 = vmatprep.subr.bf16.mxu1 %v5064_v30  ;;  %1992 = vmatprep.mubr.bf16.mxu1 %v4184_v31  ;;  %v5146_v30 = vld [vmem:[#allocation7 + $0x7e0] ss:$16 sps:$4 sm:$0xff]  }
 0x139   :  { %2156 = vmatprep.mubr.bf16.mxu0 %v4184_v31  ;;  %v5159_v31 = vld [vmem:[#allocation10 + $0xc] ss:$16 sps:$4 sm:$0xff]  }
 0x13a   :  { %2127 = vmatpush1.bf16.msra.mxu0 %v5065_v32  ;;  %v5156_v32 = vld [vmem:[#allocation10 + $0x4] ss:$16 sps:$4 sm:$0xff]  }
 0x13b   :  { %1963 = vmatpush1.bf16.msra.mxu1 %v5062_v33  ;;  %2128 = vmatprep.subr.bf16.mxu0 %v5073_v23  ;;  %v5157_v33 = vld [vmem:[#allocation10 + $0x8] ss:$16 sps:$4 sm:$0xff]   ;;  %v4183_v23 = vcombine.low %v5883_v26, %v5883_v26  ;;  %v5177_v26 = vld [vmem:[#allocation10 + $0x6c] ss:$16 sps:$4 sm:$0xff]  }
 0x13c   :  { %1964 = vmatprep.subr.bf16.mxu1 %v5070_v34  ;;  %v5154_v34 = vld [vmem:[#allocation10] ss:$16 sps:$4 sm:$0xff]  }
 0x13e   :  { %2129 = vmatpush1.bf16.msra.mxu0 %v5071_v35  ;;  %v5165_v35 = vld [vmem:[#allocation10 + $0x2c] ss:$16 sps:$4 sm:$0xff]  }
 0x13f   :  { %1965 = vmatpush1.bf16.msra.mxu1 %v5068_v36  ;;  %2130 = vmatprep.subr.bf16.mxu0 %v5079_v37  ;;  %v5162_v36 = vld [vmem:[#allocation10 + $0x24] ss:$16 sps:$4 sm:$0xff]   ;;  %v5163_v37 = vld [vmem:[#allocation10 + $0x28] ss:$16 sps:$4 sm:$0xff]  }
 0x140   :  { %1966 = vmatprep.subr.bf16.mxu1 %v5076_v38  ;;  %v5160_v38 = vld [vmem:[#allocation10 + $0x20] ss:$16 sps:$4 sm:$0xff]  }
 0x142   :  { %2131 = vmatpush1.bf16.msra.mxu0 %v5077_v39  ;;  %v5171_v39 = vld [vmem:[#allocation10 + $0x4c] ss:$16 sps:$4 sm:$0xff]  }
 0x143   :  { %1967 = vmatpush1.bf16.msra.mxu1 %v5074_v40  ;;  %2132 = vmatprep.subr.bf16.mxu0 %v5085_v41  ;;  %v5168_v40 = vld [vmem:[#allocation10 + $0x44] ss:$16 sps:$4 sm:$0xff]   ;;  %v5169_v41 = vld [vmem:[#allocation10 + $0x48] ss:$16 sps:$4 sm:$0xff]  }
 0x144   :  { %1968 = vmatprep.subr.bf16.mxu1 %v5082_v42  ;;  %v5166_v42 = vld [vmem:[#allocation10 + $0x40] ss:$16 sps:$4 sm:$0xff]  }
 0x146   :  { %2133 = vmatpush1.bf16.msra.mxu0 %v5083_v44  ;;  %v5175_v44 = vld [vmem:[#allocation10 + $0x68] ss:$16 sps:$4 sm:$0xff]  }
 0x147   :  { %1969 = vmatpush1.bf16.msra.mxu1 %v5080_v43  ;;  %2134 = vmatprep.subr.bf16.mxu0 %v5091_v46  ;;  %v5174_v43 = vld [vmem:[#allocation10 + $0x64] ss:$16 sps:$4 sm:$0xff]   ;;  %v5183_v46 = vld [vmem:[#allocation10 + $0x8c] ss:$16 sps:$4 sm:$0xff]  }
 0x148   :  { %1970 = vmatprep.subr.bf16.mxu1 %v5088_v45  ;;  %v5887_v52 = vpop.f32.mrb[0].mxu0  ;;  %v5172_v45 = vld [vmem:[#allocation10 + $0x60] ss:$16 sps:$4 sm:$0xff]  }
 0x149   :  { %v5889_v53 = vpop.f32.mrb[0].mxu1  ;;  %v5891_v56 = vpop.f32.mrb[1].mxu0 }
 0x14a   :  { %v5893_v57 = vpop.f32.mrb[1].mxu1  ;;  %2135 = vmatpush1.bf16.msra.mxu0 %v5089_v47  ;;  %v5180_v47 = vld [vmem:[#allocation10 + $0x84] ss:$16 sps:$4 sm:$0xff]  }
 0x14b   :  { %1971 = vmatpush1.bf16.msra.mxu1 %v5086_v48  ;;  %2136 = vmatprep.subr.bf16.mxu0 %v5097_v49  ;;  %v5181_v48 = vld [vmem:[#allocation10 + $0x88] ss:$16 sps:$4 sm:$0xff]   ;;  %v5178_v49 = vld [vmem:[#allocation10 + $0x80] ss:$16 sps:$4 sm:$0xff]  }
 0x14c   :  { %1972 = vmatprep.subr.bf16.mxu1 %v5094_v50  ;;  %v5189_v50 = vld [vmem:[#allocation10 + $0xac] ss:$16 sps:$4 sm:$0xff]  }
 0x14e   :  { %2137 = vmatpush1.bf16.msra.mxu0 %v5095_v51  ;;  %v5186_v51 = vld [vmem:[#allocation10 + $0xa4] ss:$16 sps:$4 sm:$0xff]  }
 0x14f   :  { %1973 = vmatpush1.bf16.msra.mxu1 %v5092_v54  ;;  %2138 = vmatprep.subr.bf16.mxu0 %v5103_v55  ;;  %v5187_v54 = vld [vmem:[#allocation10 + $0xa8] ss:$16 sps:$4 sm:$0xff]   ;;  %v5184_v55 = vld [vmem:[#allocation10 + $0xa0] ss:$16 sps:$4 sm:$0xff]  }
 0x150   :  { %1974 = vmatprep.subr.bf16.mxu1 %v5100_v58  ;;  %v5195_v58 = vld [vmem:[#allocation10 + $0xcc] ss:$16 sps:$4 sm:$0xff]  }
 0x152   :  { %2139 = vmatpush1.bf16.msra.mxu0 %v5101_v59 }
 0x153   :  { %1975 = vmatpush1.bf16.msra.mxu1 %v5098_v60  ;;  %2140 = vmatprep.subr.bf16.mxu0 %v5109_v61  ;;  %v5192_v60 = vld [vmem:[#allocation10 + $0xc4] ss:$16 sps:$4 sm:$0xff]  }
 0x154   :  { %1976 = vmatprep.subr.bf16.mxu1 %v5106_v62 }
 0x156   :  { %2141 = vmatpush1.bf16.msra.mxu0 %v5107_v63 }
 0x157   :  { %1977 = vmatpush1.bf16.msra.mxu1 %v5104_v0  ;;  %2142 = vmatprep.subr.bf16.mxu0 %v5115_v1 }
 0x158   :  { %1978 = vmatprep.subr.bf16.mxu1 %v5112_v2 }
 0x15a   :  { %2143 = vmatpush1.bf16.msra.mxu0 %v5113_v3 }
 0x15b   :  { %1979 = vmatpush1.bf16.msra.mxu1 %v5110_v4  ;;  %2144 = vmatprep.subr.bf16.mxu0 %v5121_v5  ;;  %v5193_v4 = vld [vmem:[#allocation10 + $0xc8] ss:$16 sps:$4 sm:$0xff]  }
 0x15c   :  { %1980 = vmatprep.subr.bf16.mxu1 %v5118_v6 }
 0x15e   :  { %2145 = vmatpush1.bf16.msra.mxu0 %v5119_v7 }
 0x15f   :  { %1981 = vmatpush1.bf16.msra.mxu1 %v5116_v8  ;;  %2146 = vmatprep.subr.bf16.mxu0 %v5127_v9  ;;  %v5190_v8 = vld [vmem:[#allocation10 + $0xc0] ss:$16 sps:$4 sm:$0xff]  }
 0x160   :  { %1982 = vmatprep.subr.bf16.mxu1 %v5124_v10  ;;  %v5199_v10 = vld [vmem:[#allocation10 + $0xe8] ss:$16 sps:$4 sm:$0xff]  }
 0x162   :  { %2147 = vmatpush1.bf16.msra.mxu0 %v5125_v11  ;;  %v5207_v11 = vld [vmem:[#allocation10 + $0x10c] ss:$16 sps:$4 sm:$0xff]  }
 0x163   :  { %1983 = vmatpush1.bf16.msra.mxu1 %v5122_v12  ;;  %2148 = vmatprep.subr.bf16.mxu0 %v5133_v13  ;;  %v5204_v12 = vld [vmem:[#allocation10 + $0x104] ss:$16 sps:$4 sm:$0xff]   ;;  %v5202_v13 = vld [vmem:[#allocation10 + $0x100] ss:$16 sps:$4 sm:$0xff]  }
 0x164   :  { %1984 = vmatprep.subr.bf16.mxu1 %v5130_v14  ;;  %v5213_v14 = vld [vmem:[#allocation10 + $0x12c] ss:$16 sps:$4 sm:$0xff]  }
 0x166   :  { %2149 = vmatpush1.bf16.msra.mxu0 %v5131_v15  ;;  %v5210_v15 = vld [vmem:[#allocation10 + $0x124] ss:$16 sps:$4 sm:$0xff]  }
 0x167   :  { %1985 = vmatpush1.bf16.msra.mxu1 %v5128_v16  ;;  %2150 = vmatprep.subr.bf16.mxu0 %v5139_v17  ;;  %v5211_v16 = vld [vmem:[#allocation10 + $0x128] ss:$16 sps:$4 sm:$0xff]   ;;  %v5208_v17 = vld [vmem:[#allocation10 + $0x120] ss:$16 sps:$4 sm:$0xff]  }
 0x168   :  { %1986 = vmatprep.subr.bf16.mxu1 %v5136_v18  ;;  %v5219_v18 = vld [vmem:[#allocation10 + $0x14c] ss:$16 sps:$4 sm:$0xff]  }
 0x16a   :  { %2151 = vmatpush1.bf16.msra.mxu0 %v5137_v19  ;;  %v5216_v19 = vld [vmem:[#allocation10 + $0x144] ss:$16 sps:$4 sm:$0xff]  }
 0x16b   :  { %1987 = vmatpush1.bf16.msra.mxu1 %v5134_v20  ;;  %2152 = vmatprep.subr.bf16.mxu0 %v5145_v21  ;;  %v5217_v20 = vld [vmem:[#allocation10 + $0x148] ss:$16 sps:$4 sm:$0xff]   ;;  %v5214_v21 = vld [vmem:[#allocation10 + $0x140] ss:$16 sps:$4 sm:$0xff]  }
 0x16c   :  { %1988 = vmatprep.subr.bf16.mxu1 %v5142_v22  ;;  %v5225_v22 = vld [vmem:[#allocation10 + $0x16c] ss:$16 sps:$4 sm:$0xff]  }
 0x16e   :  { %2153 = vmatpush1.bf16.msra.mxu0 %v5143_v24  ;;  %v5222_v24 = vld [vmem:[#allocation10 + $0x164] ss:$16 sps:$4 sm:$0xff]  }
 0x16f   :  { %1989 = vmatpush1.bf16.msra.mxu1 %v5140_v25  ;;  %2154 = vmatprep.subr.bf16.mxu0 %v5151_v27  ;;  %v5223_v25 = vld [vmem:[#allocation10 + $0x168] ss:$16 sps:$4 sm:$0xff]   ;;  %v5220_v27 = vld [vmem:[#allocation10 + $0x160] ss:$16 sps:$4 sm:$0xff]  }
 0x170   :  { %1990 = vmatprep.subr.bf16.mxu1 %v5148_v28  ;;  %v5231_v28 = vld [vmem:[#allocation10 + $0x18c] ss:$16 sps:$4 sm:$0xff]  }
 0x172   :  { %2155 = vmatpush1.bf16.msra.mxu0 %v5149_v29  ;;  %v5228_v29 = vld [vmem:[#allocation10 + $0x184] ss:$16 sps:$4 sm:$0xff]  }
 0x173   :  { %1991 = vmatpush1.bf16.msra.mxu1 %v5146_v30  ;;  %3053 = vmatprep.subr.bf16.mxu0 %v5159_v31  ;;  %v5229_v30 = vld [vmem:[#allocation10 + $0x188] ss:$16 sps:$4 sm:$0xff]   ;;  %v5226_v31 = vld [vmem:[#allocation10 + $0x180] ss:$16 sps:$4 sm:$0xff]  }
 0x174   :  { %2971 = vmatprep.subr.bf16.mxu1 %v5156_v32  ;;  %v5237_v32 = vld [vmem:[#allocation10 + $0x1ac] ss:$16 sps:$4 sm:$0xff]  }
 0x175   :  { %2157 = vmatmul.mubr.bf16.vlgmr.msra.gmra.mrb[8].mxu0 %v4183_v23 }
 0x176   :  { %1993 = vmatmul.mubr.bf16.vlgmr.msra.gmra.mrb[8].mxu1 %v4183_v23  ;;  %3054 = vmatpush1.bf16.msra.mxu0 %v5157_v33  ;;  %v5234_v33 = vld [vmem:[#allocation10 + $0x1a4] ss:$16 sps:$4 sm:$0xff]   ;;  %v5235_v23 = vld [vmem:[#allocation10 + $0x1a8] ss:$16 sps:$4 sm:$0xff]  }
 0x177   :  { %2972 = vmatpush1.bf16.msra.mxu1 %v5154_v34  ;;  %3055 = vmatprep.subr.bf16.mxu0 %v5165_v35  ;;  %v5232_v34 = vld [vmem:[#allocation10 + $0x1a0] ss:$16 sps:$4 sm:$0xff]   ;;  %v5240_v35 = vld [vmem:[#allocation10 + $0x1c4] ss:$16 sps:$4 sm:$0xff]  }
 0x178   :  { %2973 = vmatprep.subr.bf16.mxu1 %v5162_v36  ;;  %v5243_v36 = vld [vmem:[#allocation10 + $0x1cc] ss:$16 sps:$4 sm:$0xff]  }
 0x17a   :  { %3056 = vmatpush1.bf16.msra.mxu0 %v5163_v37  ;;  %v5238_v37 = vld [vmem:[#allocation10 + $0x1c0] ss:$16 sps:$4 sm:$0xff]  }
 0x17b   :  { %2974 = vmatpush1.bf16.msra.mxu1 %v5160_v38  ;;  %3057 = vmatprep.subr.bf16.mxu0 %v5171_v39  ;;  %v5241_v38 = vld [vmem:[#allocation10 + $0x1c8] ss:$16 sps:$4 sm:$0xff]   ;;  %v5246_v39 = vld [vmem:[#allocation10 + $0x1e4] ss:$16 sps:$4 sm:$0xff]  }
 0x17c   :  { %2975 = vmatprep.subr.bf16.mxu1 %v5168_v40  ;;  %v5249_v40 = vld [vmem:[#allocation10 + $0x1ec] ss:$16 sps:$4 sm:$0xff]  }
 0x17e   :  { %3058 = vmatpush1.bf16.msra.mxu0 %v5169_v41  ;;  %v5244_v41 = vld [vmem:[#allocation10 + $0x1e0] ss:$16 sps:$4 sm:$0xff]  }
 0x17f   :  { %2976 = vmatpush1.bf16.msra.mxu1 %v5166_v42  ;;  %3059 = vmatprep.subr.bf16.mxu0 %v5177_v26  ;;  %v5247_v42 = vld [vmem:[#allocation10 + $0x1e8] ss:$16 sps:$4 sm:$0xff]   ;;  %v5252_v26 = vld [vmem:[#allocation10 + $0x204] ss:$16 sps:$4 sm:$0xff]  }
 0x180   :  { %2977 = vmatprep.subr.bf16.mxu1 %v5174_v43  ;;  %v5255_v43 = vld [vmem:[#allocation10 + $0x20c] ss:$16 sps:$4 sm:$0xff]  }
 0x182   :  { %3060 = vmatpush1.bf16.msra.mxu0 %v5175_v44 }
 0x183   :  { %2978 = vmatpush1.bf16.msra.mxu1 %v5172_v45  ;;  %3061 = vmatprep.subr.bf16.mxu0 %v5183_v46 }
 0x184   :  { %2979 = vmatprep.subr.bf16.mxu1 %v5180_v47 }
 0x186   :  { %3062 = vmatpush1.bf16.msra.mxu0 %v5181_v48 }
 0x187   :  { %2980 = vmatpush1.bf16.msra.mxu1 %v5178_v49  ;;  %3063 = vmatprep.subr.bf16.mxu0 %v5189_v50 }
 0x188   :  { %v2035_v59 = vpop.f32.mrb[4].mxu0  ;;  %2981 = vmatprep.subr.bf16.mxu1 %v5186_v51 }
 0x189   :  { %v1871_v61 = vpop.f32.mrb[4].mxu1  ;;  %v5898_v62 = vadd.f32 %v2035_v59, %v5889_v53  ;;  %v2037_v63 = vpop.f32.mrb[5].mxu0  ;;  %v5201_v53 = vld [vmem:[#allocation10 + $0xec] ss:$16 sps:$4 sm:$0xff]  }
 0x18a   :  { %v5901_v0 = vadd.f32 %v1871_v61, %v5887_v52  ;;  %v1873_v1 = vpop.f32.mrb[5].mxu1  ;;  %v5904_v2 = vadd.f32 %v2037_v63, %v5893_v57  ;;  %v2039_v3 = vpop.f32.mrb[6].mxu0  ;;  %3064 = vmatpush1.bf16.msra.mxu0 %v5187_v54  ;;  %v5198_v52 = vld [vmem:[#allocation10 + $0xe4] ss:$16 sps:$4 sm:$0xff]   ;;  %v5196_v57 = vld [vmem:[#allocation10 + $0xe0] ss:$16 sps:$4 sm:$0xff]  }
 0x18b   :  { %v5907_v5 = vadd.f32 %v1873_v1, %v5891_v56  ;;  %v1875_v6 = vpop.f32.mrb[6].mxu1  ;;  %v2040_v7 = vpop.f32.mrb[7].mxu0  ;;  %2982 = vmatpush1.bf16.msra.mxu1 %v5184_v55  ;;  %3065 = vmatprep.subr.bf16.mxu0 %v5195_v58  ;;  %v5205_v56 = vld [vmem:[#allocation10 + $0x108] ss:$16 sps:$4 sm:$0xff]  }
 0x18c   :  { %v1876_v9 = vpop.f32.mrb[7].mxu1  ;;  %2983 = vmatprep.subr.bf16.mxu1 %v5192_v60 }
 0x18d   :  { %v5259_v9 = vld [vmem:[#allocation10 + $0x228] ss:$16 sps:$4 sm:$0xff]  }
 0x18e   :  { %3066 = vmatpush1.bf16.msra.mxu0 %v5193_v4  ;;  %v5250_v4 = vld [vmem:[#allocation10 + $0x200] ss:$16 sps:$4 sm:$0xff]  }
 0x18f   :  { %2984 = vmatpush1.bf16.msra.mxu1 %v5190_v8  ;;  %3067 = vmatprep.subr.bf16.mxu0 %v5201_v53  ;;  %v5256_v53 = vld [vmem:[#allocation10 + $0x220] ss:$16 sps:$4 sm:$0xff]  }
 0x190   :  { %2985 = vmatprep.subr.bf16.mxu1 %v5198_v52  ;;  %v5264_v52 = vld [vmem:[#allocation10 + $0x244] ss:$16 sps:$4 sm:$0xff]  }
 0x192   :  { %3068 = vmatpush1.bf16.msra.mxu0 %v5199_v10  ;;  %v5267_v10 = vld [vmem:[#allocation10 + $0x24c] ss:$16 sps:$4 sm:$0xff]  }
 0x193   :  { %2986 = vmatpush1.bf16.msra.mxu1 %v5196_v57  ;;  %3069 = vmatprep.subr.bf16.mxu0 %v5207_v11  ;;  %v5262_v57 = vld [vmem:[#allocation10 + $0x240] ss:$16 sps:$4 sm:$0xff]   ;;  %v5265_v11 = vld [vmem:[#allocation10 + $0x248] ss:$16 sps:$4 sm:$0xff]  }
 0x194   :  { %2987 = vmatprep.subr.bf16.mxu1 %v5204_v12  ;;  %v5270_v12 = vld [vmem:[#allocation10 + $0x264] ss:$16 sps:$4 sm:$0xff]  }
 0x196   :  { %3070 = vmatpush1.bf16.msra.mxu0 %v5205_v56  ;;  %v5273_v56 = vld [vmem:[#allocation10 + $0x26c] ss:$16 sps:$4 sm:$0xff]  }
 0x197   :  { %2988 = vmatpush1.bf16.msra.mxu1 %v5202_v13  ;;  %3071 = vmatprep.subr.bf16.mxu0 %v5213_v14  ;;  %v5268_v13 = vld [vmem:[#allocation10 + $0x260] ss:$16 sps:$4 sm:$0xff]   ;;  %v5271_v14 = vld [vmem:[#allocation10 + $0x268] ss:$16 sps:$4 sm:$0xff]  }
 0x198   :  { %2989 = vmatprep.subr.bf16.mxu1 %v5210_v15  ;;  %v5276_v15 = vld [vmem:[#allocation10 + $0x284] ss:$16 sps:$4 sm:$0xff]  }
 0x19a   :  { %3072 = vmatpush1.bf16.msra.mxu0 %v5211_v16  ;;  %v5279_v16 = vld [vmem:[#allocation10 + $0x28c] ss:$16 sps:$4 sm:$0xff]  }
 0x19b   :  { %2990 = vmatpush1.bf16.msra.mxu1 %v5208_v17  ;;  %3073 = vmatprep.subr.bf16.mxu0 %v5219_v18  ;;  %v5274_v17 = vld [vmem:[#allocation10 + $0x280] ss:$16 sps:$4 sm:$0xff]   ;;  %v5277_v18 = vld [vmem:[#allocation10 + $0x288] ss:$16 sps:$4 sm:$0xff]  }
 0x19c   :  { %2991 = vmatprep.subr.bf16.mxu1 %v5216_v19  ;;  %v5282_v19 = vld [vmem:[#allocation10 + $0x2a4] ss:$16 sps:$4 sm:$0xff]  }
 0x19e   :  { %3074 = vmatpush1.bf16.msra.mxu0 %v5217_v20  ;;  %v5285_v20 = vld [vmem:[#allocation10 + $0x2ac] ss:$16 sps:$4 sm:$0xff]  }
 0x19f   :  { %2992 = vmatpush1.bf16.msra.mxu1 %v5214_v21  ;;  %3075 = vmatprep.subr.bf16.mxu0 %v5225_v22  ;;  %v5280_v21 = vld [vmem:[#allocation10 + $0x2a0] ss:$16 sps:$4 sm:$0xff]   ;;  %v5283_v22 = vld [vmem:[#allocation10 + $0x2a8] ss:$16 sps:$4 sm:$0xff]  }
 0x1a0   :  { %2993 = vmatprep.subr.bf16.mxu1 %v5222_v24  ;;  %v5288_v24 = vld [vmem:[#allocation10 + $0x2c4] ss:$16 sps:$4 sm:$0xff]  }
 0x1a2   :  { %3076 = vmatpush1.bf16.msra.mxu0 %v5223_v25  ;;  %v5291_v25 = vld [vmem:[#allocation10 + $0x2cc] ss:$16 sps:$4 sm:$0xff]  }
 0x1a3   :  { %2994 = vmatpush1.bf16.msra.mxu1 %v5220_v27  ;;  %3077 = vmatprep.subr.bf16.mxu0 %v5231_v28  ;;  %v5286_v27 = vld [vmem:[#allocation10 + $0x2c0] ss:$16 sps:$4 sm:$0xff]   ;;  %v5289_v28 = vld [vmem:[#allocation10 + $0x2c8] ss:$16 sps:$4 sm:$0xff]  }
 0x1a4   :  { %2995 = vmatprep.subr.bf16.mxu1 %v5228_v29  ;;  %v5294_v29 = vld [vmem:[#allocation10 + $0x2e4] ss:$16 sps:$4 sm:$0xff]  }
 0x1a6   :  { %3078 = vmatpush1.bf16.msra.mxu0 %v5229_v30  ;;  %v5297_v30 = vld [vmem:[#allocation10 + $0x2ec] ss:$16 sps:$4 sm:$0xff]  }
 0x1a7   :  { %2996 = vmatpush1.bf16.msra.mxu1 %v5226_v31  ;;  %3079 = vmatprep.subr.bf16.mxu0 %v5237_v32  ;;  %v5292_v31 = vld [vmem:[#allocation10 + $0x2e0] ss:$16 sps:$4 sm:$0xff]   ;;  %v5295_v32 = vld [vmem:[#allocation10 + $0x2e8] ss:$16 sps:$4 sm:$0xff]  }
 0x1a8   :  { %2997 = vmatprep.subr.bf16.mxu1 %v5234_v33  ;;  %v5300_v33 = vld [vmem:[#allocation10 + $0x304] ss:$16 sps:$4 sm:$0xff]  }
 0x1aa   :  { %3080 = vmatpush1.bf16.msra.mxu0 %v5235_v23  ;;  %v5303_v23 = vld [vmem:[#allocation10 + $0x30c] ss:$16 sps:$4 sm:$0xff]  }
 0x1ab   :  { %2998 = vmatpush1.bf16.msra.mxu1 %v5232_v34  ;;  %3081 = vmatprep.subr.bf16.mxu0 %v5243_v36  ;;  %v5298_v34 = vld [vmem:[#allocation10 + $0x300] ss:$16 sps:$4 sm:$0xff]   ;;  %v5306_v36 = vld [vmem:[#allocation10 + $0x324] ss:$16 sps:$4 sm:$0xff]  }
 0x1ac   :  { %2999 = vmatprep.subr.bf16.mxu1 %v5240_v35  ;;  %v5301_v35 = vld [vmem:[#allocation10 + $0x308] ss:$16 sps:$4 sm:$0xff]  }
 0x1ae   :  { %3082 = vmatpush1.bf16.msra.mxu0 %v5241_v38  ;;  %v5304_v38 = vld [vmem:[#allocation10 + $0x320] ss:$16 sps:$4 sm:$0xff]  }
 0x1af   :  { %3000 = vmatpush1.bf16.msra.mxu1 %v5238_v37  ;;  %3083 = vmatprep.subr.bf16.mxu0 %v5249_v40  ;;  %v5309_v37 = vld [vmem:[#allocation10 + $0x32c] ss:$16 sps:$4 sm:$0xff]   ;;  %v5312_v40 = vld [vmem:[#allocation10 + $0x344] ss:$16 sps:$4 sm:$0xff]  }
 0x1b0   :  { %3001 = vmatprep.subr.bf16.mxu1 %v5246_v39  ;;  %v5307_v39 = vld [vmem:[#allocation10 + $0x328] ss:$16 sps:$4 sm:$0xff]  }
 0x1b2   :  { %3084 = vmatpush1.bf16.msra.mxu0 %v5247_v42  ;;  %v5310_v42 = vld [vmem:[#allocation10 + $0x340] ss:$16 sps:$4 sm:$0xff]  }
 0x1b3   :  { %3002 = vmatpush1.bf16.msra.mxu1 %v5244_v41  ;;  %3094 = vmatprep.subr.bf16.mxu0 %v5255_v43  ;;  %v5315_v41 = vld [vmem:[#allocation10 + $0x34c] ss:$16 sps:$4 sm:$0xff]   ;;  %v5318_v43 = vld [vmem:[#allocation10 + $0x364] ss:$16 sps:$4 sm:$0xff]  }
 0x1b4   :  { %3012 = vmatprep.subr.bf16.mxu1 %v5252_v26  ;;  %v5313_v26 = vld [vmem:[#allocation10 + $0x348] ss:$16 sps:$4 sm:$0xff]  }
 0x248   :  { %v2158_v44 = vpop.f32.mrb[8].mxu0 }
 0x249   :  { %v1994_v45 = vpop.f32.mrb[8].mxu1  ;;  %v5910_v46 = vadd.f32 %v2158_v44, %v5898_v62  ;;  %v2160_v47 = vpop.f32.mrb[9].mxu0  ;;  %v5321_v44 = vld [vmem:[#allocation10 + $0x36c] ss:$16 sps:$4 sm:$0xff]  }
 0x24a   :  { %v4706_v48 = vadd.f32 %v1994_v45, %v5901_v0  ;;  %v1996_v49 = vpop.f32.mrb[9].mxu1  ;;  %v4709_v50 = vadd.f32 %v2160_v47, %v5904_v2  ;;  %v2162_v51 = vpop.f32.mrb[10].mxu0  ;;  %v5253_v0 = vld [vmem:[#allocation10 + $0x208] ss:$16 sps:$4 sm:$0xff]   ;;  %v5258_v2 = vld [vmem:[#allocation10 + $0x224] ss:$16 sps:$4 sm:$0xff]  }
 0x24b   :  { %v4707_v54 = vadd.f32 %v1996_v49, %v5907_v5  ;;  %v1998_v55 = vpop.f32.mrb[10].mxu1  ;;  %v2163_v58 = vpop.f32.mrb[11].mxu0  ;;  %v5261_v5 = vld [vmem:[#allocation10 + $0x22c] ss:$16 sps:$4 sm:$0xff]   ;;  %v5316_v45 = vld [vmem:[#allocation10 + $0x360] ss:$16 sps:$4 sm:$0xff]  }
 0x24c   :  { %vm2165_vm1 = vcmp.gt.f32.partialorder %v4706_v48, 0.0  ;;  %v2169_v59 = vmul.f32 0.2, %v4706_v48  ;;  %v2172_v60 = vmul.f32 0.2, %v4709_v50  ;;  %vm2168_vm3 = vcmp.gt.f32.partialorder %v4709_v50, 0.0 }
 0x24d   :  { %vm2166_vm2 = vcmp.gt.f32.partialorder %v4707_v54, 0.0  ;;  %v2170_v61 = vmul.f32 0.2, %v4707_v54  ;;  %v1999_v63 = vpop.f32.mrb[11].mxu1  ;;  %v5319_v47 = vld [vmem:[#allocation10 + $0x368] ss:$16 sps:$4 sm:$0xff]  }
 0x24e   :  { %v2173_v62 = vsel %vm2165_vm1, %v4706_v48, %v2169_v59  ;;  %v2176_v6 = vsel %vm2168_vm3, %v4709_v50, %v2172_v60  ;;  %v5324_v48 = vld [vmem:[#allocation10 + $0x384] ss:$16 sps:$4 sm:$0xff]   ;;  %v5327_v49 = vld [vmem:[#allocation10 + $0x38c] ss:$16 sps:$4 sm:$0xff]   ;;  %v5322_v50 = vld [vmem:[#allocation10 + $0x380] ss:$16 sps:$4 sm:$0xff]  }
 0x24f   :  { %v2174_v1 = vsel %vm2166_vm2, %v4707_v54, %v2170_v61  ;;  %v2177_v7 = vpack.c.bf16 %v2173_v62, %v2173_v62  ;;  %v2180_v8 = vpack.c.bf16 %v2176_v6, %v2176_v6  ;;  %v5325_v51 = vld [vmem:[#allocation10 + $0x388] ss:$16 sps:$4 sm:$0xff]   ;;  %v5330_v54 = vld [vmem:[#allocation10 + $0x3a4] ss:$16 sps:$4 sm:$0xff]   ;;  %v5333_v55 = vld [vmem:[#allocation10 + $0x3ac] ss:$16 sps:$4 sm:$0xff]  }
 0x250   :  { %v2178_v3 = vpack.c.bf16 %v2174_v1, %v2174_v1  ;;  %v5328_v58 = vld [vmem:[#allocation10 + $0x3a0] ss:$16 sps:$4 sm:$0xff]   ;;  %v5331_v59 = vld [vmem:[#allocation10 + $0x3a8] ss:$16 sps:$4 sm:$0xff]   ;;  %v5336_v60 = vld [vmem:[#allocation10 + $0x3c4] ss:$16 sps:$4 sm:$0xff]  }
 0x251   :  { %v5339_v61 = vld [vmem:[#allocation10 + $0x3cc] ss:$16 sps:$4 sm:$0xff]   ;;  %v5334_v63 = vld [vmem:[#allocation10 + $0x3c0] ss:$16 sps:$4 sm:$0xff]   ;;  %v5337_v62 = vld [vmem:[#allocation10 + $0x3c8] ss:$16 sps:$4 sm:$0xff]  }
 0x252   :  { %3003 = vmatprep.mubr.bf16.mxu1 %v2178_v3  ;;  %3085 = vmatprep.mubr.bf16.mxu0 %v2178_v3  ;;  %v5342_v1 = vld [vmem:[#allocation10 + $0x3e4] ss:$16 sps:$4 sm:$0xff]   ;;  %v5345_v3 = vld [vmem:[#allocation10 + $0x3ec] ss:$16 sps:$4 sm:$0xff]   ;;  %vm2167_vm4 = vcmp.gt.f32.partialorder %v5910_v46, 0.0 }
 0x253   :  { %3004 = vmatmul.mubr.bf16.vlgmr.msra.gmra.mrb[12].mxu1 %v2177_v7  ;;  %3086 = vmatmul.mubr.bf16.vlgmr.msra.gmra.mrb[12].mxu0 %v2177_v7  ;;  %v5343_v6 = vld [vmem:[#allocation10 + $0x3e8] ss:$16 sps:$4 sm:$0xff]   ;;  %v5348_v7 = vld [vmem:[#allocation11 + $0x4] ss:$16 sps:$4 sm:$0xff]  }
 0x254   :  { %3013 = vmatpush1.bf16.msra.mxu1 %v5250_v4  ;;  %3095 = vmatpush1.bf16.msra.mxu0 %v5253_v0  ;;  %v2171_v4 = vmul.f32 0.2, %v5910_v46  ;;  %v5340_v0 = vld [vmem:[#allocation10 + $0x3e0] ss:$16 sps:$4 sm:$0xff]  }
 0x255   :  { %3044 = vmatprep.mubr.bf16.mxu1 %v2180_v8  ;;  %3126 = vmatprep.mubr.bf16.mxu0 %v2180_v8  ;;  %v5346_v8 = vld [vmem:[#allocation11] ss:$16 sps:$4 sm:$0xff]  }
 0x256   :  { %3014 = vmatprep.subr.bf16.mxu1 %v5258_v2  ;;  %3096 = vmatprep.subr.bf16.mxu0 %v5261_v5  ;;  %v5351_v2 = vld [vmem:[#allocation11 + $0xc] ss:$16 sps:$4 sm:$0xff]   ;;  %v2175_v5 = vsel %vm2167_vm4, %v5910_v46, %v2171_v4  ;;  %v5358_v46 = vld [vmem:[#allocation11 + $0x40] ss:$16 sps:$4 sm:$0xff]   ;;  %v5433_v4 = vld [vmem:[#allocation11 + $0x1c8] ss:$16 sps:$4 sm:$0xff]  }
 0x258   :  { %3015 = vmatpush1.bf16.msra.mxu1 %v5256_v53  ;;  %3097 = vmatpush1.bf16.msra.mxu0 %v5259_v9  ;;  %v5349_v53 = vld [vmem:[#allocation11 + $0x8] ss:$16 sps:$4 sm:$0xff]   ;;  %v2179_v9 = vpack.c.bf16 %v2175_v5, %v2175_v5  ;;  %v5444_v5 = vld [vmem:[#allocation11 + $0x204] ss:$16 sps:$4 sm:$0xff]  }
 0x259   :  { %3016 = vmatprep.subr.bf16.mxu1 %v5264_v52  ;;  %3098 = vmatprep.subr.bf16.mxu0 %v5267_v10  ;;  %v5354_v52 = vld [vmem:[#allocation11 + $0x24] ss:$16 sps:$4 sm:$0xff]   ;;  %v5357_v10 = vld [vmem:[#allocation11 + $0x2c] ss:$16 sps:$4 sm:$0xff]  }
 0x25c   :  { %3017 = vmatpush1.bf16.msra.mxu1 %v5262_v57  ;;  %3099 = vmatpush1.bf16.msra.mxu0 %v5265_v11  ;;  %v5352_v57 = vld [vmem:[#allocation11 + $0x20] ss:$16 sps:$4 sm:$0xff]   ;;  %v5355_v11 = vld [vmem:[#allocation11 + $0x28] ss:$16 sps:$4 sm:$0xff]  }
 0x25d   :  { %3018 = vmatprep.subr.bf16.mxu1 %v5270_v12  ;;  %3100 = vmatprep.subr.bf16.mxu0 %v5273_v56  ;;  %v5360_v12 = vld [vmem:[#allocation11 + $0x44] ss:$16 sps:$4 sm:$0xff]   ;;  %v5363_v56 = vld [vmem:[#allocation11 + $0x4c] ss:$16 sps:$4 sm:$0xff]  }
 0x260   :  { %3019 = vmatpush1.bf16.msra.mxu1 %v5268_v13  ;;  %3101 = vmatpush1.bf16.msra.mxu0 %v5271_v14  ;;  %v5361_v13 = vld [vmem:[#allocation11 + $0x48] ss:$16 sps:$4 sm:$0xff]   ;;  %v5366_v14 = vld [vmem:[#allocation11 + $0x64] ss:$16 sps:$4 sm:$0xff]  }
 0x261   :  { %3020 = vmatprep.subr.bf16.mxu1 %v5276_v15  ;;  %3102 = vmatprep.subr.bf16.mxu0 %v5279_v16  ;;  %v5369_v15 = vld [vmem:[#allocation11 + $0x6c] ss:$16 sps:$4 sm:$0xff]   ;;  %v5364_v16 = vld [vmem:[#allocation11 + $0x60] ss:$16 sps:$4 sm:$0xff]  }
 0x264   :  { %3021 = vmatpush1.bf16.msra.mxu1 %v5274_v17  ;;  %3103 = vmatpush1.bf16.msra.mxu0 %v5277_v18  ;;  %v5367_v17 = vld [vmem:[#allocation11 + $0x68] ss:$16 sps:$4 sm:$0xff]   ;;  %v5372_v18 = vld [vmem:[#allocation11 + $0x84] ss:$16 sps:$4 sm:$0xff]  }
 0x265   :  { %3022 = vmatprep.subr.bf16.mxu1 %v5282_v19  ;;  %3104 = vmatprep.subr.bf16.mxu0 %v5285_v20  ;;  %v5375_v19 = vld [vmem:[#allocation11 + $0x8c] ss:$16 sps:$4 sm:$0xff]   ;;  %v5370_v20 = vld [vmem:[#allocation11 + $0x80] ss:$16 sps:$4 sm:$0xff]  }
 0x268   :  { %3023 = vmatpush1.bf16.msra.mxu1 %v5280_v21  ;;  %3105 = vmatpush1.bf16.msra.mxu0 %v5283_v22  ;;  %v5373_v21 = vld [vmem:[#allocation11 + $0x88] ss:$16 sps:$4 sm:$0xff]   ;;  %v5378_v22 = vld [vmem:[#allocation11 + $0xa4] ss:$16 sps:$4 sm:$0xff]  }
 0x269   :  { %3024 = vmatprep.subr.bf16.mxu1 %v5288_v24  ;;  %3106 = vmatprep.subr.bf16.mxu0 %v5291_v25  ;;  %v5381_v24 = vld [vmem:[#allocation11 + $0xac] ss:$16 sps:$4 sm:$0xff]   ;;  %v5376_v25 = vld [vmem:[#allocation11 + $0xa0] ss:$16 sps:$4 sm:$0xff]  }
 0x26c   :  { %3025 = vmatpush1.bf16.msra.mxu1 %v5286_v27  ;;  %3107 = vmatpush1.bf16.msra.mxu0 %v5289_v28  ;;  %v5379_v27 = vld [vmem:[#allocation11 + $0xa8] ss:$16 sps:$4 sm:$0xff]   ;;  %v5384_v28 = vld [vmem:[#allocation11 + $0xc4] ss:$16 sps:$4 sm:$0xff]  }
 0x26d   :  { %3026 = vmatprep.subr.bf16.mxu1 %v5294_v29  ;;  %3108 = vmatprep.subr.bf16.mxu0 %v5297_v30  ;;  %v5387_v29 = vld [vmem:[#allocation11 + $0xcc] ss:$16 sps:$4 sm:$0xff]   ;;  %v5382_v30 = vld [vmem:[#allocation11 + $0xc0] ss:$16 sps:$4 sm:$0xff]  }
 0x270   :  { %3027 = vmatpush1.bf16.msra.mxu1 %v5292_v31  ;;  %3109 = vmatpush1.bf16.msra.mxu0 %v5295_v32  ;;  %v5385_v31 = vld [vmem:[#allocation11 + $0xc8] ss:$16 sps:$4 sm:$0xff]   ;;  %v5390_v32 = vld [vmem:[#allocation11 + $0xe4] ss:$16 sps:$4 sm:$0xff]  }
 0x271   :  { %3028 = vmatprep.subr.bf16.mxu1 %v5300_v33  ;;  %3110 = vmatprep.subr.bf16.mxu0 %v5303_v23  ;;  %v5393_v33 = vld [vmem:[#allocation11 + $0xec] ss:$16 sps:$4 sm:$0xff]   ;;  %v5388_v23 = vld [vmem:[#allocation11 + $0xe0] ss:$16 sps:$4 sm:$0xff]  }
 0x274   :  { %3029 = vmatpush1.bf16.msra.mxu1 %v5298_v34  ;;  %3111 = vmatpush1.bf16.msra.mxu0 %v5301_v35  ;;  %v5391_v34 = vld [vmem:[#allocation11 + $0xe8] ss:$16 sps:$4 sm:$0xff]   ;;  %v5396_v35 = vld [vmem:[#allocation11 + $0x104] ss:$16 sps:$4 sm:$0xff]  }
 0x275   :  { %3030 = vmatprep.subr.bf16.mxu1 %v5306_v36  ;;  %3112 = vmatprep.subr.bf16.mxu0 %v5309_v37  ;;  %v5399_v36 = vld [vmem:[#allocation11 + $0x10c] ss:$16 sps:$4 sm:$0xff]   ;;  %v5394_v37 = vld [vmem:[#allocation11 + $0x100] ss:$16 sps:$4 sm:$0xff]  }
 0x278   :  { %3031 = vmatpush1.bf16.msra.mxu1 %v5304_v38  ;;  %3113 = vmatpush1.bf16.msra.mxu0 %v5307_v39  ;;  %v5397_v38 = vld [vmem:[#allocation11 + $0x108] ss:$16 sps:$4 sm:$0xff]   ;;  %v5402_v39 = vld [vmem:[#allocation11 + $0x124] ss:$16 sps:$4 sm:$0xff]  }
 0x279   :  { %3032 = vmatprep.subr.bf16.mxu1 %v5312_v40  ;;  %3114 = vmatprep.subr.bf16.mxu0 %v5315_v41  ;;  %v5405_v40 = vld [vmem:[#allocation11 + $0x12c] ss:$16 sps:$4 sm:$0xff]   ;;  %v5400_v41 = vld [vmem:[#allocation11 + $0x120] ss:$16 sps:$4 sm:$0xff]  }
 0x27c   :  { %3033 = vmatpush1.bf16.msra.mxu1 %v5310_v42  ;;  %3115 = vmatpush1.bf16.msra.mxu0 %v5313_v26  ;;  %v5403_v42 = vld [vmem:[#allocation11 + $0x128] ss:$16 sps:$4 sm:$0xff]   ;;  %v5408_v26 = vld [vmem:[#allocation11 + $0x144] ss:$16 sps:$4 sm:$0xff]  }
 0x27d   :  { %3034 = vmatprep.subr.bf16.mxu1 %v5318_v43  ;;  %3116 = vmatprep.subr.bf16.mxu0 %v5321_v44  ;;  %v5411_v43 = vld [vmem:[#allocation11 + $0x14c] ss:$16 sps:$4 sm:$0xff]   ;;  %v5406_v44 = vld [vmem:[#allocation11 + $0x140] ss:$16 sps:$4 sm:$0xff]  }
 0x280   :  { %3035 = vmatpush1.bf16.msra.mxu1 %v5316_v45  ;;  %3117 = vmatpush1.bf16.msra.mxu0 %v5319_v47  ;;  %v5409_v45 = vld [vmem:[#allocation11 + $0x148] ss:$16 sps:$4 sm:$0xff]   ;;  %v5414_v47 = vld [vmem:[#allocation11 + $0x164] ss:$16 sps:$4 sm:$0xff]  }
 0x281   :  { %3036 = vmatprep.subr.bf16.mxu1 %v5324_v48  ;;  %3118 = vmatprep.subr.bf16.mxu0 %v5327_v49  ;;  %v5417_v48 = vld [vmem:[#allocation11 + $0x16c] ss:$16 sps:$4 sm:$0xff]   ;;  %v5412_v49 = vld [vmem:[#allocation11 + $0x160] ss:$16 sps:$4 sm:$0xff]  }
 0x284   :  { %3037 = vmatpush1.bf16.msra.mxu1 %v5322_v50  ;;  %3119 = vmatpush1.bf16.msra.mxu0 %v5325_v51  ;;  %v5415_v50 = vld [vmem:[#allocation11 + $0x168] ss:$16 sps:$4 sm:$0xff]   ;;  %v5420_v51 = vld [vmem:[#allocation11 + $0x184] ss:$16 sps:$4 sm:$0xff]  }
 0x285   :  { %3038 = vmatprep.subr.bf16.mxu1 %v5330_v54  ;;  %3120 = vmatprep.subr.bf16.mxu0 %v5333_v55  ;;  %v5423_v54 = vld [vmem:[#allocation11 + $0x18c] ss:$16 sps:$4 sm:$0xff]   ;;  %v5418_v55 = vld [vmem:[#allocation11 + $0x180] ss:$16 sps:$4 sm:$0xff]  }
 0x288   :  { %3039 = vmatpush1.bf16.msra.mxu1 %v5328_v58  ;;  %3121 = vmatpush1.bf16.msra.mxu0 %v5331_v59  ;;  %v5421_v58 = vld [vmem:[#allocation11 + $0x188] ss:$16 sps:$4 sm:$0xff]   ;;  %v5426_v59 = vld [vmem:[#allocation11 + $0x1a4] ss:$16 sps:$4 sm:$0xff]  }
 0x289   :  { %3040 = vmatprep.subr.bf16.mxu1 %v5336_v60  ;;  %3122 = vmatprep.subr.bf16.mxu0 %v5339_v61  ;;  %v5429_v60 = vld [vmem:[#allocation11 + $0x1ac] ss:$16 sps:$4 sm:$0xff]   ;;  %v5424_v61 = vld [vmem:[#allocation11 + $0x1a0] ss:$16 sps:$4 sm:$0xff]  }
 0x28c   :  { %3041 = vmatpush1.bf16.msra.mxu1 %v5334_v63  ;;  %3123 = vmatpush1.bf16.msra.mxu0 %v5337_v62  ;;  %v5427_v63 = vld [vmem:[#allocation11 + $0x1a8] ss:$16 sps:$4 sm:$0xff]   ;;  %v5432_v62 = vld [vmem:[#allocation11 + $0x1c4] ss:$16 sps:$4 sm:$0xff]  }
 0x28d   :  { %3042 = vmatprep.subr.bf16.mxu1 %v5342_v1  ;;  %3124 = vmatprep.subr.bf16.mxu0 %v5345_v3  ;;  %v5435_v1 = vld [vmem:[#allocation11 + $0x1cc] ss:$16 sps:$4 sm:$0xff]   ;;  %v5430_v3 = vld [vmem:[#allocation11 + $0x1c0] ss:$16 sps:$4 sm:$0xff]  }
 0x290   :  { %3043 = vmatpush1.bf16.msra.mxu1 %v5340_v0  ;;  %3125 = vmatpush1.bf16.msra.mxu0 %v5343_v6  ;;  %v5438_v0 = vld [vmem:[#allocation11 + $0x1e4] ss:$16 sps:$4 sm:$0xff]   ;;  %v5441_v6 = vld [vmem:[#allocation11 + $0x1ec] ss:$16 sps:$4 sm:$0xff]  }
 0x291   :  { %3941 = vmatprep.subr.bf16.mxu1 %v5348_v7  ;;  %4023 = vmatprep.subr.bf16.mxu0 %v5351_v2  ;;  %v5436_v7 = vld [vmem:[#allocation11 + $0x1e0] ss:$16 sps:$4 sm:$0xff]   ;;  %v5439_v2 = vld [vmem:[#allocation11 + $0x1e8] ss:$16 sps:$4 sm:$0xff]  }
 0x293   :  { %3045 = vmatmul.mubr.bf16.vlgmr.msra.gmra.mrb[12].mxu1 %v2179_v9  ;;  %3127 = vmatmul.mubr.bf16.vlgmr.msra.gmra.mrb[12].mxu0 %v2179_v9 }
 0x294   :  { %3942 = vmatpush1.bf16.msra.mxu1 %v5346_v8  ;;  %4024 = vmatpush1.bf16.msra.mxu0 %v5349_v53  ;;  %v5447_v8 = vld [vmem:[#allocation11 + $0x20c] ss:$16 sps:$4 sm:$0xff]   ;;  %v2311_v53 = vlaneseq }
 0x295   :  { %3943 = vmatprep.subr.bf16.mxu1 %v5354_v52  ;;  %4025 = vmatprep.subr.bf16.mxu0 %v5357_v10  ;;  %v5926_v10 = vld [vmem:[%s5982_s5] sm:$0xf] }
 0x296   :  { %v5918_v9 = vshrl.u32 %v2311_v53, 7  ;;  %v5501_v53 = vld [vmem:[#allocation11 + $0x32c] ss:$16 sps:$4 sm:$0xff]  }
 0x298   :  { %3944 = vmatpush1.bf16.msra.mxu1 %v5352_v57  ;;  %4026 = vmatpush1.bf16.msra.mxu0 %v5355_v11  ;;  %v5921_v52 = vsub.s32 0, %v5918_v9  ;;  %v5929_v57 = vsub.s32 1, %v5918_v9  ;;  %v5932_v11 = vsub.s32 3, %v5918_v9 }
 0x299   :  { %3945 = vmatprep.subr.bf16.mxu1 %v5360_v12  ;;  %4027 = vmatprep.subr.bf16.mxu0 %v5363_v56 }
 0x29a   :  { %v2314_v12 = vrot.slane %v5926_v10, %v5921_v52  ;;  %v2318_v56 = vrot.slane %v5926_v10, %v5929_v57 }
 0x29c   :  { %3946 = vmatpush1.bf16.msra.mxu1 %v5358_v46  ;;  %4028 = vmatpush1.bf16.msra.mxu0 %v5361_v13  ;;  %v2326_v46 = vrot.slane %v5926_v10, %v5932_v11 }
 0x29d   :  { %3947 = vmatprep.subr.bf16.mxu1 %v5366_v14  ;;  %4029 = vmatprep.subr.bf16.mxu0 %v5369_v15 }
 0x2a0   :  { %3948 = vmatpush1.bf16.msra.mxu1 %v5364_v16  ;;  %4030 = vmatpush1.bf16.msra.mxu0 %v5367_v17 }
 0x2a1   :  { %3949 = vmatprep.subr.bf16.mxu1 %v5372_v18  ;;  %4031 = vmatprep.subr.bf16.mxu0 %v5375_v19 }
 0x2a4   :  { %3950 = vmatpush1.bf16.msra.mxu1 %v5370_v20  ;;  %4032 = vmatpush1.bf16.msra.mxu0 %v5373_v21 }
 0x2a5   :  { %3951 = vmatprep.subr.bf16.mxu1 %v5378_v22  ;;  %4033 = vmatprep.subr.bf16.mxu0 %v5381_v24 }
 0x2a8   :  { %3952 = vmatpush1.bf16.msra.mxu1 %v5376_v25  ;;  %4034 = vmatpush1.bf16.msra.mxu0 %v5379_v27 }
 0x2a9   :  { %3953 = vmatprep.subr.bf16.mxu1 %v5384_v28  ;;  %4035 = vmatprep.subr.bf16.mxu0 %v5387_v29 }
 0x2ac   :  { %3954 = vmatpush1.bf16.msra.mxu1 %v5382_v30  ;;  %4036 = vmatpush1.bf16.msra.mxu0 %v5385_v31 }
 0x2ad   :  { %3955 = vmatprep.subr.bf16.mxu1 %v5390_v32  ;;  %4037 = vmatprep.subr.bf16.mxu0 %v5393_v33  ;;  %v5442_v32 = vld [vmem:[#allocation11 + $0x200] ss:$16 sps:$4 sm:$0xff]   ;;  %v5445_v33 = vld [vmem:[#allocation11 + $0x208] ss:$16 sps:$4 sm:$0xff]  }
 0x2b0   :  { %3956 = vmatpush1.bf16.msra.mxu1 %v5388_v23  ;;  %4038 = vmatpush1.bf16.msra.mxu0 %v5391_v34 }
 0x2b1   :  { %3957 = vmatprep.subr.bf16.mxu1 %v5396_v35  ;;  %4039 = vmatprep.subr.bf16.mxu0 %v5399_v36  ;;  %v5450_v35 = vld [vmem:[#allocation11 + $0x224] ss:$16 sps:$4 sm:$0xff]   ;;  %v5453_v36 = vld [vmem:[#allocation11 + $0x22c] ss:$16 sps:$4 sm:$0xff]  }
 0x2b4   :  { %3958 = vmatpush1.bf16.msra.mxu1 %v5394_v37  ;;  %4040 = vmatpush1.bf16.msra.mxu0 %v5397_v38  ;;  %v5448_v38 = vld [vmem:[#allocation11 + $0x220] ss:$16 sps:$4 sm:$0xff]  }
 0x2b5   :  { %3959 = vmatprep.subr.bf16.mxu1 %v5402_v39  ;;  %4041 = vmatprep.subr.bf16.mxu0 %v5405_v40  ;;  %v5451_v39 = vld [vmem:[#allocation11 + $0x228] ss:$16 sps:$4 sm:$0xff]   ;;  %v5456_v40 = vld [vmem:[#allocation11 + $0x244] ss:$16 sps:$4 sm:$0xff]  }
 0x2b8   :  { %3960 = vmatpush1.bf16.msra.mxu1 %v5400_v41  ;;  %4042 = vmatpush1.bf16.msra.mxu0 %v5403_v42  ;;  %v5459_v41 = vld [vmem:[#allocation11 + $0x24c] ss:$16 sps:$4 sm:$0xff]   ;;  %v5454_v42 = vld [vmem:[#allocation11 + $0x240] ss:$16 sps:$4 sm:$0xff]  }
 0x2b9   :  { %3961 = vmatprep.subr.bf16.mxu1 %v5408_v26  ;;  %4043 = vmatprep.subr.bf16.mxu0 %v5411_v43  ;;  %v5457_v26 = vld [vmem:[#allocation11 + $0x248] ss:$16 sps:$4 sm:$0xff]   ;;  %v5462_v43 = vld [vmem:[#allocation11 + $0x264] ss:$16 sps:$4 sm:$0xff]  }
 0x2bc   :  { %3962 = vmatpush1.bf16.msra.mxu1 %v5406_v44  ;;  %4044 = vmatpush1.bf16.msra.mxu0 %v5409_v45  ;;  %v5465_v44 = vld [vmem:[#allocation11 + $0x26c] ss:$16 sps:$4 sm:$0xff]   ;;  %v5460_v45 = vld [vmem:[#allocation11 + $0x260] ss:$16 sps:$4 sm:$0xff]  }
 0x2bd   :  { %3963 = vmatprep.subr.bf16.mxu1 %v5414_v47  ;;  %4045 = vmatprep.subr.bf16.mxu0 %v5417_v48  ;;  %v5463_v47 = vld [vmem:[#allocation11 + $0x268] ss:$16 sps:$4 sm:$0xff]   ;;  %v5468_v48 = vld [vmem:[#allocation11 + $0x284] ss:$16 sps:$4 sm:$0xff]  }
 0x2c0   :  { %3964 = vmatpush1.bf16.msra.mxu1 %v5412_v49  ;;  %4046 = vmatpush1.bf16.msra.mxu0 %v5415_v50  ;;  %v5471_v49 = vld [vmem:[#allocation11 + $0x28c] ss:$16 sps:$4 sm:$0xff]   ;;  %v5466_v50 = vld [vmem:[#allocation11 + $0x280] ss:$16 sps:$4 sm:$0xff]  }
 0x2c1   :  { %3965 = vmatprep.subr.bf16.mxu1 %v5420_v51  ;;  %4047 = vmatprep.subr.bf16.mxu0 %v5423_v54  ;;  %v5469_v51 = vld [vmem:[#allocation11 + $0x288] ss:$16 sps:$4 sm:$0xff]   ;;  %v5474_v54 = vld [vmem:[#allocation11 + $0x2a4] ss:$16 sps:$4 sm:$0xff]  }
 0x2c4   :  { %3966 = vmatpush1.bf16.msra.mxu1 %v5418_v55  ;;  %4048 = vmatpush1.bf16.msra.mxu0 %v5421_v58  ;;  %v5477_v55 = vld [vmem:[#allocation11 + $0x2ac] ss:$16 sps:$4 sm:$0xff]   ;;  %v5472_v58 = vld [vmem:[#allocation11 + $0x2a0] ss:$16 sps:$4 sm:$0xff]  }
 0x2c5   :  { %3967 = vmatprep.subr.bf16.mxu1 %v5426_v59  ;;  %4049 = vmatprep.subr.bf16.mxu0 %v5429_v60  ;;  %v5475_v59 = vld [vmem:[#allocation11 + $0x2a8] ss:$16 sps:$4 sm:$0xff]   ;;  %v5480_v60 = vld [vmem:[#allocation11 + $0x2c4] ss:$16 sps:$4 sm:$0xff]  }
 0x2c8   :  { %3968 = vmatpush1.bf16.msra.mxu1 %v5424_v61  ;;  %4050 = vmatpush1.bf16.msra.mxu0 %v5427_v63  ;;  %v5483_v61 = vld [vmem:[#allocation11 + $0x2cc] ss:$16 sps:$4 sm:$0xff]   ;;  %v5478_v63 = vld [vmem:[#allocation11 + $0x2c0] ss:$16 sps:$4 sm:$0xff]  }
 0x2c9   :  { %3969 = vmatprep.subr.bf16.mxu1 %v5432_v62  ;;  %4051 = vmatprep.subr.bf16.mxu0 %v5435_v1  ;;  %v5481_v62 = vld [vmem:[#allocation11 + $0x2c8] ss:$16 sps:$4 sm:$0xff]   ;;  %v5486_v1 = vld [vmem:[#allocation11 + $0x2e4] ss:$16 sps:$4 sm:$0xff]  }
 0x2cc   :  { %3970 = vmatpush1.bf16.msra.mxu1 %v5430_v3  ;;  %4052 = vmatpush1.bf16.msra.mxu0 %v5433_v4  ;;  %v5489_v3 = vld [vmem:[#allocation11 + $0x2ec] ss:$16 sps:$4 sm:$0xff]   ;;  %v5484_v4 = vld [vmem:[#allocation11 + $0x2e0] ss:$16 sps:$4 sm:$0xff]  }
 0x2cd   :  { %3971 = vmatprep.subr.bf16.mxu1 %v5438_v0  ;;  %4053 = vmatprep.subr.bf16.mxu0 %v5441_v6  ;;  %v5487_v0 = vld [vmem:[#allocation11 + $0x2e8] ss:$16 sps:$4 sm:$0xff]   ;;  %v5492_v6 = vld [vmem:[#allocation11 + $0x304] ss:$16 sps:$4 sm:$0xff]  }
 0x2d0   :  { %3972 = vmatpush1.bf16.msra.mxu1 %v5436_v7  ;;  %4054 = vmatpush1.bf16.msra.mxu0 %v5439_v2  ;;  %v5495_v7 = vld [vmem:[#allocation11 + $0x30c] ss:$16 sps:$4 sm:$0xff]   ;;  %v5490_v2 = vld [vmem:[#allocation11 + $0x300] ss:$16 sps:$4 sm:$0xff]  }
 0x2d1   :  { %3982 = vmatprep.subr.bf16.mxu1 %v5444_v5  ;;  %4064 = vmatprep.subr.bf16.mxu0 %v5447_v8  ;;  %v5493_v5 = vld [vmem:[#allocation11 + $0x308] ss:$16 sps:$4 sm:$0xff]   ;;  %v5498_v8 = vld [vmem:[#allocation11 + $0x324] ss:$16 sps:$4 sm:$0xff]  }
 0x366   :  { %v3046_v13 = vpop.f32.mrb[12].mxu1  ;;  %v5940_v14 = vpop.f32.mrb[12].mxu0 }
 0x367   :  { %v4710_v15 = vadd.f32 %v3046_v13, %v2314_v12  ;;  %v3048_v16 = vpop.f32.mrb[13].mxu1  ;;  %v3130_v17 = vpop.f32.mrb[13].mxu0  ;;  %v5496_v12 = vld [vmem:[#allocation11 + $0x320] ss:$16 sps:$4 sm:$0xff]   ;;  %v5507_v13 = vld [vmem:[#allocation11 + $0x34c] ss:$16 sps:$4 sm:$0xff]  }
 0x368   :  { %v4711_v18 = vadd.f32 %v3048_v16, %v2318_v56  ;;  %v4713_v19 = vadd.f32 %v3130_v17, %v2326_v46  ;;  %v3050_v20 = vpop.f32.mrb[14].mxu1  ;;  %v3132_v21 = vpop.f32.mrb[14].mxu0  ;;  %v5499_v56 = vld [vmem:[#allocation11 + $0x328] ss:$16 sps:$4 sm:$0xff]   ;;  %v5504_v46 = vld [vmem:[#allocation11 + $0x344] ss:$16 sps:$4 sm:$0xff]  }
 0x369   :  { %vm3135_vm5 = vcmp.gt.f32.partialorder %v4710_v15, 0.0  ;;  %v3139_v22 = vmul.f32 0.2, %v4710_v15  ;;  %v3051_v28 = vpop.f32.mrb[15].mxu1  ;;  %v3133_v29 = vpop.f32.mrb[15].mxu0 }
 0x36a   :  { %vm3136_vm6 = vcmp.gt.f32.partialorder %v4711_v18, 0.0  ;;  %v3140_v24 = vmul.f32 0.2, %v4711_v18  ;;  %vm3138_vm7 = vcmp.gt.f32.partialorder %v4713_v19, 0.0  ;;  %v3142_v25 = vmul.f32 0.2, %v4713_v19 }
 0x36b   :  { %v3143_v27 = vsel %vm3135_vm5, %v4710_v15, %v3139_v22  ;;  %v5502_v15 = vld [vmem:[#allocation11 + $0x340] ss:$16 sps:$4 sm:$0xff]   ;;  %v5505_v16 = vld [vmem:[#allocation11 + $0x348] ss:$16 sps:$4 sm:$0xff]   ;;  %v5510_v17 = vld [vmem:[#allocation11 + $0x364] ss:$16 sps:$4 sm:$0xff]  }
 0x36c   :  { %v3144_v30 = vsel %vm3136_vm6, %v4711_v18, %v3140_v24  ;;  %v3146_v23 = vsel %vm3138_vm7, %v4713_v19, %v3142_v25  ;;  %v3147_v34 = vpack.c.bf16 %v3143_v27, %v3143_v27  ;;  %v5513_v18 = vld [vmem:[#allocation11 + $0x36c] ss:$16 sps:$4 sm:$0xff]   ;;  %v5508_v19 = vld [vmem:[#allocation11 + $0x360] ss:$16 sps:$4 sm:$0xff]   ;;  %v5511_v20 = vld [vmem:[#allocation11 + $0x368] ss:$16 sps:$4 sm:$0xff]  }
 0x36d   :  { %v3148_v31 = vpack.c.bf16 %v3144_v30, %v3144_v30  ;;  %v3150_v37 = vpack.c.bf16 %v3146_v23, %v3146_v23  ;;  %v5516_v21 = vld [vmem:[#allocation11 + $0x384] ss:$16 sps:$4 sm:$0xff]   ;;  %v5519_v22 = vld [vmem:[#allocation11 + $0x38c] ss:$16 sps:$4 sm:$0xff]   ;;  %v5943_v24 = vsub.s32 2, %v5918_v9 }
 0x36e   :  { %v5514_v25 = vld [vmem:[#allocation11 + $0x380] ss:$16 sps:$4 sm:$0xff]   ;;  %v5517_v27 = vld [vmem:[#allocation11 + $0x388] ss:$16 sps:$4 sm:$0xff]   ;;  %v5522_v28 = vld [vmem:[#allocation11 + $0x3a4] ss:$16 sps:$4 sm:$0xff]  }
 0x36f   :  { %3973 = vmatprep.mubr.bf16.mxu1 %v3148_v31  ;;  %4055 = vmatprep.mubr.bf16.mxu0 %v3148_v31  ;;  %v5525_v29 = vld [vmem:[#allocation11 + $0x3ac] ss:$16 sps:$4 sm:$0xff]   ;;  %v2322_v30 = vrot.slane %v5926_v10, %v5943_v24  ;;  %v5520_v31 = vld [vmem:[#allocation11 + $0x3a0] ss:$16 sps:$4 sm:$0xff]  }
 0x370   :  { %3974 = vmatmul.mubr.bf16.vlgmr.msra.gmra.mrb[16].mxu1 %v3147_v34  ;;  %4056 = vmatmul.mubr.bf16.vlgmr.msra.gmra.mrb[16].mxu0 %v3147_v34  ;;  %v5531_v9 = vld [vmem:[#allocation11 + $0x3cc] ss:$16 sps:$4 sm:$0xff]   ;;  %v5526_v34 = vld [vmem:[#allocation11 + $0x3c0] ss:$16 sps:$4 sm:$0xff]  }
 0x371   :  { %3983 = vmatpush1.bf16.msra.mxu1 %v5442_v32  ;;  %4065 = vmatpush1.bf16.msra.mxu0 %v5445_v33  ;;  %v5523_v32 = vld [vmem:[#allocation11 + $0x3a8] ss:$16 sps:$4 sm:$0xff]   ;;  %v5528_v33 = vld [vmem:[#allocation11 + $0x3c4] ss:$16 sps:$4 sm:$0xff]   ;;  %v4712_v23 = vadd.f32 %v5940_v14, %v2322_v30  ;;  %v5532_v10 = vld [vmem:[#allocation11 + $0x3e0] ss:$16 sps:$4 sm:$0xff]  }
 0x372   :  { %4014 = vmatprep.mubr.bf16.mxu1 %v3150_v37  ;;  %4096 = vmatprep.mubr.bf16.mxu0 %v3150_v37  ;;  %v5537_v37 = vld [vmem:[#allocation11 + $0x3ec] ss:$16 sps:$4 sm:$0xff]  }
 0x373   :  { %3984 = vmatprep.subr.bf16.mxu1 %v5450_v35  ;;  %4066 = vmatprep.subr.bf16.mxu0 %v5453_v36  ;;  %v5529_v35 = vld [vmem:[#allocation11 + $0x3c8] ss:$16 sps:$4 sm:$0xff]   ;;  %v5534_v36 = vld [vmem:[#allocation11 + $0x3e4] ss:$16 sps:$4 sm:$0xff]   ;;  %vm3137_vm8 = vcmp.gt.f32.partialorder %v4712_v23, 0.0 }
 0x375   :  { %3985 = vmatpush1.bf16.msra.mxu1 %v5448_v38  ;;  %4067 = vmatpush1.bf16.msra.mxu0 %v5451_v39  ;;  %v3141_v38 = vmul.f32 0.2, %v4712_v23  ;;  %v5535_v39 = vld [vmem:[#allocation11 + $0x3e8] ss:$16 sps:$4 sm:$0xff]  }
 0x376   :  { %3986 = vmatprep.subr.bf16.mxu1 %v5456_v40  ;;  %4068 = vmatprep.subr.bf16.mxu0 %v5459_v41  ;;  %v3279_v41 = vld [vmem:[%s5984_s7] sm:$0xf] }
 0x377   :  { %v3145_v40 = vsel %vm3137_vm8, %v4712_v23, %v3141_v38 }
 0x378   :  { %v3149_v14 = vpack.c.bf16 %v3145_v40, %v3145_v40 }
 0x379   :  { %3987 = vmatpush1.bf16.msra.mxu1 %v5454_v42  ;;  %4069 = vmatpush1.bf16.msra.mxu0 %v5457_v26  ;;  %v3284_v42 = vrot.slane %v3279_v41, %v5921_v52  ;;  %v3292_v26 = vrot.slane %v3279_v41, %v5943_v24 }
 0x37a   :  { %3988 = vmatprep.subr.bf16.mxu1 %v5462_v43  ;;  %4070 = vmatprep.subr.bf16.mxu0 %v5465_v44  ;;  %v3288_v43 = vrot.slane %v3279_v41, %v5929_v57  ;;  %v3296_v44 = vrot.slane %v3279_v41, %v5932_v11 }
 0x37d   :  { %3989 = vmatpush1.bf16.msra.mxu1 %v5460_v45  ;;  %4071 = vmatpush1.bf16.msra.mxu0 %v5463_v47  ;;  %v4117_v45 = vld [vmem:[%s5985_s8] sm:$0xf] }
 0x37e   :  { %3990 = vmatprep.subr.bf16.mxu1 %v5468_v48  ;;  %4072 = vmatprep.subr.bf16.mxu0 %v5471_v49 }
 0x381   :  { %3991 = vmatpush1.bf16.msra.mxu1 %v5466_v50  ;;  %4073 = vmatpush1.bf16.msra.mxu0 %v5469_v51 }
 0x382   :  { %3992 = vmatprep.subr.bf16.mxu1 %v5474_v54  ;;  %4074 = vmatprep.subr.bf16.mxu0 %v5477_v55 }
 0x385   :  { %3993 = vmatpush1.bf16.msra.mxu1 %v5472_v58  ;;  %4075 = vmatpush1.bf16.msra.mxu0 %v5475_v59 }
 0x386   :  { %3994 = vmatprep.subr.bf16.mxu1 %v5480_v60  ;;  %4076 = vmatprep.subr.bf16.mxu0 %v5483_v61  ;;  %v4122_v61 = vrot.slane %v4117_v45, %v5921_v52  ;;  %v4134_v52 = vrot.slane %v4117_v45, %v5932_v11 }
 0x389   :  { %3995 = vmatpush1.bf16.msra.mxu1 %v5478_v63  ;;  %4077 = vmatpush1.bf16.msra.mxu0 %v5481_v62  ;;  %v4126_v63 = vrot.slane %v4117_v45, %v5929_v57 }
 0x38a   :  { %3996 = vmatprep.subr.bf16.mxu1 %v5486_v1  ;;  %4078 = vmatprep.subr.bf16.mxu0 %v5489_v3 }
 0x38d   :  { %3997 = vmatpush1.bf16.msra.mxu1 %v5484_v4  ;;  %4079 = vmatpush1.bf16.msra.mxu0 %v5487_v0 }
 0x38e   :  { %3998 = vmatprep.subr.bf16.mxu1 %v5492_v6  ;;  %4080 = vmatprep.subr.bf16.mxu0 %v5495_v7 }
 0x391   :  { %3999 = vmatpush1.bf16.msra.mxu1 %v5490_v2  ;;  %4081 = vmatpush1.bf16.msra.mxu0 %v5493_v5  ;;  %v4130_v2 = vrot.slane %v4117_v45, %v5943_v24 }
 0x392   :  { %4000 = vmatprep.subr.bf16.mxu1 %v5498_v8  ;;  %4082 = vmatprep.subr.bf16.mxu0 %v5501_v53 }
 0x395   :  { %4001 = vmatpush1.bf16.msra.mxu1 %v5496_v12  ;;  %4083 = vmatpush1.bf16.msra.mxu0 %v5499_v56 }
 0x396   :  { %4002 = vmatprep.subr.bf16.mxu1 %v5504_v46  ;;  %4084 = vmatprep.subr.bf16.mxu0 %v5507_v13 }
 0x399   :  { %4003 = vmatpush1.bf16.msra.mxu1 %v5502_v15  ;;  %4085 = vmatpush1.bf16.msra.mxu0 %v5505_v16 }
 0x39a   :  { %4004 = vmatprep.subr.bf16.mxu1 %v5510_v17  ;;  %4086 = vmatprep.subr.bf16.mxu0 %v5513_v18  ;;  %v4697_v17 = vld [vmem:[%s5986_s9] ss:$0 sm:$0xff] }
 0x39d   :  { %4005 = vmatpush1.bf16.msra.mxu1 %v5508_v19  ;;  %4087 = vmatpush1.bf16.msra.mxu0 %v5511_v20 }
 0x39e   :  { %4006 = vmatprep.subr.bf16.mxu1 %v5516_v21  ;;  %4088 = vmatprep.subr.bf16.mxu0 %v5519_v22 }
 0x3a1   :  { %4007 = vmatpush1.bf16.msra.mxu1 %v5514_v25  ;;  %4089 = vmatpush1.bf16.msra.mxu0 %v5517_v27 }
 0x3a2   :  { %4008 = vmatprep.subr.bf16.mxu1 %v5522_v28  ;;  %4090 = vmatprep.subr.bf16.mxu0 %v5525_v29 }
 0x3a5   :  { %4009 = vmatpush1.bf16.msra.mxu1 %v5520_v31  ;;  %4091 = vmatpush1.bf16.msra.mxu0 %v5523_v32 }
 0x3a6   :  { %4010 = vmatprep.subr.bf16.mxu1 %v5528_v33  ;;  %4092 = vmatprep.subr.bf16.mxu0 %v5531_v9 }
 0x3a9   :  { %4011 = vmatpush1.bf16.msra.mxu1 %v5526_v34  ;;  %4093 = vmatpush1.bf16.msra.mxu0 %v5529_v35 }
 0x3aa   :  { %4012 = vmatprep.subr.bf16.mxu1 %v5534_v36  ;;  %4094 = vmatprep.subr.bf16.mxu0 %v5537_v37 }
 0x3ad   :  { %4013 = vmatpush1.bf16.msra.mxu1 %v5532_v10  ;;  %4095 = vmatpush1.bf16.msra.mxu0 %v5535_v39 }
 0x3b0   :  { %4015 = vmatmul.mubr.bf16.vlgmr.msra.gmra.mrb[16].mxu1 %v3149_v14  ;;  %4097 = vmatmul.mubr.bf16.vlgmr.msra.gmra.mrb[16].mxu0 %v3149_v14 }
 0x483   :  { %v4016_v47 = vpop.f32.mrb[16].mxu1  ;;  %v4098_v48 = vpop.f32.mrb[16].mxu0 }
 0x484   :  { %v4714_v49 = vadd.f32 %v4016_v47, %v3284_v42  ;;  %v4716_v50 = vadd.f32 %v4098_v48, %v3292_v26  ;;  %v4018_v51 = vpop.f32.mrb[17].mxu1  ;;  %v4100_v54 = vpop.f32.mrb[17].mxu0 }
 0x485   :  { %v4715_v55 = vadd.f32 %v4018_v51, %v3288_v43  ;;  %v4717_v58 = vadd.f32 %v4100_v54, %v3296_v44  ;;  %v4020_v59 = vpop.f32.mrb[18].mxu1  ;;  %v4102_v60 = vpop.f32.mrb[18].mxu0 }
 0x486   :  { %vm4105_vm9 = vcmp.gt.f32.partialorder %v4714_v49, 0.0  ;;  %v4109_v62 = vmul.f32 0.2, %v4714_v49  ;;  %vm4107_vm10 = vcmp.gt.f32.partialorder %v4716_v50, 0.0  ;;  %v4111_v1 = vmul.f32 0.2, %v4716_v50 }
 0x487   :  { %vm4106_vm11 = vcmp.gt.f32.partialorder %v4715_v55, 0.0  ;;  %v4110_v3 = vmul.f32 0.2, %v4715_v55  ;;  %v4112_v4 = vmul.f32 0.2, %v4717_v58  ;;  %vm4108_vm12 = vcmp.gt.f32.partialorder %v4717_v58, 0.0 }
 0x488   :  { %v4113_v0 = vsel %vm4105_vm9, %v4714_v49, %v4109_v62  ;;  %v4021_v6 = vpop.f32.mrb[19].mxu1  ;;  %v4103_v7 = vpop.f32.mrb[19].mxu0  ;;  %v4115_v8 = vsel %vm4107_vm10, %v4716_v50, %v4111_v1 }
 0x489   :  { %v4114_v5 = vsel %vm4106_vm11, %v4715_v55, %v4110_v3  ;;  %v4139_v53 = vmul.f32 %v4122_v61, %v4113_v0  ;;  %v4116_v57 = vsel %vm4108_vm12, %v4717_v58, %v4112_v4  ;;  %v4141_v56 = vmul.f32 %v4130_v2, %v4115_v8 }
 0x48a   :  { %v4140_v12 = vmul.f32 %v4126_v63, %v4114_v5  ;;  %v4142_v13 = vmul.f32 %v4134_v52, %v4116_v57 }
 0x48c   :  { %v4143_v46 = vadd.f32 %v4140_v12, %v4139_v53 }
 0x48e   :  { %v4144_v15 = vadd.f32 %v4143_v46, %v4141_v56 }
 0x490   :  { %v4145_v16 = vadd.f32 %v4144_v15, %v4142_v13 }
 0x492   :  { %4146 = vadd.xlane.f32.xlu0 %v4145_v16 }
 0x51f   :  { %v4147_v18 = vpop.xlane.xlu0 %4146 }
 0x520   :  { %v4155_v19 = vadd.f32 %v4697_v17, %v4147_v18 }
 0x522   :  { %4156 = vst [vmem:[#allocation13] sm:$0xff] %v4155_v19 }
 0x523   :  { %5681 = shalt.err (!%p5678_p10)
}
 0x524   :  { %s5682_s16 = scalar_lea.hbm %s5987_s10, 128 }
 0x525   :  { %p5683_p11 = scmp.ne.s32.totalorder %s5987_s10, %s5682_s16  ;;  %p5686_p12 = scmp.lt.u32.totalorder %s5682_s16, %s5987_s10 }
 0x527   :  { %p5688_p13 = pnand %p5686_p12, %p5683_p11 }
 0x529   :  { %5691 = shalt.err (!%p5688_p13)
}
 0x52a   :  { %4166 = dma.vmem_to_hbm [thread:$0]  %s4164_s27, 128, %s5987_s10, [#allocation4]  }
 0x52b   :  { %5700 = dma.done.wait [#allocation4], 128  }
 0x52c   :  { %5701 = vsyncadd [#allocation4], 4294967168 }
 0x52d   :  { %4170 = vsyncpa [#allocation3], 1 }
 0x52e   :  { %4171 = vsyncpa [#allocation6], 1 }
 0x52f   :  { %4172 = vsyncpa [#allocation9], 1 }
 0x530   :  { %4173 = vsyncpa [#allocation12], 1 }
 0x531   :  { %4174 = vsyncpa [#allocation4], 1 }

</bundles_post_ra>
